<compile_context>
chip_gen: v7x
topology: tpu7x:2x2x1
jax: 0.10.0
libtpu: 0.0.40
codegen_flags: <defaults>
</compile_context>

<pallas_src>
import math
import numpy as np
import jax
import jax.numpy as jnp
from jax.experimental import pallas as pl
from jax.experimental.pallas import tpu as pltpu

NUM_HEADS = 8  # GlobalAttention(transformer_num_heads=8)


# ----------------------------------------------------------------------------
# Pallas kernel: one transformer block per inner grid step, one M tile per
# outer grid step; head (avg-pool + locout) fused into the final block.
# ----------------------------------------------------------------------------
def transformer_stack_kernel(x_hbm_ref, loc_w_ref, loc_b_ref,
                             wq_ref, bq_ref, wk_ref, bk_ref, wv_ref, bv_ref,
                             wo_ref, bo_ref,
                             w1a_ref, w1b_ref, s1_ref, t1_ref,
                             w2_ref, s2_ref, t2_ref,
                             out_ref, state_ref, x_sem):
    mi = pl.program_id(0)
    n = pl.program_id(1)
    TM, N, C = state_ref.shape
    H = NUM_HEADS
    Dh = C // H

    # Seed the resident xloc state once per M tile: manual DMA straight from
    # HBM into the scratch (x is never held in a double-buffered input block).
    @pl.when(n == 0)
    def _():
        cp = pltpu.make_async_copy(x_hbm_ref.at[pl.ds(mi * TM, TM)],
                                   state_ref, x_sem)
        cp.start()
        cp.wait()

    x = state_ref[...]                       # (TM, N, C) f32 running xloc
    x2 = x.reshape(TM * N, C)
    x2_bf = x2.astype(jnp.bfloat16)

    # --- GlobalAttention: full-width Q/K/V projections (bf16 in, f32 acc).
    # The 1/sqrt(Dh) score scale is folded into wq/bq at init time.
    q = jnp.dot(x2_bf, wq_ref[0], preferred_element_type=jnp.float32) + bq_ref[0]
    k = jnp.dot(x2_bf, wk_ref[0], preferred_element_type=jnp.float32) + bk_ref[0]
    v = jnp.dot(x2_bf, wv_ref[0], preferred_element_type=jnp.float32) + bv_ref[0]

    # Cast to bf16 BEFORE any per-head slicing so any relayout moves half the
    # bytes; no head-stack or head-merge concatenation buffers are ever built.
    q_bf = q.astype(jnp.bfloat16).reshape(TM, N, C)
    k_bf = k.astype(jnp.bfloat16).reshape(TM, N, C)
    v_bf = v.astype(jnp.bfloat16).reshape(TM, N, C)

    # Per-head attention with the output projection folded per head:
    #     attn_out = bo + sum_h ctx_h @ wo[h]
    # wo is pre-split to (H, Dh, C) at init, so neither q/k/v heads nor the
    # context ever need to be re-assembled (lane-concat) back to (.., C).
    attn_acc = None
    for h in range(H):
        sl = slice(h * Dh, (h + 1) * Dh)
        qh = q_bf[:, :, sl]                  # (TM, N, Dh) bf16
        kh = k_bf[:, :, sl]
        vh = v_bf[:, :, sl]
        s = jnp.einsum('bnd,bmd->bnm', qh, kh,
                       preferred_element_type=jnp.float32)       # (TM, N, N)
        s = s - jnp.max(s, axis=-1, keepdims=True)
        p = jnp.exp(s)
        p = p * pl.reciprocal(jnp.sum(p, axis=-1, keepdims=True), approx=True)
        # TODO(synk): attn_dropout / proj_dropout (p=drop_rate) are stochastic;
        # implemented as identity (eval-mode semantics).
        ctx = jnp.einsum('bnm,bmd->bnd', p.astype(jnp.bfloat16), vh,
                         preferred_element_type=jnp.float32)     # (TM, N, Dh)
        contrib = jnp.dot(ctx.reshape(TM * N, Dh).astype(jnp.bfloat16),
                          wo_ref[0, h], preferred_element_type=jnp.float32)
        attn_acc = contrib if attn_acc is None else attn_acc + contrib
    attn_out = attn_acc + bo_ref[0]                              # (TM*N, C)

    # --- Feedforward.  torch.cat([tmp, xloc], dim=1) + 1x1 conv (2C -> C) is
    # computed as two aligned (TM*N,C)x(C,C) matmuls (w1 split at init), so no
    # (TM*N, 2C) concat is ever materialized.
    h1 = (jnp.dot(attn_out.astype(jnp.bfloat16), w1a_ref[0],
                  preferred_element_type=jnp.float32)
          + jnp.dot(x2_bf, w1b_ref[0], preferred_element_type=jnp.float32))
    h1 = jnp.maximum(h1 * s1_ref[0] + t1_ref[0], 0.0)           # conv1 + BN + ReLU
    h2 = jnp.dot(h1.astype(jnp.bfloat16), w2_ref[0],
                 preferred_element_type=jnp.float32)
    h2 = jnp.maximum(h2 * s2_ref[0] + t2_ref[0], 0.0)           # conv2 + BN + ReLU

    new_state = x + h2.reshape(TM, N, C)                        # residual xloc += tmp
    state_ref[...] = new_state

    # --- Fused head on the final block: AdaptiveAvgPool2d(1) == mean over
    # tokens; locout Linear(C,1) as a lane reduction (no second pallas_call).
    @pl.when(n == pl.num_programs(1) - 1)
    def _():
        pooled = jnp.mean(new_state, axis=1)                    # (TM, C)
        out_ref[...] = (jnp.sum(pooled * loc_w_ref[...], axis=-1, keepdims=True)
                        + loc_b_ref[...])


# ----------------------------------------------------------------------------
# Wrapper: tiling / VMEM sizing / pallas_call plumbing.
# ----------------------------------------------------------------------------
def _vmem_capacity_bytes():
    cap = 64 * 1024 * 1024                    # conservative (v7x per-TC) fallback
    try:
        info = pltpu.get_tpu_info()
        cap = int(getattr(info, 'vmem_capacity_bytes', cap) or cap)
    except Exception:
        pass
    return cap


def _pick_tm(M, N, C, cap_bytes):
    """Largest divisor of M (multiple of 8, or M itself) whose per-tile
    activation footprint (state + in-kernel temporaries) fits a VMEM slice."""
    per_row = 48 * N * C                      # ~bytes of state + f32/bf16 temps per m row
    budget = max(int(0.35 * cap_bytes), 4 * 1024 * 1024)
    cands = [tm for tm in range(1, M + 1)
             if M % tm == 0 and (tm == M or tm % 8 == 0)]
    fitting = [tm for tm in cands if tm * per_row <= budget]
    return max(fitting) if fitting else min(cands)


def run_model(xseq_all, params):
    """All nblock transformer blocks + head for all batched patches at once."""
    M, N, C = xseq_all.shape
    nblock = params['wq'].shape[0]
    H = NUM_HEADS

    cap = _vmem_capacity_bytes()
    TM = _pick_tm(M, N, C, cap)
    num_m = M // TM

    weight_keys = ['wq', 'bq', 'wk', 'bk', 'wv', 'bv', 'wo', 'bo',
                   'w1a', 'w1b', 's1', 't1', 'w2', 's2', 't2']

    def per_block_spec(shape):
        nd = len(shape)
        return pl.BlockSpec((1,) + shape[1:],
                            lambda m, n, _nd=nd: (n,) + (0,) * (_nd - 1))

    in_specs = [pl.BlockSpec(memory_space=pl.ANY),               # x: raw HBM, manual DMA
                pl.BlockSpec((1, C), lambda m, n: (0, 0)),       # locout weight (1, C)
                pl.BlockSpec((1, 1), lambda m, n: (0, 0))]       # locout bias
    args = [xseq_all, params['loc_w'], params['loc_b']]
    wblock_bytes = 0
    for kkey in weight_keys:
        w = params[kkey]
        in_specs.append(per_block_spec(w.shape))
        args.append(w)
        wblock_bytes += int(np.prod(w.shape[1:])) * w.dtype.itemsize

    # VMEM limit derived from the actual per-step footprint (state scratch +
    # double-buffered per-block weights + in-kernel temporaries) and clamped to
    # the chip's capacity — replaces the old hard-coded 48 MiB.
    act_bytes = TM * N * C * 4                                   # resident state
    tmp_bytes = 48 * TM * N * C                                  # q/k/v/h1/h2/... temps
    need = act_bytes + 2 * wblock_bytes + tmp_bytes + (2 << 20)
    vmem_limit = int(min(0.85 * cap, max(1.3 * need, 16 * 1024 * 1024)))

    # Advisory cost estimate: 7 big (M*N,C)x(C,C) matmuls per block + attention.
    flops = nblock * (2 * M * N * C * C * 7 + 4 * M * N * N * C) + 2 * M * C
    transcend = nblock * H * M * N * N
    bytes_accessed = (xseq_all.size * 4 + M * 4
                      + num_m * nblock * wblock_bytes)

    return pl.pallas_call(
        transformer_stack_kernel,
        out_shape=jax.ShapeDtypeStruct((M, 1), jnp.float32),
        grid=(num_m, nblock),
        in_specs=in_specs,
        out_specs=pl.BlockSpec((TM, 1), lambda m, n: (m, 0)),
        scratch_shapes=[pltpu.VMEM((TM, N, C), jnp.float32),     # running xloc
                        pltpu.SemaphoreType.DMA(())],
        compiler_params=pltpu.CompilerParams(
            dimension_semantics=("parallel", "arbitrary"),
            vmem_limit_bytes=vmem_limit),
        cost_estimate=pl.CostEstimate(flops=int(flops),
                                      transcendentals=int(transcend),
                                      bytes_accessed=int(bytes_accessed)),
    )(*args)


# ----------------------------------------------------------------------------
# Stand-in backbone (plain-JAX glue).
# TODO(synk): vnet.VGG8 / rnet.resnet18 are external modules not provided in
# the source; replaced by a deterministic stand-in (3x3 conv + folded-BN + ReLU
# + adaptive avg-pool to a fixed 4x4 feature grid) so the transformer hot path
# sees the same (B, C, H1, W1) -> (B, N, C) contract.  The fixed 4x4 grid also
# lets all patch sizes be batched into one kernel call; with a real backbone
# whose N varies with patch size, batch per patch-size group instead.
# ----------------------------------------------------------------------------
def standin_backbone(patch, params, feat_hw=4):
    y = jax.lax.conv_general_dilated(
        patch, params['bb_w'], window_strides=(1, 1), padding='SAME',
        dimension_numbers=('NCHW', 'OIHW', 'NCHW'))
    y = y * params['bb_s'][None, :, None, None] + params['bb_t'][None, :, None, None]
    y = jnp.maximum(y, 0.0)
    B, C, Hh, Ww = y.shape
    y = y.reshape(B, C, feat_hw, Hh // feat_hw,
                  feat_hw, Ww // feat_hw).mean(axis=(3, 5))
    # NCHW feature map -> token layout (B, N, C)
    return y.reshape(B, C, feat_hw * feat_hw).transpose(0, 2, 1)


def init_params(key, cin, C, nblock):
    keys = iter(jax.random.split(key, 64))

    def nrm(shape, scale):
        return (scale * jax.random.normal(next(keys), shape)).astype(jnp.float32)

    eps = 1e-5

    def bn_fold(gamma, beta):
        # TODO(synk): eval-mode BatchNorm folded assuming running_mean=0,
        # running_var=1 (true for the stand-in init, not pretrained stats).
        return gamma / jnp.sqrt(1.0 + eps), beta

    p = {}
    p['bb_w'] = nrm((C, cin, 3, 3), 0.1)
    p['bb_s'], p['bb_t'] = bn_fold(1.0 + nrm((C,), 0.01), nrm((C,), 0.01))

    def stack(shape, scale):
        return nrm((nblock,) + shape, scale)

    H = NUM_HEADS
    Dh = C // H
    inv = 1.0 / math.sqrt(C)
    qk_scale = 1.0 / math.sqrt(Dh)            # folded attention score scale
    bf16 = jnp.bfloat16
    p['wq'] = (stack((C, C), inv) * qk_scale).astype(bf16)
    p['bq'] = stack((1, C), 0.01) * qk_scale
    p['wk'] = stack((C, C), inv).astype(bf16);  p['bk'] = stack((1, C), 0.01)
    p['wv'] = stack((C, C), inv).astype(bf16);  p['bv'] = stack((1, C), 0.01)
    # Output projection stored per head (H, Dh, C): rows h*Dh..(h+1)*Dh of the
    # dense (C, C) matrix — lets the kernel fold O-proj per head (no concat).
    p['wo'] = stack((C, C), inv).reshape(nblock, H, Dh, C).astype(bf16)
    p['bo'] = stack((1, C), 0.01)
    inv2 = 1.0 / math.sqrt(2 * C)
    p['w1a'] = stack((C, C), inv2).astype(bf16)   # rows acting on attention out
    p['w1b'] = stack((C, C), inv2).astype(bf16)   # rows acting on residual xloc
    p['s1'], p['t1'] = bn_fold(1.0 + stack((1, C), 0.01), stack((1, C), 0.01))
    p['w2'] = stack((C, C), inv).astype(bf16)
    p['s2'], p['t2'] = bn_fold(1.0 + stack((1, C), 0.01), stack((1, C), 0.01))
    p['loc_w'] = nrm((1, C), inv)                 # locout Linear(C, 1), row form
    p['loc_b'] = nrm((1, 1), 0.01)
    return p


def local_brain_age_forward(xinput, params, nPoints, scale_cand, rng):
    B, _, H, W = xinput.shape
    seqs, poslist = [], []
    for _ in range(nPoints):
        idx = rng.randint(len(scale_cand))
        patch_size = scale_cand[idx]
        y = rng.randint(H - patch_size)
        x = rng.randint(W - patch_size)
        locx = xinput[:, :, y:y + patch_size, x:x + patch_size]
        poslist.append([y, x, patch_size])
        seqs.append(standin_backbone(locx, params))          # (B, N, C)

    # Batch every patch into one kernel call: weights stream from HBM once per
    # (m-tile, transformer block) for all nPoints patches.
    xseq_all = jnp.concatenate(seqs, axis=0)                  # (nPoints*B, N, C)
    out_all = run_model(xseq_all, params)                     # (nPoints*B, 1)
    out_all = out_all.reshape(nPoints, B, 1)
    outlist = [out_all[i] for i in range(nPoints)]
    return outlist, poslist


if __name__ == "__main__":
    B, Cin, H, W = 2, 4, 16, 16
    C = 128         # hidden_size (512 in the original, scaled down; kept a
                    # multiple of 128 so vreg lanes / MXU columns are full)
    nblock = 2      # nblock (12 in the original, scaled down)
    nPoints = 3
    # scaled-down analogue of self.scale_candede for a 16x16 input
    scale_cand = [4, 8, 12]

    key = jax.random.PRNGKey(0)
    kx, kp = jax.random.split(key)
    xinput = jax.random.normal(kx, (B, Cin, H, W), dtype=jnp.float32)
    params = init_params(kp, Cin, C, nblock)

    rng = np.random.RandomState(0)   # deterministic stand-in for np.random in forward()
    outlist, poslist = local_brain_age_forward(xinput, params, nPoints, scale_cand, rng)

    outs = jax.block_until_ready(jnp.stack(outlist))
    assert outs.shape == (nPoints, B, 1)
    assert len(poslist) == nPoints
    assert bool(jnp.all(jnp.isfinite(outs)))
    print("KERNEL_OK")
</pallas_src>

<mosaic_0001>
module attributes {stable_mosaic.version = 11 : i64} {
  func.func @transformer_stack_kernel(%arg0: i32, %arg1: i32, %arg2: memref<6x16x128xf32, #tpu.memory_space<any>>, %arg3: memref<1x128xf32, #tpu.memory_space<vmem>>, %arg4: memref<1x1xf32, #tpu.memory_space<vmem>>, %arg5: memref<1x128x128xbf16, #tpu.memory_space<vmem>>, %arg6: memref<1x1x128xf32, #tpu.memory_space<vmem>>, %arg7: memref<1x128x128xbf16, #tpu.memory_space<vmem>>, %arg8: memref<1x1x128xf32, #tpu.memory_space<vmem>>, %arg9: memref<1x128x128xbf16, #tpu.memory_space<vmem>>, %arg10: memref<1x1x128xf32, #tpu.memory_space<vmem>>, %arg11: memref<1x8x16x128xbf16, #tpu.memory_space<vmem>>, %arg12: memref<1x1x128xf32, #tpu.memory_space<vmem>>, %arg13: memref<1x128x128xbf16, #tpu.memory_space<vmem>>, %arg14: memref<1x128x128xbf16, #tpu.memory_space<vmem>>, %arg15: memref<1x1x128xf32, #tpu.memory_space<vmem>>, %arg16: memref<1x1x128xf32, #tpu.memory_space<vmem>>, %arg17: memref<1x128x128xbf16, #tpu.memory_space<vmem>>, %arg18: memref<1x1x128xf32, #tpu.memory_space<vmem>>, %arg19: memref<1x1x128xf32, #tpu.memory_space<vmem>>, %arg20: memref<6x1xf32, #tpu.memory_space<vmem>>, %arg21: memref<6x16x128xf32, #tpu.memory_space<vmem>>, %arg22: memref<!tpu.dma_semaphore, #tpu.memory_space<semaphore_mem>>) attributes {dimension_semantics = [#tpu.dimension_semantics<parallel>, #tpu.dimension_semantics<arbitrary>], iteration_bounds = array<i64: 1, 2>, scalar_prefetch = 0 : i64, scratch_operands = 2 : i64, tpu.core_type = #tpu.core_type<tc>, window_params = [{}, {pipeline_mode = #tpu.pipeline_mode<synchronous>, transform_indices = @transform_1, window_bounds = array<i64: 1, 128>}, {pipeline_mode = #tpu.pipeline_mode<synchronous>, transform_indices = @transform_2, window_bounds = array<i64: 1, 1>}, {transform_indices = @transform_3, window_bounds = array<i64: 1, 128, 128>}, {transform_indices = @transform_4, window_bounds = array<i64: 1, 1, 128>}, {transform_indices = @transform_5, window_bounds = array<i64: 1, 128, 128>}, {transform_indices = @transform_6, window_bounds = array<i64: 1, 1, 128>}, {transform_indices = @transform_7, window_bounds = array<i64: 1, 128, 128>}, {transform_indices = @transform_8, window_bounds = array<i64: 1, 1, 128>}, {transform_indices = @transform_9, window_bounds = array<i64: 1, 8, 16, 128>}, {transform_indices = @transform_10, window_bounds = array<i64: 1, 1, 128>}, {transform_indices = @transform_11, window_bounds = array<i64: 1, 128, 128>}, {transform_indices = @transform_12, window_bounds = array<i64: 1, 128, 128>}, {transform_indices = @transform_13, window_bounds = array<i64: 1, 1, 128>}, {transform_indices = @transform_14, window_bounds = array<i64: 1, 1, 128>}, {transform_indices = @transform_15, window_bounds = array<i64: 1, 128, 128>}, {transform_indices = @transform_16, window_bounds = array<i64: 1, 1, 128>}, {transform_indices = @transform_17, window_bounds = array<i64: 1, 1, 128>}, {transform_indices = @transform_18, window_bounds = array<i64: 6, 1>}]} {
    %c0_i32 = arith.constant 0 : i32
    %0 = arith.cmpi eq, %arg1, %c0_i32 : i32
    %1 = arith.extui %0 : i1 to i32
    %c0_i32_0 = arith.constant 0 : i32
    %2 = arith.cmpi ne, %1, %c0_i32_0 : i32
    scf.if %2 {
      %c6_i32 = arith.constant 6 : i32
      %250 = arith.muli %arg0, %c6_i32 : i32
      %c0_i32_121 = arith.constant 0 : i32
      %c0_i32_122 = arith.constant 0 : i32
      %251 = tpu.memref_slice %arg2[%250, %c0_i32_121, %c0_i32_122] : memref<6x16x128xf32, #tpu.memory_space<any>> -> memref<6x16x128xf32, #tpu.memory_space<any>>
      tpu.enqueue_dma source(%251 : memref<6x16x128xf32, #tpu.memory_space<any>>) target(%arg21 : memref<6x16x128xf32, #tpu.memory_space<vmem>>) target_semaphore(%arg22 : memref<!tpu.dma_semaphore, #tpu.memory_space<semaphore_mem>>)
      %c0_i32_123 = arith.constant 0 : i32
      %c0_i32_124 = arith.constant 0 : i32
      %252 = tpu.memref_slice %arg2[%250, %c0_i32_123, %c0_i32_124] : memref<6x16x128xf32, #tpu.memory_space<any>> -> memref<6x16x128xf32, #tpu.memory_space<any>>
      tpu.wait_dma2 semaphore(%arg22 : memref<!tpu.dma_semaphore, #tpu.memory_space<semaphore_mem>>) src(%252 : memref<6x16x128xf32, #tpu.memory_space<any>>) dst(%arg21 : memref<6x16x128xf32, #tpu.memory_space<vmem>>)
    } else {
    }
    %c0 = arith.constant 0 : index
    %c0_1 = arith.constant 0 : index
    %c0_2 = arith.constant 0 : index
    %3 = vector.load %arg21[%c0, %c0_1, %c0_2] : memref<6x16x128xf32, #tpu.memory_space<vmem>>, vector<6x16x128xf32>
    %4 = vector.shape_cast %3 : vector<6x16x128xf32> to vector<96x128xf32>
    %5 = arith.truncf %4 : vector<96x128xf32> to vector<96x128xbf16>
    %c0_3 = arith.constant 0 : index
    %c0_4 = arith.constant 0 : index
    %c0_5 = arith.constant 0 : index
    %6 = vector.load %arg5[%c0_3, %c0_4, %c0_5] : memref<1x128x128xbf16, #tpu.memory_space<vmem>>, vector<1x128x128xbf16>
    %7 = vector.shape_cast %6 : vector<1x128x128xbf16> to vector<128x128xbf16>
    %cst = arith.constant dense<0.000000e+00> : vector<96x128xf32>
    %8 = tpu.matmul %5, %7, %cst {dimension_numbers = #tpu.dot_dimension_numbers<[1], [0], [0], [1], [0, 0, 1, 1], [], []>} : vector<96x128xbf16>, vector<128x128xbf16>, vector<96x128xf32> -> vector<96x128xf32>
    %c0_6 = arith.constant 0 : index
    %c0_7 = arith.constant 0 : index
    %c0_8 = arith.constant 0 : index
    %9 = vector.load %arg6[%c0_6, %c0_7, %c0_8] : memref<1x1x128xf32, #tpu.memory_space<vmem>>, vector<1x1x128xf32>
    %10 = vector.shape_cast %9 : vector<1x1x128xf32> to vector<1x128xf32>
    %11 = vector.broadcast %10 : vector<1x128xf32> to vector<96x128xf32>
    %12 = arith.addf %8, %11 : vector<96x128xf32>
    %c0_9 = arith.constant 0 : index
    %c0_10 = arith.constant 0 : index
    %c0_11 = arith.constant 0 : index
    %13 = vector.load %arg7[%c0_9, %c0_10, %c0_11] : memref<1x128x128xbf16, #tpu.memory_space<vmem>>, vector<1x128x128xbf16>
    %14 = vector.shape_cast %13 : vector<1x128x128xbf16> to vector<128x128xbf16>
    %cst_12 = arith.constant dense<0.000000e+00> : vector<96x128xf32>
    %15 = tpu.matmul %5, %14, %cst_12 {dimension_numbers = #tpu.dot_dimension_numbers<[1], [0], [0], [1], [0, 0, 1, 1], [], []>} : vector<96x128xbf16>, vector<128x128xbf16>, vector<96x128xf32> -> vector<96x128xf32>
    %c0_13 = arith.constant 0 : index
    %c0_14 = arith.constant 0 : index
    %c0_15 = arith.constant 0 : index
    %16 = vector.load %arg8[%c0_13, %c0_14, %c0_15] : memref<1x1x128xf32, #tpu.memory_space<vmem>>, vector<1x1x128xf32>
    %17 = vector.shape_cast %16 : vector<1x1x128xf32> to vector<1x128xf32>
    %18 = vector.broadcast %17 : vector<1x128xf32> to vector<96x128xf32>
    %19 = arith.addf %15, %18 : vector<96x128xf32>
    %c0_16 = arith.constant 0 : index
    %c0_17 = arith.constant 0 : index
    %c0_18 = arith.constant 0 : index
    %20 = vector.load %arg9[%c0_16, %c0_17, %c0_18] : memref<1x128x128xbf16, #tpu.memory_space<vmem>>, vector<1x128x128xbf16>
    %21 = vector.shape_cast %20 : vector<1x128x128xbf16> to vector<128x128xbf16>
    %cst_19 = arith.constant dense<0.000000e+00> : vector<96x128xf32>
    %22 = tpu.matmul %5, %21, %cst_19 {dimension_numbers = #tpu.dot_dimension_numbers<[1], [0], [0], [1], [0, 0, 1, 1], [], []>} : vector<96x128xbf16>, vector<128x128xbf16>, vector<96x128xf32> -> vector<96x128xf32>
    %c0_20 = arith.constant 0 : index
    %c0_21 = arith.constant 0 : index
    %c0_22 = arith.constant 0 : index
    %23 = vector.load %arg10[%c0_20, %c0_21, %c0_22] : memref<1x1x128xf32, #tpu.memory_space<vmem>>, vector<1x1x128xf32>
    %24 = vector.shape_cast %23 : vector<1x1x128xf32> to vector<1x128xf32>
    %25 = vector.broadcast %24 : vector<1x128xf32> to vector<96x128xf32>
    %26 = arith.addf %22, %25 : vector<96x128xf32>
    %27 = arith.truncf %12 : vector<96x128xf32> to vector<96x128xbf16>
    %28 = vector.shape_cast %27 : vector<96x128xbf16> to vector<6x16x128xbf16>
    %29 = arith.truncf %19 : vector<96x128xf32> to vector<96x128xbf16>
    %30 = vector.shape_cast %29 : vector<96x128xbf16> to vector<6x16x128xbf16>
    %31 = arith.truncf %26 : vector<96x128xf32> to vector<96x128xbf16>
    %32 = vector.shape_cast %31 : vector<96x128xbf16> to vector<6x16x128xbf16>
    %33 = vector.extract_strided_slice %28 {offsets = [0, 0, 0], sizes = [6, 16, 16], strides = [1, 1, 1]} : vector<6x16x128xbf16> to vector<6x16x16xbf16>
    %34 = vector.extract_strided_slice %30 {offsets = [0, 0, 0], sizes = [6, 16, 16], strides = [1, 1, 1]} : vector<6x16x128xbf16> to vector<6x16x16xbf16>
    %35 = vector.extract_strided_slice %32 {offsets = [0, 0, 0], sizes = [6, 16, 16], strides = [1, 1, 1]} : vector<6x16x128xbf16> to vector<6x16x16xbf16>
    "tpu.trace_start"() <{level = 10 : i32, message = "bnd,bmd->bnm"}> : () -> ()
    %cst_23 = arith.constant dense<0.000000e+00> : vector<6x16x16xf32>
    %36 = tpu.matmul %33, %34, %cst_23 {dimension_numbers = #tpu.dot_dimension_numbers<[2], [2], [1], [1], [0, 0, 0, 1, 1, 1], [0], [0]>} : vector<6x16x16xbf16>, vector<6x16x16xbf16>, vector<6x16x16xf32> -> vector<6x16x16xf32>
    "tpu.trace_stop"() : () -> ()
    %cst_24 = arith.constant dense<0xFF800000> : vector<6x16xf32>
    %37 = vector.multi_reduction <maximumf>, %36, %cst_24 [2] : vector<6x16x16xf32> to vector<6x16xf32>
    %38 = vector.shape_cast %37 : vector<6x16xf32> to vector<6x16x1xf32>
    %39 = vector.broadcast %38 : vector<6x16x1xf32> to vector<6x16x16xf32>
    %40 = arith.subf %36, %39 : vector<6x16x16xf32>
    %41 = math.exp %40 : vector<6x16x16xf32>
    %cst_25 = arith.constant dense<0.000000e+00> : vector<6x16xf32>
    %42 = vector.multi_reduction <add>, %41, %cst_25 [2] : vector<6x16x16xf32> to vector<6x16xf32>
    %43 = vector.shape_cast %42 : vector<6x16xf32> to vector<6x16x1xf32>
    %44 = tpu.reciprocal %43 {approx = true} : vector<6x16x1xf32> -> vector<6x16x1xf32>
    %45 = vector.broadcast %44 : vector<6x16x1xf32> to vector<6x16x16xf32>
    %46 = arith.mulf %41, %45 : vector<6x16x16xf32>
    %47 = arith.truncf %46 : vector<6x16x16xf32> to vector<6x16x16xbf16>
    "tpu.trace_start"() <{level = 10 : i32, message = "bnm,bmd->bnd"}> : () -> ()
    %cst_26 = arith.constant dense<0.000000e+00> : vector<6x16x16xf32>
    %48 = tpu.matmul %47, %35, %cst_26 {dimension_numbers = #tpu.dot_dimension_numbers<[2], [1], [1], [2], [0, 0, 0, 1, 1, 2], [0], [0]>} : vector<6x16x16xbf16>, vector<6x16x16xbf16>, vector<6x16x16xf32> -> vector<6x16x16xf32>
    "tpu.trace_stop"() : () -> ()
    %49 = vector.shape_cast %48 : vector<6x16x16xf32> to vector<96x16xf32>
    %50 = arith.truncf %49 : vector<96x16xf32> to vector<96x16xbf16>
    %c0_27 = arith.constant 0 : index
    %c0_28 = arith.constant 0 : index
    %c0_29 = arith.constant 0 : index
    %c0_30 = arith.constant 0 : index
    %51 = vector.load %arg11[%c0_27, %c0_28, %c0_29, %c0_30] : memref<1x8x16x128xbf16, #tpu.memory_space<vmem>>, vector<1x1x16x128xbf16>
    %52 = vector.shape_cast %51 : vector<1x1x16x128xbf16> to vector<16x128xbf16>
    %cst_31 = arith.constant dense<0.000000e+00> : vector<96x128xf32>
    %53 = tpu.matmul %50, %52, %cst_31 {dimension_numbers = #tpu.dot_dimension_numbers<[1], [0], [0], [1], [0, 0, 1, 1], [], []>} : vector<96x16xbf16>, vector<16x128xbf16>, vector<96x128xf32> -> vector<96x128xf32>
    %54 = vector.extract_strided_slice %28 {offsets = [0, 0, 16], sizes = [6, 16, 16], strides = [1, 1, 1]} : vector<6x16x128xbf16> to vector<6x16x16xbf16>
    %55 = vector.extract_strided_slice %30 {offsets = [0, 0, 16], sizes = [6, 16, 16], strides = [1, 1, 1]} : vector<6x16x128xbf16> to vector<6x16x16xbf16>
    %56 = vector.extract_strided_slice %32 {offsets = [0, 0, 16], sizes = [6, 16, 16], strides = [1, 1, 1]} : vector<6x16x128xbf16> to vector<6x16x16xbf16>
    "tpu.trace_start"() <{level = 10 : i32, message = "bnd,bmd->bnm"}> : () -> ()
    %cst_32 = arith.constant dense<0.000000e+00> : vector<6x16x16xf32>
    %57 = tpu.matmul %54, %55, %cst_32 {dimension_numbers = #tpu.dot_dimension_numbers<[2], [2], [1], [1], [0, 0, 0, 1, 1, 1], [0], [0]>} : vector<6x16x16xbf16>, vector<6x16x16xbf16>, vector<6x16x16xf32> -> vector<6x16x16xf32>
    "tpu.trace_stop"() : () -> ()
    %cst_33 = arith.constant dense<0xFF800000> : vector<6x16xf32>
    %58 = vector.multi_reduction <maximumf>, %57, %cst_33 [2] : vector<6x16x16xf32> to vector<6x16xf32>
    %59 = vector.shape_cast %58 : vector<6x16xf32> to vector<6x16x1xf32>
    %60 = vector.broadcast %59 : vector<6x16x1xf32> to vector<6x16x16xf32>
    %61 = arith.subf %57, %60 : vector<6x16x16xf32>
    %62 = math.exp %61 : vector<6x16x16xf32>
    %cst_34 = arith.constant dense<0.000000e+00> : vector<6x16xf32>
    %63 = vector.multi_reduction <add>, %62, %cst_34 [2] : vector<6x16x16xf32> to vector<6x16xf32>
    %64 = vector.shape_cast %63 : vector<6x16xf32> to vector<6x16x1xf32>
    %65 = tpu.reciprocal %64 {approx = true} : vector<6x16x1xf32> -> vector<6x16x1xf32>
    %66 = vector.broadcast %65 : vector<6x16x1xf32> to vector<6x16x16xf32>
    %67 = arith.mulf %62, %66 : vector<6x16x16xf32>
    %68 = arith.truncf %67 : vector<6x16x16xf32> to vector<6x16x16xbf16>
    "tpu.trace_start"() <{level = 10 : i32, message = "bnm,bmd->bnd"}> : () -> ()
    %cst_35 = arith.constant dense<0.000000e+00> : vector<6x16x16xf32>
    %69 = tpu.matmul %68, %56, %cst_35 {dimension_numbers = #tpu.dot_dimension_numbers<[2], [1], [1], [2], [0, 0, 0, 1, 1, 2], [0], [0]>} : vector<6x16x16xbf16>, vector<6x16x16xbf16>, vector<6x16x16xf32> -> vector<6x16x16xf32>
    "tpu.trace_stop"() : () -> ()
    %70 = vector.shape_cast %69 : vector<6x16x16xf32> to vector<96x16xf32>
    %71 = arith.truncf %70 : vector<96x16xf32> to vector<96x16xbf16>
    %c0_36 = arith.constant 0 : index
    %c1 = arith.constant 1 : index
    %c0_37 = arith.constant 0 : index
    %c0_38 = arith.constant 0 : index
    %72 = vector.load %arg11[%c0_36, %c1, %c0_37, %c0_38] : memref<1x8x16x128xbf16, #tpu.memory_space<vmem>>, vector<1x1x16x128xbf16>
    %73 = vector.shape_cast %72 : vector<1x1x16x128xbf16> to vector<16x128xbf16>
    %cst_39 = arith.constant dense<0.000000e+00> : vector<96x128xf32>
    %74 = tpu.matmul %71, %73, %cst_39 {dimension_numbers = #tpu.dot_dimension_numbers<[1], [0], [0], [1], [0, 0, 1, 1], [], []>} : vector<96x16xbf16>, vector<16x128xbf16>, vector<96x128xf32> -> vector<96x128xf32>
    %75 = arith.addf %53, %74 : vector<96x128xf32>
    %76 = vector.extract_strided_slice %28 {offsets = [0, 0, 32], sizes = [6, 16, 16], strides = [1, 1, 1]} : vector<6x16x128xbf16> to vector<6x16x16xbf16>
    %77 = vector.extract_strided_slice %30 {offsets = [0, 0, 32], sizes = [6, 16, 16], strides = [1, 1, 1]} : vector<6x16x128xbf16> to vector<6x16x16xbf16>
    %78 = vector.extract_strided_slice %32 {offsets = [0, 0, 32], sizes = [6, 16, 16], strides = [1, 1, 1]} : vector<6x16x128xbf16> to vector<6x16x16xbf16>
    "tpu.trace_start"() <{level = 10 : i32, message = "bnd,bmd->bnm"}> : () -> ()
    %cst_40 = arith.constant dense<0.000000e+00> : vector<6x16x16xf32>
    %79 = tpu.matmul %76, %77, %cst_40 {dimension_numbers = #tpu.dot_dimension_numbers<[2], [2], [1], [1], [0, 0, 0, 1, 1, 1], [0], [0]>} : vector<6x16x16xbf16>, vector<6x16x16xbf16>, vector<6x16x16xf32> -> vector<6x16x16xf32>
    "tpu.trace_stop"() : () -> ()
    %cst_41 = arith.constant dense<0xFF800000> : vector<6x16xf32>
    %80 = vector.multi_reduction <maximumf>, %79, %cst_41 [2] : vector<6x16x16xf32> to vector<6x16xf32>
    %81 = vector.shape_cast %80 : vector<6x16xf32> to vector<6x16x1xf32>
    %82 = vector.broadcast %81 : vector<6x16x1xf32> to vector<6x16x16xf32>
    %83 = arith.subf %79, %82 : vector<6x16x16xf32>
    %84 = math.exp %83 : vector<6x16x16xf32>
    %cst_42 = arith.constant dense<0.000000e+00> : vector<6x16xf32>
    %85 = vector.multi_reduction <add>, %84, %cst_42 [2] : vector<6x16x16xf32> to vector<6x16xf32>
    %86 = vector.shape_cast %85 : vector<6x16xf32> to vector<6x16x1xf32>
    %87 = tpu.reciprocal %86 {approx = true} : vector<6x16x1xf32> -> vector<6x16x1xf32>
    %88 = vector.broadcast %87 : vector<6x16x1xf32> to vector<6x16x16xf32>
    %89 = arith.mulf %84, %88 : vector<6x16x16xf32>
    %90 = arith.truncf %89 : vector<6x16x16xf32> to vector<6x16x16xbf16>
    "tpu.trace_start"() <{level = 10 : i32, message = "bnm,bmd->bnd"}> : () -> ()
    %cst_43 = arith.constant dense<0.000000e+00> : vector<6x16x16xf32>
    %91 = tpu.matmul %90, %78, %cst_43 {dimension_numbers = #tpu.dot_dimension_numbers<[2], [1], [1], [2], [0, 0, 0, 1, 1, 2], [0], [0]>} : vector<6x16x16xbf16>, vector<6x16x16xbf16>, vector<6x16x16xf32> -> vector<6x16x16xf32>
    "tpu.trace_stop"() : () -> ()
    %92 = vector.shape_cast %91 : vector<6x16x16xf32> to vector<96x16xf32>
    %93 = arith.truncf %92 : vector<96x16xf32> to vector<96x16xbf16>
    %c0_44 = arith.constant 0 : index
    %c2 = arith.constant 2 : index
    %c0_45 = arith.constant 0 : index
    %c0_46 = arith.constant 0 : index
    %94 = vector.load %arg11[%c0_44, %c2, %c0_45, %c0_46] : memref<1x8x16x128xbf16, #tpu.memory_space<vmem>>, vector<1x1x16x128xbf16>
    %95 = vector.shape_cast %94 : vector<1x1x16x128xbf16> to vector<16x128xbf16>
    %cst_47 = arith.constant dense<0.000000e+00> : vector<96x128xf32>
    %96 = tpu.matmul %93, %95, %cst_47 {dimension_numbers = #tpu.dot_dimension_numbers<[1], [0], [0], [1], [0, 0, 1, 1], [], []>} : vector<96x16xbf16>, vector<16x128xbf16>, vector<96x128xf32> -> vector<96x128xf32>
    %97 = arith.addf %75, %96 : vector<96x128xf32>
    %98 = vector.extract_strided_slice %28 {offsets = [0, 0, 48], sizes = [6, 16, 16], strides = [1, 1, 1]} : vector<6x16x128xbf16> to vector<6x16x16xbf16>
    %99 = vector.extract_strided_slice %30 {offsets = [0, 0, 48], sizes = [6, 16, 16], strides = [1, 1, 1]} : vector<6x16x128xbf16> to vector<6x16x16xbf16>
    %100 = vector.extract_strided_slice %32 {offsets = [0, 0, 48], sizes = [6, 16, 16], strides = [1, 1, 1]} : vector<6x16x128xbf16> to vector<6x16x16xbf16>
    "tpu.trace_start"() <{level = 10 : i32, message = "bnd,bmd->bnm"}> : () -> ()
    %cst_48 = arith.constant dense<0.000000e+00> : vector<6x16x16xf32>
    %101 = tpu.matmul %98, %99, %cst_48 {dimension_numbers = #tpu.dot_dimension_numbers<[2], [2], [1], [1], [0, 0, 0, 1, 1, 1], [0], [0]>} : vector<6x16x16xbf16>, vector<6x16x16xbf16>, vector<6x16x16xf32> -> vector<6x16x16xf32>
    "tpu.trace_stop"() : () -> ()
    %cst_49 = arith.constant dense<0xFF800000> : vector<6x16xf32>
    %102 = vector.multi_reduction <maximumf>, %101, %cst_49 [2] : vector<6x16x16xf32> to vector<6x16xf32>
    %103 = vector.shape_cast %102 : vector<6x16xf32> to vector<6x16x1xf32>
    %104 = vector.broadcast %103 : vector<6x16x1xf32> to vector<6x16x16xf32>
    %105 = arith.subf %101, %104 : vector<6x16x16xf32>
    %106 = math.exp %105 : vector<6x16x16xf32>
    %cst_50 = arith.constant dense<0.000000e+00> : vector<6x16xf32>
    %107 = vector.multi_reduction <add>, %106, %cst_50 [2] : vector<6x16x16xf32> to vector<6x16xf32>
    %108 = vector.shape_cast %107 : vector<6x16xf32> to vector<6x16x1xf32>
    %109 = tpu.reciprocal %108 {approx = true} : vector<6x16x1xf32> -> vector<6x16x1xf32>
    %110 = vector.broadcast %109 : vector<6x16x1xf32> to vector<6x16x16xf32>
    %111 = arith.mulf %106, %110 : vector<6x16x16xf32>
    %112 = arith.truncf %111 : vector<6x16x16xf32> to vector<6x16x16xbf16>
    "tpu.trace_start"() <{level = 10 : i32, message = "bnm,bmd->bnd"}> : () -> ()
    %cst_51 = arith.constant dense<0.000000e+00> : vector<6x16x16xf32>
    %113 = tpu.matmul %112, %100, %cst_51 {dimension_numbers = #tpu.dot_dimension_numbers<[2], [1], [1], [2], [0, 0, 0, 1, 1, 2], [0], [0]>} : vector<6x16x16xbf16>, vector<6x16x16xbf16>, vector<6x16x16xf32> -> vector<6x16x16xf32>
    "tpu.trace_stop"() : () -> ()
    %114 = vector.shape_cast %113 : vector<6x16x16xf32> to vector<96x16xf32>
    %115 = arith.truncf %114 : vector<96x16xf32> to vector<96x16xbf16>
    %c0_52 = arith.constant 0 : index
    %c3 = arith.constant 3 : index
    %c0_53 = arith.constant 0 : index
    %c0_54 = arith.constant 0 : index
    %116 = vector.load %arg11[%c0_52, %c3, %c0_53, %c0_54] : memref<1x8x16x128xbf16, #tpu.memory_space<vmem>>, vector<1x1x16x128xbf16>
    %117 = vector.shape_cast %116 : vector<1x1x16x128xbf16> to vector<16x128xbf16>
    %cst_55 = arith.constant dense<0.000000e+00> : vector<96x128xf32>
    %118 = tpu.matmul %115, %117, %cst_55 {dimension_numbers = #tpu.dot_dimension_numbers<[1], [0], [0], [1], [0, 0, 1, 1], [], []>} : vector<96x16xbf16>, vector<16x128xbf16>, vector<96x128xf32> -> vector<96x128xf32>
    %119 = arith.addf %97, %118 : vector<96x128xf32>
    %120 = vector.extract_strided_slice %28 {offsets = [0, 0, 64], sizes = [6, 16, 16], strides = [1, 1, 1]} : vector<6x16x128xbf16> to vector<6x16x16xbf16>
    %121 = vector.extract_strided_slice %30 {offsets = [0, 0, 64], sizes = [6, 16, 16], strides = [1, 1, 1]} : vector<6x16x128xbf16> to vector<6x16x16xbf16>
    %122 = vector.extract_strided_slice %32 {offsets = [0, 0, 64], sizes = [6, 16, 16], strides = [1, 1, 1]} : vector<6x16x128xbf16> to vector<6x16x16xbf16>
    "tpu.trace_start"() <{level = 10 : i32, message = "bnd,bmd->bnm"}> : () -> ()
    %cst_56 = arith.constant dense<0.000000e+00> : vector<6x16x16xf32>
    %123 = tpu.matmul %120, %121, %cst_56 {dimension_numbers = #tpu.dot_dimension_numbers<[2], [2], [1], [1], [0, 0, 0, 1, 1, 1], [0], [0]>} : vector<6x16x16xbf16>, vector<6x16x16xbf16>, vector<6x16x16xf32> -> vector<6x16x16xf32>
    "tpu.trace_stop"() : () -> ()
    %cst_57 = arith.constant dense<0xFF800000> : vector<6x16xf32>
    %124 = vector.multi_reduction <maximumf>, %123, %cst_57 [2] : vector<6x16x16xf32> to vector<6x16xf32>
    %125 = vector.shape_cast %124 : vector<6x16xf32> to vector<6x16x1xf32>
    %126 = vector.broadcast %125 : vector<6x16x1xf32> to vector<6x16x16xf32>
    %127 = arith.subf %123, %126 : vector<6x16x16xf32>
    %128 = math.exp %127 : vector<6x16x16xf32>
    %cst_58 = arith.constant dense<0.000000e+00> : vector<6x16xf32>
    %129 = vector.multi_reduction <add>, %128, %cst_58 [2] : vector<6x16x16xf32> to vector<6x16xf32>
    %130 = vector.shape_cast %129 : vector<6x16xf32> to vector<6x16x1xf32>
    %131 = tpu.reciprocal %130 {approx = true} : vector<6x16x1xf32> -> vector<6x16x1xf32>
    %132 = vector.broadcast %131 : vector<6x16x1xf32> to vector<6x16x16xf32>
    %133 = arith.mulf %128, %132 : vector<6x16x16xf32>
    %134 = arith.truncf %133 : vector<6x16x16xf32> to vector<6x16x16xbf16>
    "tpu.trace_start"() <{level = 10 : i32, message = "bnm,bmd->bnd"}> : () -> ()
    %cst_59 = arith.constant dense<0.000000e+00> : vector<6x16x16xf32>
    %135 = tpu.matmul %134, %122, %cst_59 {dimension_numbers = #tpu.dot_dimension_numbers<[2], [1], [1], [2], [0, 0, 0, 1, 1, 2], [0], [0]>} : vector<6x16x16xbf16>, vector<6x16x16xbf16>, vector<6x16x16xf32> -> vector<6x16x16xf32>
    "tpu.trace_stop"() : () -> ()
    %136 = vector.shape_cast %135 : vector<6x16x16xf32> to vector<96x16xf32>
    %137 = arith.truncf %136 : vector<96x16xf32> to vector<96x16xbf16>
    %c0_60 = arith.constant 0 : index
    %c4 = arith.constant 4 : index
    %c0_61 = arith.constant 0 : index
    %c0_62 = arith.constant 0 : index
    %138 = vector.load %arg11[%c0_60, %c4, %c0_61, %c0_62] : memref<1x8x16x128xbf16, #tpu.memory_space<vmem>>, vector<1x1x16x128xbf16>
    %139 = vector.shape_cast %138 : vector<1x1x16x128xbf16> to vector<16x128xbf16>
    %cst_63 = arith.constant dense<0.000000e+00> : vector<96x128xf32>
    %140 = tpu.matmul %137, %139, %cst_63 {dimension_numbers = #tpu.dot_dimension_numbers<[1], [0], [0], [1], [0, 0, 1, 1], [], []>} : vector<96x16xbf16>, vector<16x128xbf16>, vector<96x128xf32> -> vector<96x128xf32>
    %141 = arith.addf %119, %140 : vector<96x128xf32>
    %142 = vector.extract_strided_slice %28 {offsets = [0, 0, 80], sizes = [6, 16, 16], strides = [1, 1, 1]} : vector<6x16x128xbf16> to vector<6x16x16xbf16>
    %143 = vector.extract_strided_slice %30 {offsets = [0, 0, 80], sizes = [6, 16, 16], strides = [1, 1, 1]} : vector<6x16x128xbf16> to vector<6x16x16xbf16>
    %144 = vector.extract_strided_slice %32 {offsets = [0, 0, 80], sizes = [6, 16, 16], strides = [1, 1, 1]} : vector<6x16x128xbf16> to vector<6x16x16xbf16>
    "tpu.trace_start"() <{level = 10 : i32, message = "bnd,bmd->bnm"}> : () -> ()
    %cst_64 = arith.constant dense<0.000000e+00> : vector<6x16x16xf32>
    %145 = tpu.matmul %142, %143, %cst_64 {dimension_numbers = #tpu.dot_dimension_numbers<[2], [2], [1], [1], [0, 0, 0, 1, 1, 1], [0], [0]>} : vector<6x16x16xbf16>, vector<6x16x16xbf16>, vector<6x16x16xf32> -> vector<6x16x16xf32>
    "tpu.trace_stop"() : () -> ()
    %cst_65 = arith.constant dense<0xFF800000> : vector<6x16xf32>
    %146 = vector.multi_reduction <maximumf>, %145, %cst_65 [2] : vector<6x16x16xf32> to vector<6x16xf32>
    %147 = vector.shape_cast %146 : vector<6x16xf32> to vector<6x16x1xf32>
    %148 = vector.broadcast %147 : vector<6x16x1xf32> to vector<6x16x16xf32>
    %149 = arith.subf %145, %148 : vector<6x16x16xf32>
    %150 = math.exp %149 : vector<6x16x16xf32>
    %cst_66 = arith.constant dense<0.000000e+00> : vector<6x16xf32>
    %151 = vector.multi_reduction <add>, %150, %cst_66 [2] : vector<6x16x16xf32> to vector<6x16xf32>
    %152 = vector.shape_cast %151 : vector<6x16xf32> to vector<6x16x1xf32>
    %153 = tpu.reciprocal %152 {approx = true} : vector<6x16x1xf32> -> vector<6x16x1xf32>
    %154 = vector.broadcast %153 : vector<6x16x1xf32> to vector<6x16x16xf32>
    %155 = arith.mulf %150, %154 : vector<6x16x16xf32>
    %156 = arith.truncf %155 : vector<6x16x16xf32> to vector<6x16x16xbf16>
    "tpu.trace_start"() <{level = 10 : i32, message = "bnm,bmd->bnd"}> : () -> ()
    %cst_67 = arith.constant dense<0.000000e+00> : vector<6x16x16xf32>
    %157 = tpu.matmul %156, %144, %cst_67 {dimension_numbers = #tpu.dot_dimension_numbers<[2], [1], [1], [2], [0, 0, 0, 1, 1, 2], [0], [0]>} : vector<6x16x16xbf16>, vector<6x16x16xbf16>, vector<6x16x16xf32> -> vector<6x16x16xf32>
    "tpu.trace_stop"() : () -> ()
    %158 = vector.shape_cast %157 : vector<6x16x16xf32> to vector<96x16xf32>
    %159 = arith.truncf %158 : vector<96x16xf32> to vector<96x16xbf16>
    %c0_68 = arith.constant 0 : index
    %c5 = arith.constant 5 : index
    %c0_69 = arith.constant 0 : index
    %c0_70 = arith.constant 0 : index
    %160 = vector.load %arg11[%c0_68, %c5, %c0_69, %c0_70] : memref<1x8x16x128xbf16, #tpu.memory_space<vmem>>, vector<1x1x16x128xbf16>
    %161 = vector.shape_cast %160 : vector<1x1x16x128xbf16> to vector<16x128xbf16>
    %cst_71 = arith.constant dense<0.000000e+00> : vector<96x128xf32>
    %162 = tpu.matmul %159, %161, %cst_71 {dimension_numbers = #tpu.dot_dimension_numbers<[1], [0], [0], [1], [0, 0, 1, 1], [], []>} : vector<96x16xbf16>, vector<16x128xbf16>, vector<96x128xf32> -> vector<96x128xf32>
    %163 = arith.addf %141, %162 : vector<96x128xf32>
    %164 = vector.extract_strided_slice %28 {offsets = [0, 0, 96], sizes = [6, 16, 16], strides = [1, 1, 1]} : vector<6x16x128xbf16> to vector<6x16x16xbf16>
    %165 = vector.extract_strided_slice %30 {offsets = [0, 0, 96], sizes = [6, 16, 16], strides = [1, 1, 1]} : vector<6x16x128xbf16> to vector<6x16x16xbf16>
    %166 = vector.extract_strided_slice %32 {offsets = [0, 0, 96], sizes = [6, 16, 16], strides = [1, 1, 1]} : vector<6x16x128xbf16> to vector<6x16x16xbf16>
    "tpu.trace_start"() <{level = 10 : i32, message = "bnd,bmd->bnm"}> : () -> ()
    %cst_72 = arith.constant dense<0.000000e+00> : vector<6x16x16xf32>
    %167 = tpu.matmul %164, %165, %cst_72 {dimension_numbers = #tpu.dot_dimension_numbers<[2], [2], [1], [1], [0, 0, 0, 1, 1, 1], [0], [0]>} : vector<6x16x16xbf16>, vector<6x16x16xbf16>, vector<6x16x16xf32> -> vector<6x16x16xf32>
    "tpu.trace_stop"() : () -> ()
    %cst_73 = arith.constant dense<0xFF800000> : vector<6x16xf32>
    %168 = vector.multi_reduction <maximumf>, %167, %cst_73 [2] : vector<6x16x16xf32> to vector<6x16xf32>
    %169 = vector.shape_cast %168 : vector<6x16xf32> to vector<6x16x1xf32>
    %170 = vector.broadcast %169 : vector<6x16x1xf32> to vector<6x16x16xf32>
    %171 = arith.subf %167, %170 : vector<6x16x16xf32>
    %172 = math.exp %171 : vector<6x16x16xf32>
    %cst_74 = arith.constant dense<0.000000e+00> : vector<6x16xf32>
    %173 = vector.multi_reduction <add>, %172, %cst_74 [2] : vector<6x16x16xf32> to vector<6x16xf32>
    %174 = vector.shape_cast %173 : vector<6x16xf32> to vector<6x16x1xf32>
    %175 = tpu.reciprocal %174 {approx = true} : vector<6x16x1xf32> -> vector<6x16x1xf32>
    %176 = vector.broadcast %175 : vector<6x16x1xf32> to vector<6x16x16xf32>
    %177 = arith.mulf %172, %176 : vector<6x16x16xf32>
    %178 = arith.truncf %177 : vector<6x16x16xf32> to vector<6x16x16xbf16>
    "tpu.trace_start"() <{level = 10 : i32, message = "bnm,bmd->bnd"}> : () -> ()
    %cst_75 = arith.constant dense<0.000000e+00> : vector<6x16x16xf32>
    %179 = tpu.matmul %178, %166, %cst_75 {dimension_numbers = #tpu.dot_dimension_numbers<[2], [1], [1], [2], [0, 0, 0, 1, 1, 2], [0], [0]>} : vector<6x16x16xbf16>, vector<6x16x16xbf16>, vector<6x16x16xf32> -> vector<6x16x16xf32>
    "tpu.trace_stop"() : () -> ()
    %180 = vector.shape_cast %179 : vector<6x16x16xf32> to vector<96x16xf32>
    %181 = arith.truncf %180 : vector<96x16xf32> to vector<96x16xbf16>
    %c0_76 = arith.constant 0 : index
    %c6 = arith.constant 6 : index
    %c0_77 = arith.constant 0 : index
    %c0_78 = arith.constant 0 : index
    %182 = vector.load %arg11[%c0_76, %c6, %c0_77, %c0_78] : memref<1x8x16x128xbf16, #tpu.memory_space<vmem>>, vector<1x1x16x128xbf16>
    %183 = vector.shape_cast %182 : vector<1x1x16x128xbf16> to vector<16x128xbf16>
    %cst_79 = arith.constant dense<0.000000e+00> : vector<96x128xf32>
    %184 = tpu.matmul %181, %183, %cst_79 {dimension_numbers = #tpu.dot_dimension_numbers<[1], [0], [0], [1], [0, 0, 1, 1], [], []>} : vector<96x16xbf16>, vector<16x128xbf16>, vector<96x128xf32> -> vector<96x128xf32>
    %185 = arith.addf %163, %184 : vector<96x128xf32>
    %186 = vector.extract_strided_slice %28 {offsets = [0, 0, 112], sizes = [6, 16, 16], strides = [1, 1, 1]} : vector<6x16x128xbf16> to vector<6x16x16xbf16>
    %187 = vector.extract_strided_slice %30 {offsets = [0, 0, 112], sizes = [6, 16, 16], strides = [1, 1, 1]} : vector<6x16x128xbf16> to vector<6x16x16xbf16>
    %188 = vector.extract_strided_slice %32 {offsets = [0, 0, 112], sizes = [6, 16, 16], strides = [1, 1, 1]} : vector<6x16x128xbf16> to vector<6x16x16xbf16>
    "tpu.trace_start"() <{level = 10 : i32, message = "bnd,bmd->bnm"}> : () -> ()
    %cst_80 = arith.constant dense<0.000000e+00> : vector<6x16x16xf32>
    %189 = tpu.matmul %186, %187, %cst_80 {dimension_numbers = #tpu.dot_dimension_numbers<[2], [2], [1], [1], [0, 0, 0, 1, 1, 1], [0], [0]>} : vector<6x16x16xbf16>, vector<6x16x16xbf16>, vector<6x16x16xf32> -> vector<6x16x16xf32>
    "tpu.trace_stop"() : () -> ()
    %cst_81 = arith.constant dense<0xFF800000> : vector<6x16xf32>
    %190 = vector.multi_reduction <maximumf>, %189, %cst_81 [2] : vector<6x16x16xf32> to vector<6x16xf32>
    %191 = vector.shape_cast %190 : vector<6x16xf32> to vector<6x16x1xf32>
    %192 = vector.broadcast %191 : vector<6x16x1xf32> to vector<6x16x16xf32>
    %193 = arith.subf %189, %192 : vector<6x16x16xf32>
    %194 = math.exp %193 : vector<6x16x16xf32>
    %cst_82 = arith.constant dense<0.000000e+00> : vector<6x16xf32>
    %195 = vector.multi_reduction <add>, %194, %cst_82 [2] : vector<6x16x16xf32> to vector<6x16xf32>
    %196 = vector.shape_cast %195 : vector<6x16xf32> to vector<6x16x1xf32>
    %197 = tpu.reciprocal %196 {approx = true} : vector<6x16x1xf32> -> vector<6x16x1xf32>
    %198 = vector.broadcast %197 : vector<6x16x1xf32> to vector<6x16x16xf32>
    %199 = arith.mulf %194, %198 : vector<6x16x16xf32>
    %200 = arith.truncf %199 : vector<6x16x16xf32> to vector<6x16x16xbf16>
    "tpu.trace_start"() <{level = 10 : i32, message = "bnm,bmd->bnd"}> : () -> ()
    %cst_83 = arith.constant dense<0.000000e+00> : vector<6x16x16xf32>
    %201 = tpu.matmul %200, %188, %cst_83 {dimension_numbers = #tpu.dot_dimension_numbers<[2], [1], [1], [2], [0, 0, 0, 1, 1, 2], [0], [0]>} : vector<6x16x16xbf16>, vector<6x16x16xbf16>, vector<6x16x16xf32> -> vector<6x16x16xf32>
    "tpu.trace_stop"() : () -> ()
    %202 = vector.shape_cast %201 : vector<6x16x16xf32> to vector<96x16xf32>
    %203 = arith.truncf %202 : vector<96x16xf32> to vector<96x16xbf16>
    %c0_84 = arith.constant 0 : index
    %c7 = arith.constant 7 : index
    %c0_85 = arith.constant 0 : index
    %c0_86 = arith.constant 0 : index
    %204 = vector.load %arg11[%c0_84, %c7, %c0_85, %c0_86] : memref<1x8x16x128xbf16, #tpu.memory_space<vmem>>, vector<1x1x16x128xbf16>
    %205 = vector.shape_cast %204 : vector<1x1x16x128xbf16> to vector<16x128xbf16>
    %cst_87 = arith.constant dense<0.000000e+00> : vector<96x128xf32>
    %206 = tpu.matmul %203, %205, %cst_87 {dimension_numbers = #tpu.dot_dimension_numbers<[1], [0], [0], [1], [0, 0, 1, 1], [], []>} : vector<96x16xbf16>, vector<16x128xbf16>, vector<96x128xf32> -> vector<96x128xf32>
    %207 = arith.addf %185, %206 : vector<96x128xf32>
    %c0_88 = arith.constant 0 : index
    %c0_89 = arith.constant 0 : index
    %c0_90 = arith.constant 0 : index
    %208 = vector.load %arg12[%c0_88, %c0_89, %c0_90] : memref<1x1x128xf32, #tpu.memory_space<vmem>>, vector<1x1x128xf32>
    %209 = vector.shape_cast %208 : vector<1x1x128xf32> to vector<1x128xf32>
    %210 = vector.broadcast %209 : vector<1x128xf32> to vector<96x128xf32>
    %211 = arith.addf %207, %210 : vector<96x128xf32>
    %212 = arith.truncf %211 : vector<96x128xf32> to vector<96x128xbf16>
    %c0_91 = arith.constant 0 : index
    %c0_92 = arith.constant 0 : index
    %c0_93 = arith.constant 0 : index
    %213 = vector.load %arg13[%c0_91, %c0_92, %c0_93] : memref<1x128x128xbf16, #tpu.memory_space<vmem>>, vector<1x128x128xbf16>
    %214 = vector.shape_cast %213 : vector<1x128x128xbf16> to vector<128x128xbf16>
    %cst_94 = arith.constant dense<0.000000e+00> : vector<96x128xf32>
    %215 = tpu.matmul %212, %214, %cst_94 {dimension_numbers = #tpu.dot_dimension_numbers<[1], [0], [0], [1], [0, 0, 1, 1], [], []>} : vector<96x128xbf16>, vector<128x128xbf16>, vector<96x128xf32> -> vector<96x128xf32>
    %c0_95 = arith.constant 0 : index
    %c0_96 = arith.constant 0 : index
    %c0_97 = arith.constant 0 : index
    %216 = vector.load %arg14[%c0_95, %c0_96, %c0_97] : memref<1x128x128xbf16, #tpu.memory_space<vmem>>, vector<1x128x128xbf16>
    %217 = vector.shape_cast %216 : vector<1x128x128xbf16> to vector<128x128xbf16>
    %cst_98 = arith.constant dense<0.000000e+00> : vector<96x128xf32>
    %218 = tpu.matmul %5, %217, %cst_98 {dimension_numbers = #tpu.dot_dimension_numbers<[1], [0], [0], [1], [0, 0, 1, 1], [], []>} : vector<96x128xbf16>, vector<128x128xbf16>, vector<96x128xf32> -> vector<96x128xf32>
    %219 = arith.addf %215, %218 : vector<96x128xf32>
    %c0_99 = arith.constant 0 : index
    %c0_100 = arith.constant 0 : index
    %c0_101 = arith.constant 0 : index
    %220 = vector.load %arg15[%c0_99, %c0_100, %c0_101] : memref<1x1x128xf32, #tpu.memory_space<vmem>>, vector<1x1x128xf32>
    %221 = vector.shape_cast %220 : vector<1x1x128xf32> to vector<1x128xf32>
    %222 = vector.broadcast %221 : vector<1x128xf32> to vector<96x128xf32>
    %223 = arith.mulf %219, %222 : vector<96x128xf32>
    %c0_102 = arith.constant 0 : index
    %c0_103 = arith.constant 0 : index
    %c0_104 = arith.constant 0 : index
    %224 = vector.load %arg16[%c0_102, %c0_103, %c0_104] : memref<1x1x128xf32, #tpu.memory_space<vmem>>, vector<1x1x128xf32>
    %225 = vector.shape_cast %224 : vector<1x1x128xf32> to vector<1x128xf32>
    %226 = vector.broadcast %225 : vector<1x128xf32> to vector<96x128xf32>
    %227 = arith.addf %223, %226 : vector<96x128xf32>
    %cst_105 = arith.constant 0.000000e+00 : f32
    %228 = vector.broadcast %cst_105 : f32 to vector<96x128xf32>
    %229 = arith.maximumf %227, %228 : vector<96x128xf32>
    %230 = arith.truncf %229 : vector<96x128xf32> to vector<96x128xbf16>
    %c0_106 = arith.constant 0 : index
    %c0_107 = arith.constant 0 : index
    %c0_108 = arith.constant 0 : index
    %231 = vector.load %arg17[%c0_106, %c0_107, %c0_108] : memref<1x128x128xbf16, #tpu.memory_space<vmem>>, vector<1x128x128xbf16>
    %232 = vector.shape_cast %231 : vector<1x128x128xbf16> to vector<128x128xbf16>
    %cst_109 = arith.constant dense<0.000000e+00> : vector<96x128xf32>
    %233 = tpu.matmul %230, %232, %cst_109 {dimension_numbers = #tpu.dot_dimension_numbers<[1], [0], [0], [1], [0, 0, 1, 1], [], []>} : vector<96x128xbf16>, vector<128x128xbf16>, vector<96x128xf32> -> vector<96x128xf32>
    %c0_110 = arith.constant 0 : index
    %c0_111 = arith.constant 0 : index
    %c0_112 = arith.constant 0 : index
    %234 = vector.load %arg18[%c0_110, %c0_111, %c0_112] : memref<1x1x128xf32, #tpu.memory_space<vmem>>, vector<1x1x128xf32>
    %235 = vector.shape_cast %234 : vector<1x1x128xf32> to vector<1x128xf32>
    %236 = vector.broadcast %235 : vector<1x128xf32> to vector<96x128xf32>
    %237 = arith.mulf %233, %236 : vector<96x128xf32>
    %c0_113 = arith.constant 0 : index
    %c0_114 = arith.constant 0 : index
    %c0_115 = arith.constant 0 : index
    %238 = vector.load %arg19[%c0_113, %c0_114, %c0_115] : memref<1x1x128xf32, #tpu.memory_space<vmem>>, vector<1x1x128xf32>
    %239 = vector.shape_cast %238 : vector<1x1x128xf32> to vector<1x128xf32>
    %240 = vector.broadcast %239 : vector<1x128xf32> to vector<96x128xf32>
    %241 = arith.addf %237, %240 : vector<96x128xf32>
    %cst_116 = arith.constant 0.000000e+00 : f32
    %242 = vector.broadcast %cst_116 : f32 to vector<96x128xf32>
    %243 = arith.maximumf %241, %242 : vector<96x128xf32>
    %244 = vector.shape_cast %243 : vector<96x128xf32> to vector<6x16x128xf32>
    %245 = arith.addf %3, %244 : vector<6x16x128xf32>
    %c0_117 = arith.constant 0 : index
    %c0_118 = arith.constant 0 : index
    %c0_119 = arith.constant 0 : index
    %246 = vector.load %arg21[%c0_117, %c0_118, %c0_119] : memref<6x16x128xf32, #tpu.memory_space<vmem>>, vector<6x16x128xf32>
    tpu.vector_store %arg21[%c0_117, %c0_118, %c0_119], %245 {strides = array<i32>} : memref<6x16x128xf32, #tpu.memory_space<vmem>>, vector<6x16x128xf32>,
    %c1_i32 = arith.constant 1 : i32
    %247 = arith.cmpi eq, %arg1, %c1_i32 : i32
    %248 = arith.extui %247 : i1 to i32
    %c0_i32_120 = arith.constant 0 : i32
    %249 = arith.cmpi ne, %248, %c0_i32_120 : i32
    scf.if %249 {
      %cst_121 = arith.constant dense<0.000000e+00> : vector<6x128xf32>
      %250 = vector.multi_reduction <add>, %245, %cst_121 [1] : vector<6x16x128xf32> to vector<6x128xf32>
      %cst_122 = arith.constant 1.600000e+01 : f32
      %251 = vector.broadcast %cst_122 : f32 to vector<6x128xf32>
      %252 = arith.divf %250, %251 : vector<6x128xf32>
      %c0_123 = arith.constant 0 : index
      %c0_124 = arith.constant 0 : index
      %253 = vector.load %arg3[%c0_123, %c0_124] : memref<1x128xf32, #tpu.memory_space<vmem>>, vector<1x128xf32>
      %254 = vector.broadcast %253 : vector<1x128xf32> to vector<6x128xf32>
      %255 = arith.mulf %252, %254 : vector<6x128xf32>
      %cst_125 = arith.constant dense<0.000000e+00> : vector<6xf32>
      %256 = vector.multi_reduction <add>, %255, %cst_125 [1] : vector<6x128xf32> to vector<6xf32>
      %257 = vector.shape_cast %256 : vector<6xf32> to vector<6x1xf32>
      %c0_126 = arith.constant 0 : index
      %c0_127 = arith.constant 0 : index
      %258 = vector.load %arg4[%c0_126, %c0_127] : memref<1x1xf32, #tpu.memory_space<vmem>>, vector<1x1xf32>
      %259 = vector.broadcast %258 : vector<1x1xf32> to vector<6x1xf32>
      %260 = arith.addf %257, %259 : vector<6x1xf32>
      %c0_128 = arith.constant 0 : index
      %c0_129 = arith.constant 0 : index
      %261 = vector.load %arg20[%c0_128, %c0_129] : memref<6x1xf32, #tpu.memory_space<vmem>>, vector<6x1xf32>
      tpu.vector_store %arg20[%c0_128, %c0_129], %260 {strides = array<i32>} : memref<6x1xf32, #tpu.memory_space<vmem>>, vector<6x1xf32>,
    } else {
    }
    return
  }
  func.func @transform_1(%arg0: i32, %arg1: i32) -> (i32, i32) {
    %c0_i32 = arith.constant 0 : i32
    %c0_i32_0 = arith.constant 0 : i32
    %c0_i32_1 = arith.constant 0 : i32
    return %c0_i32, %c0_i32_0 : i32, i32
  }
  func.func @transform_2(%arg0: i32, %arg1: i32) -> (i32, i32) {
    %c0_i32 = arith.constant 0 : i32
    %c0_i32_0 = arith.constant 0 : i32
    %c0_i32_1 = arith.constant 0 : i32
    return %c0_i32, %c0_i32_0 : i32, i32
  }
  func.func @transform_3(%arg0: i32, %arg1: i32) -> (i32, i32, i32) {
    %c0_i32 = arith.constant 0 : i32
    %c0_i32_0 = arith.constant 0 : i32
    %c0_i32_1 = arith.constant 0 : i32
    return %arg1, %c0_i32, %c0_i32_0 : i32, i32, i32
  }
  func.func @transform_4(%arg0: i32, %arg1: i32) -> (i32, i32, i32) {
    %c0_i32 = arith.constant 0 : i32
    %c0_i32_0 = arith.constant 0 : i32
    %c0_i32_1 = arith.constant 0 : i32
    return %arg1, %c0_i32, %c0_i32_0 : i32, i32, i32
  }
  func.func @transform_5(%arg0: i32, %arg1: i32) -> (i32, i32, i32) {
    %c0_i32 = arith.constant 0 : i32
    %c0_i32_0 = arith.constant 0 : i32
    %c0_i32_1 = arith.constant 0 : i32
    return %arg1, %c0_i32, %c0_i32_0 : i32, i32, i32
  }
  func.func @transform_6(%arg0: i32, %arg1: i32) -> (i32, i32, i32) {
    %c0_i32 = arith.constant 0 : i32
    %c0_i32_0 = arith.constant 0 : i32
    %c0_i32_1 = arith.constant 0 : i32
    return %arg1, %c0_i32, %c0_i32_0 : i32, i32, i32
  }
  func.func @transform_7(%arg0: i32, %arg1: i32) -> (i32, i32, i32) {
    %c0_i32 = arith.constant 0 : i32
    %c0_i32_0 = arith.constant 0 : i32
    %c0_i32_1 = arith.constant 0 : i32
    return %arg1, %c0_i32, %c0_i32_0 : i32, i32, i32
  }
  func.func @transform_8(%arg0: i32, %arg1: i32) -> (i32, i32, i32) {
    %c0_i32 = arith.constant 0 : i32
    %c0_i32_0 = arith.constant 0 : i32
    %c0_i32_1 = arith.constant 0 : i32
    return %arg1, %c0_i32, %c0_i32_0 : i32, i32, i32
  }
  func.func @transform_9(%arg0: i32, %arg1: i32) -> (i32, i32, i32, i32) {
    %c0_i32 = arith.constant 0 : i32
    %c0_i32_0 = arith.constant 0 : i32
    %c0_i32_1 = arith.constant 0 : i32
    %c0_i32_2 = arith.constant 0 : i32
    return %arg1, %c0_i32, %c0_i32_0, %c0_i32_1 : i32, i32, i32, i32
  }
  func.func @transform_10(%arg0: i32, %arg1: i32) -> (i32, i32, i32) {
    %c0_i32 = arith.constant 0 : i32
    %c0_i32_0 = arith.constant 0 : i32
    %c0_i32_1 = arith.constant 0 : i32
    return %arg1, %c0_i32, %c0_i32_0 : i32, i32, i32
  }
  func.func @transform_11(%arg0: i32, %arg1: i32) -> (i32, i32, i32) {
    %c0_i32 = arith.constant 0 : i32
    %c0_i32_0 = arith.constant 0 : i32
    %c0_i32_1 = arith.constant 0 : i32
    return %arg1, %c0_i32, %c0_i32_0 : i32, i32, i32
  }
  func.func @transform_12(%arg0: i32, %arg1: i32) -> (i32, i32, i32) {
    %c0_i32 = arith.constant 0 : i32
    %c0_i32_0 = arith.constant 0 : i32
    %c0_i32_1 = arith.constant 0 : i32
    return %arg1, %c0_i32, %c0_i32_0 : i32, i32, i32
  }
  func.func @transform_13(%arg0: i32, %arg1: i32) -> (i32, i32, i32) {
    %c0_i32 = arith.constant 0 : i32
    %c0_i32_0 = arith.constant 0 : i32
    %c0_i32_1 = arith.constant 0 : i32
    return %arg1, %c0_i32, %c0_i32_0 : i32, i32, i32
  }
  func.func @transform_14(%arg0: i32, %arg1: i32) -> (i32, i32, i32) {
    %c0_i32 = arith.constant 0 : i32
    %c0_i32_0 = arith.constant 0 : i32
    %c0_i32_1 = arith.constant 0 : i32
    return %arg1, %c0_i32, %c0_i32_0 : i32, i32, i32
  }
  func.func @transform_15(%arg0: i32, %arg1: i32) -> (i32, i32, i32) {
    %c0_i32 = arith.constant 0 : i32
    %c0_i32_0 = arith.constant 0 : i32
    %c0_i32_1 = arith.constant 0 : i32
    return %arg1, %c0_i32, %c0_i32_0 : i32, i32, i32
  }
  func.func @transform_16(%arg0: i32, %arg1: i32) -> (i32, i32, i32) {
    %c0_i32 = arith.constant 0 : i32
    %c0_i32_0 = arith.constant 0 : i32
    %c0_i32_1 = arith.constant 0 : i32
    return %arg1, %c0_i32, %c0_i32_0 : i32, i32, i32
  }
  func.func @transform_17(%arg0: i32, %arg1: i32) -> (i32, i32, i32) {
    %c0_i32 = arith.constant 0 : i32
    %c0_i32_0 = arith.constant 0 : i32
    %c0_i32_1 = arith.constant 0 : i32
    return %arg1, %c0_i32, %c0_i32_0 : i32, i32, i32
  }
  func.func @transform_18(%arg0: i32, %arg1: i32) -> (i32, i32) {
    %c0_i32 = arith.constant 0 : i32
    %c0_i32_0 = arith.constant 0 : i32
    return %arg0, %c0_i32 : i32, i32
  }
}

</mosaic_0001>

<bundles_post_ra>
// kernel: tpu_custom_call.1
= control target key start
LH: loop header
LB: loop body
LE: loop exit
PB: predicated region body
PF: predicated region fallthrough
CT: control target
= control target key end

     0   :  { %s14003_s0 = inlined_call_operand.hbm [shape: f32[6,16,128], index: 0, kind: input, shape index: {}]   ;;  %s14004_s1 = inlined_call_operand.vmem [shape: f32[1,128], index: 1, kind: input, shape index: {}]   ;;  %s14005_s2 = inlined_call_operand.<no memory space> [shape: f32[1,1], index: 2, kind: input, shape index: {}]   ;;  %s14006_s3 = inlined_call_operand.hbm [shape: bf16[2,128,128], index: 3, kind: input, shape index: {}]   ;;  %s14007_s4 = inlined_call_operand.vmem [shape: f32[2,1,128], index: 4, kind: input, shape index: {}]   ;;  %s14008_s5 = inlined_call_operand.hbm [shape: bf16[2,128,128], index: 5, kind: input, shape index: {}]   ;;  %s14009_s6 = inlined_call_operand.vmem [shape: f32[2,1,128], index: 6, kind: input, shape index: {}]   ;;  %s14010_s7 = inlined_call_operand.hbm [shape: bf16[2,128,128], index: 7, kind: input, shape index: {}]   ;;  %s14011_s8 = inlined_call_operand.vmem [shape: f32[2,1,128], index: 8, kind: input, shape index: {}]   ;;  %s14012_s9 = inlined_call_operand.hbm [shape: bf16[2,8,16,128], index: 9, kind: input, shape index: {}]   ;;  %s14013_s10 = inlined_call_operand.vmem [shape: f32[2,1,128], index: 10, kind: input, shape index: {}]   ;;  %s14014_s11 = inlined_call_operand.hbm [shape: bf16[2,128,128], index: 11, kind: input, shape index: {}]   ;;  %s14015_s12 = inlined_call_operand.hbm [shape: bf16[2,128,128], index: 12, kind: input, shape index: {}]   ;;  %s14016_s13 = inlined_call_operand.vmem [shape: f32[2,1,128], index: 13, kind: input, shape index: {}]   ;;  %s14017_s14 = inlined_call_operand.vmem [shape: f32[2,1,128], index: 14, kind: input, shape index: {}]   ;;  %s14018_s15 = inlined_call_operand.hbm [shape: bf16[2,128,128], index: 15, kind: input, shape index: {}]   ;;  %s14019_s16 = inlined_call_operand.vmem [shape: f32[2,1,128], index: 16, kind: input, shape index: {}]   ;;  %s14020_s17 = inlined_call_operand.vmem [shape: f32[2,1,128], index: 17, kind: input, shape index: {}]   ;;  %s14021_s18 = inlined_call_operand.vmem [shape: f32[6,1], index: 18, kind: output, shape index: {}]  }
   0x1   :  { %14055 = sst [smem:[#allocation42_spill]] %s14003_s0 }
   0x2   :  { %14056 = sst [smem:[#allocation43_spill]] %s14004_s1 }
   0x3   :  { %14057 = sst [smem:[#allocation44_spill]] %s14005_s2 }
   0x4   :  { %14058 = sst [smem:[#allocation45_spill]] %s14006_s3  ;;  %s14071_s29 = sld [smem:[#allocation44_spill]] }
   0x5   :  { %14059 = sst [smem:[#allocation46_spill]] %s14008_s5 }
   0x6   :  { %14060 = sst [smem:[#allocation47_spill]] %s14010_s7 }
   0x7   :  { %14061 = sst [smem:[#allocation48_spill]] %s14012_s9 }
   0x8   :  { %14062 = sst [smem:[#allocation49_spill]] %s14013_s10 }
   0x9   :  { %14063 = sst [smem:[#allocation50_spill]] %s14014_s11 }
   0xa   :  { %14064 = sst [smem:[#allocation51_spill]] %s14015_s12  ;;  %v23_v0 = vstv %s14071_s29 }
   0xb   :  { %14065 = sst [smem:[#allocation52_spill]] %s14016_s13  ;;  %24 = vst [vmem:[#allocation4] sm:$0x1] %v23_v0 }
   0xc   :  { %14066 = sst [smem:[#allocation53_spill]] %s14017_s14 }
   0xd   :  { %14067 = sst [smem:[#allocation54_spill]] %s14018_s15 }
   0xe   :  { %14068 = sst [smem:[#allocation55_spill]] %s14019_s16 }
   0xf   :  { %14069 = sst [smem:[#allocation56_spill]] %s14020_s17 }
  0x10   :  { %14070 = sst [smem:[#allocation57_spill]] %s14021_s18 }
  0x11   :  { %25 = vsyncpa [#allocation6], 0 }
  0x12   :  { %27 = vsyncpa [#allocation6 + $0x1], 0 }
  0x13   :  { %28 = vsyncpa [#allocation8], 0 }
  0x14   :  { %30 = vsyncpa [#allocation8 + $0x1], 0 }
  0x15   :  { %31 = vsyncpa [#allocation11], 0 }
  0x16   :  { %33 = vsyncpa [#allocation11 + $0x1], 0 }
  0x17   :  { %34 = vsyncpa [#allocation14], 0 }
  0x18   :  { %36 = vsyncpa [#allocation14 + $0x1], 0  ;;  %s11707_s30 = smov 0   ;;  %s11709_s0 = smov 0  }
  0x19   :  { %s11711_s19 = smov 0   ;;  %s11713_s1 = smov 0  }
  0x1a   :  { %s11715_s20 = smov 0   ;;  %s11717_s21 = smov 0  }
  0x1b LB: > { %14072 = sst [smem:[#allocation25_spill]] %s11572_s0  ;;  %s14023_s22 = sadd.s32 4294967295, %s11588_s21   ;;  %s11588_s21 = sphi %s11717_s21, %s42_s21   ;;  %s11584_s20 = sphi %s11715_s20, %s14150_s20   ;;  %s11580_s1 = sphi %s11713_s1, %s14149_s1   ;;  %s11576_s19 = sphi %s11711_s19, %s14148_s19   ;;  %s11572_s0 = sphi %s11709_s0, %s14147_s0   ;;  %s11568_s30 = sphi %s11707_s30, %s14146_s30  }
  0x1c   : > { %14073 = sst [smem:[#allocation26_spill]] %s11576_s19  ;;  %s51_s2 = sadd.s32 1, %s11584_s20 }
  0x1d   : > { %14074 = sst [smem:[#allocation27_spill]] %s11584_s20  ;;  %p52_p0 = scmp.ge.s32.totalorder %s51_s2, 2 }
  0x1e   : > { %14075 = sst [smem:[#allocation28_spill]] %s11588_s21  ;;  %s103_s23 = sadd.s32 1, %s11576_s19 }
  0x1f   : > { %p110_p1 = scmp.ne.s32.totalorder %s11576_s19, %s11572_s0  ;;  %p111_p2 = scmp.eq.s32.totalorder %s11588_s21, 0 }
  0x20   : > { %s14152_s2 = smov (%p52_p0, %s51_s2), 0  ;;  %p116_p4 = scmp.ne.s32.totalorder %s11572_s0, %s11568_s30 }
  0x21   : > { %14076 = sst [smem:[#allocation29_spill]] %s14152_s2  ;;  %p112_p3 = por %p111_p2, %p110_p1 }
  0x22   : > { %s100_s24 = ssub.s32 %s11584_s20, %s14152_s2  ;;  %p117_p5 = scmp.eq.s32.totalorder %s14023_s22, 0 }
  0x23   : > { %p101_p6 = scmp.eq.s32.totalorder %s100_s24, 0  ;;  %p10772_p8 = scmp.lt.s32.totalorder %s11588_s21, 2 }
  0x24   : > { %p11748_p7 = por %p117_p5, %p116_p4  ;;  %s14025_s27 = sand.u32 1, %s11576_s19  }
  0x25   : > { %s11754_s26 = scalar_select %p101_p6, %s11576_s19, %s103_s23  }
  0x26   : > { %s14077_s25 = scalar_select %p11748_p7, 1, 0 }
  0x27   : > { %14078 = sst [smem:[#allocation30_spill]] %s11754_s26  ;;  %s11758_s28 = sshll.u32 %s11584_s20, 10 }
  0x28   : > { %s11762_s29 = sshll.u32 %s14025_s27, 6  ;;  %p11764_p9 = pnand %p10772_p8, %p112_p3 }
  0x29   : > { %s11769_s24 = sand.u32 1, %s11588_s21   ;;  %s14080_s5 = sld [smem:[#allocation46_spill]] }
  0x2a   : > { %s567_s27 = scalar_lea.vmem [#allocation7], %s11762_s29  ;;  %p11786_p12 = pneg %p11764_p9 }
  0x2b   : > { %s574_s20 = sshll.u32 %s567_s27, 4  ;;  %s11778_s20 = int_to_ptr.vmem [resolvable:$true] %s574_s20 }
  0x2f   : > { %s11775_s23 = scalar_lea.hbm %s14080_s5, %s11758_s28  ;;  %s11291_s16 = scalar_lea.hbm %s14080_s5, 2048 }
  0x30   : > { %s11286_s18 = scalar_lea.hbm %s11775_s23, 1024  ;;  %p11292_p1 = scmp.lt.u32.totalorder %s11775_s23, %s14080_s5 }
  0x31   : > { %p11287_p11 = scmp.ne.s32.totalorder %s11775_s23, %s11286_s18  ;;  %p11293_p2 = scmp.lt.u32.totalorder %s11291_s16, %s11286_s18 }
  0x32   : > { %p11295_p4 = scmp.lt.u32.totalorder %s11286_s18, %s11775_s23 }
  0x33   : > { %p11289_p13 = pnand %p11786_p12, %p11287_p11  ;;  %p11294_p3 = por %p11293_p2, %p11292_p1 }
  0x35   : > { %p11290_p0 = pneg %p11289_p13  ;;  %p11296_p5 = por %p11295_p4, %p11294_p3 }
  0x37   : > { %p11297_p6 = pnand %p11296_p5, %p11290_p0 }
  0x39   : > { %11300 = shalt.err (!%p11297_p6)
}
  0x3a   : > { %s11301_s26 = scalar_lea.vmem %s11778_s20, 1024  ;;  %s11590_s22 = smov [#allocation7]  }
  0x3b   : > { %p11302_p8 = scmp.ne.s32.totalorder %s11778_s20, %s11301_s26  ;;  %s11306_s2 = sshll.u32 %s11590_s22, 4  ;;  %s11307_s2 = int_to_ptr.vmem [resolvable:$false] %s11306_s2 }
  0x3c   : > { %s11308_s14 = scalar_lea.vmem %s11307_s2, 2048  ;;  %p11309_p10 = scmp.lt.s32.totalorder %s11778_s20, %s11307_s2 }
  0x3d   : > { %p11304_p11 = pnand %p11302_p8, %p11786_p12  ;;  %p11310_p7 = scmp.lt.s32.totalorder %s11308_s14, %s11301_s26 }
  0x3f   : > { %p11305_p13 = pneg %p11304_p11  ;;  %p11311_p1 = por %p11310_p7, %p11309_p10 }
  0x41   : > { %p11312_p2 = pnand %p11311_p1, %p11305_p13 }
  0x43   : > { %11315 = shalt.err (!%p11312_p2)
}
  0x44   : > { %s14032_s16 = smov 64   ;;  %s14034_s18 = smov 4  }
  0x45   : > { %s14082_s26 = scalar_lea.sflag [#allocation8], %s11769_s24  ;;  %p729_p7 = scmp.lt.s32.totalorder %s11588_s21, 3 }
  0x46   : > { %10756 = dma.hbm_to_vmem [thread:$0]  (!%p11764_p9), %s11775_s23, 1024, %s11778_s20, %s14082_s26, %s14032_s16, %s14032_s16, %s14034_s18  }
  0x47   : > { %s14083_s9 = sld [smem:[#allocation48_spill]]  ;;  %p14084_p10 = scmp.ge.s32.totalorder %s11588_s21, 1 }
  0x48   : > { %s621_s5 = scalar_lea.vmem [#allocation10], %s11762_s29  ;;  %s14037_s20 = scalar_lea.sflag [#allocation11], %s11769_s24 }
  0x49   : > { %p11823_p0 = pnand %p14084_p10, %p729_p7  ;;  %s628_s13 = sshll.u32 %s621_s5, 4  ;;  %s11828_s13 = int_to_ptr.vmem [resolvable:$true] %s628_s13 }
  0x4b   : > { %s14085_s14 = scalar_select %p11823_p0, 1, 0 }
  0x4d   : > { %s11819_s2 = scalar_lea.hbm %s14083_s9, %s11758_s28  ;;  %s11321_s22 = scalar_lea.hbm %s14083_s9, 2048 }
  0x4e   : > { %s11316_s23 = scalar_lea.hbm %s11819_s2, 1024  ;;  %p11322_p6 = scmp.lt.u32.totalorder %s11819_s2, %s14083_s9 }
  0x4f   : > { %p11317_p3 = scmp.ne.s32.totalorder %s11819_s2, %s11316_s23  ;;  %p11323_p8 = scmp.lt.u32.totalorder %s11321_s22, %s11316_s23 }
  0x50   : > { %p11325_p13 = scmp.lt.u32.totalorder %s11316_s23, %s11819_s2 }
  0x51   : > { %p11319_p4 = pnand %p11317_p3, %p11786_p12  ;;  %p11324_p11 = por %p11323_p8, %p11322_p6 }
  0x53   : > { %p11320_p5 = pneg %p11319_p4  ;;  %p11326_p1 = por %p11325_p13, %p11324_p11 }
  0x55   : > { %p11327_p2 = pnand %p11326_p1, %p11320_p5 }
  0x57   : > { %11330 = shalt.err (!%p11327_p2)
}
  0x58   : > { %s11331_s5 = scalar_lea.vmem %s11828_s13, 1024  ;;  %s11593_s26 = smov [#allocation10]  }
  0x59   : > { %p11332_p7 = scmp.ne.s32.totalorder %s11828_s13, %s11331_s5  ;;  %s11336_s27 = sshll.u32 %s11593_s26, 4  ;;  %s11337_s27 = int_to_ptr.vmem [resolvable:$false] %s11336_s27 }
  0x5a   : > { %s11338_s16 = scalar_lea.vmem %s11337_s27, 2048  ;;  %p11339_p4 = scmp.lt.s32.totalorder %s11828_s13, %s11337_s27 }
  0x5b   : > { %p11334_p10 = pnand %p11332_p7, %p11786_p12  ;;  %p11340_p0 = scmp.lt.s32.totalorder %s11338_s16, %s11331_s5 }
  0x5d   : > { %p11335_p3 = pneg %p11334_p10  ;;  %p11341_p6 = por %p11340_p0, %p11339_p4 }
  0x5f   : > { %p11342_p8 = pnand %p11341_p6, %p11335_p3 }
  0x61   : > { %11345 = shalt.err (!%p11342_p8)
}
  0x62   : > { %s14086_s18 = smov 4   ;;  %s14087_s23 = smov 64  }
  0x63   : > { %10762 = dma.hbm_to_vmem [thread:$0]  (!%p11764_p9), %s11819_s2, 1024, %s11828_s13, %s14037_s20, %s14087_s23, %s14087_s23, %s14086_s18  }
  0x64   : > { %s14088_s12 = sld [smem:[#allocation51_spill]]  ;;  %s669_s27 = scalar_lea.vmem [#allocation13], %s11762_s29 }
  0x65   : > { %s676_s16 = sshll.u32 %s669_s27, 4  ;;  %s14038_s9 = scalar_lea.sflag [#allocation14], %s11769_s24  ;;  %s11864_s16 = int_to_ptr.vmem [resolvable:$true] %s676_s16 }
  0x6a   : > { %s11861_s5 = scalar_lea.hbm %s14088_s12, %s11758_s28  ;;  %s11351_s22 = scalar_lea.hbm %s14088_s12, 2048 }
  0x6b   : > { %s11346_s10 = scalar_lea.hbm %s11861_s5, 1024  ;;  %p11352_p13 = scmp.lt.u32.totalorder %s11861_s5, %s14088_s12 }
  0x6c   : > { %p11347_p0 = scmp.ne.s32.totalorder %s11861_s5, %s11346_s10  ;;  %p11353_p1 = scmp.lt.u32.totalorder %s11351_s22, %s11346_s10 }
  0x6d   : > { %p11355_p7 = scmp.lt.u32.totalorder %s11346_s10, %s11861_s5 }
  0x6e   : > { %p11349_p5 = pnand %p11347_p0, %p11786_p12  ;;  %p11354_p2 = por %p11353_p1, %p11352_p13 }
  0x70   : > { %p11350_p11 = pneg %p11349_p5  ;;  %p11356_p10 = por %p11355_p7, %p11354_p2 }
  0x72   : > { %p11357_p3 = pnand %p11356_p10, %p11350_p11 }
  0x74   : > { %11360 = shalt.err (!%p11357_p3)
}
  0x75   : > { %s11361_s27 = scalar_lea.vmem %s11864_s16, 1024  ;;  %s11594_s13 = smov [#allocation13]  }
  0x76   : > { %p11362_p4 = scmp.ne.s32.totalorder %s11864_s16, %s11361_s27  ;;  %s11366_s2 = sshll.u32 %s11594_s13, 4  ;;  %s11367_s2 = int_to_ptr.vmem [resolvable:$false] %s11366_s2 }
  0x77   : > { %s11368_s20 = scalar_lea.vmem %s11367_s2, 2048  ;;  %p11369_p0 = scmp.lt.s32.totalorder %s11864_s16, %s11367_s2 }
  0x78   : > { %p11364_p6 = pnand %p11362_p4, %p11786_p12  ;;  %p11370_p5 = scmp.lt.s32.totalorder %s11368_s20, %s11361_s27 }
  0x7a   : > { %p11365_p8 = pneg %p11364_p6  ;;  %p11371_p13 = por %p11370_p5, %p11369_p0 }
  0x7c   : > { %p11372_p1 = pnand %p11371_p13, %p11365_p8 }
  0x7e   : > { %11375 = shalt.err (!%p11372_p1)
}
  0x7f   : > { %10768 = dma.hbm_to_vmem [thread:$0]  (!%p11764_p9), %s11861_s5, 1024, %s11864_s16, %s14038_s9, %s14087_s23, %s14087_s23, %s14086_s18  }
  0x80   : > { %s14089_s3 = sld [smem:[#allocation45_spill]]  ;;  %s540_s27 = scalar_lea.vmem [#allocation5], %s11762_s29 }
  0x81   : > { %s547_s13 = sshll.u32 %s540_s27, 4  ;;  %s14090_s2 = sand.u32 1, %s11576_s19   ;;  %s11900_s13 = int_to_ptr.vmem [resolvable:$true] %s547_s13 }
  0x82   : > { %s11904_s20 = scalar_lea.sflag [#allocation6], %s14090_s2 }
  0x86   : > { %s11897_s26 = scalar_lea.hbm %s14089_s3, %s11758_s28  ;;  %s11381_s10 = scalar_lea.hbm %s14089_s3, 2048 }
  0x87   : > { %s11376_s12 = scalar_lea.hbm %s11897_s26, 1024  ;;  %p11382_p10 = scmp.lt.u32.totalorder %s11897_s26, %s14089_s3 }
  0x88   : > { %p11377_p11 = scmp.ne.s32.totalorder %s11897_s26, %s11376_s12  ;;  %p11383_p3 = scmp.lt.u32.totalorder %s11381_s10, %s11376_s12 }
  0x89   : > { %p11385_p6 = scmp.lt.u32.totalorder %s11376_s12, %s11897_s26 }
  0x8a   : > { %p11379_p2 = pnand %p11377_p11, %p11786_p12  ;;  %p11384_p4 = por %p11383_p3, %p11382_p10 }
  0x8c   : > { %p11380_p7 = pneg %p11379_p2  ;;  %p11386_p8 = por %p11385_p6, %p11384_p4 }
  0x8e   : > { %p11387_p0 = pnand %p11386_p8, %p11380_p7 }
  0x90   : > { %11390 = shalt.err (!%p11387_p0)
}
  0x91   : > { %s11391_s27 = scalar_lea.vmem %s11900_s13, 1024  ;;  %s11595_s2 = smov [#allocation5]  }
  0x92   : > { %p11392_p5 = scmp.ne.s32.totalorder %s11900_s13, %s11391_s27  ;;  %s11396_s5 = sshll.u32 %s11595_s2, 4  ;;  %s11397_s5 = int_to_ptr.vmem [resolvable:$false] %s11396_s5 }
  0x93   : > { %s11398_s9 = scalar_lea.vmem %s11397_s5, 2048  ;;  %p11399_p11 = scmp.lt.s32.totalorder %s11900_s13, %s11397_s5 }
  0x94   : > { %p11394_p13 = pnand %p11392_p5, %p11786_p12  ;;  %p11400_p2 = scmp.lt.s32.totalorder %s11398_s9, %s11391_s27 }
  0x96   : > { %p11395_p1 = pneg %p11394_p13  ;;  %p11401_p10 = por %p11400_p2, %p11399_p11 }
  0x98   : > { %p11402_p3 = pnand %p11401_p10, %p11395_p1 }
  0x9a   : > { %11405 = shalt.err (!%p11402_p3)
}
  0x9b   : > { %10753 = dma.hbm_to_vmem [thread:$0]  (!%p11764_p9), %s11897_s26, 1024, %s11900_s13, %s11904_s20, %s14087_s23, %s14087_s23, %s14086_s18  }
  0x9c   : > { %s14091_s7 = sld [smem:[#allocation47_spill]]  ;;  %s594_s22 = scalar_lea.vmem [#allocation9], %s11762_s29 }
  0x9d   : > { %s601_s27 = sshll.u32 %s594_s22, 4  ;;  %s11938_s27 = int_to_ptr.vmem [resolvable:$true] %s601_s27 }
  0xa2   : > { %s11935_s10 = scalar_lea.hbm %s14091_s7, %s11758_s28  ;;  %s11411_s13 = scalar_lea.hbm %s14091_s7, 2048 }
  0xa3   : > { %s11406_s2 = scalar_lea.hbm %s11935_s10, 1024  ;;  %p11412_p8 = scmp.lt.u32.totalorder %s11935_s10, %s14091_s7 }
  0xa4   : > { %p11407_p7 = scmp.ne.s32.totalorder %s11935_s10, %s11406_s2  ;;  %p11413_p0 = scmp.lt.u32.totalorder %s11411_s13, %s11406_s2 }
  0xa5   : > { %p11415_p13 = scmp.lt.u32.totalorder %s11406_s2, %s11935_s10 }
  0xa6   : > { %p11409_p4 = pnand %p11407_p7, %p11786_p12  ;;  %p11414_p5 = por %p11413_p0, %p11412_p8 }
  0xa8   : > { %p11410_p6 = pneg %p11409_p4  ;;  %p11416_p1 = por %p11415_p13, %p11414_p5 }
  0xaa   : > { %p11417_p11 = pnand %p11416_p1, %p11410_p6 }
  0xac   : > { %11420 = shalt.err (!%p11417_p11)
}
  0xad   : > { %s11421_s12 = scalar_lea.vmem %s11938_s27, 1024  ;;  %s11596_s16 = smov [#allocation9]  }
  0xae   : > { %p11422_p2 = scmp.ne.s32.totalorder %s11938_s27, %s11421_s12  ;;  %s11426_s22 = sshll.u32 %s11596_s16, 4  ;;  %s11427_s22 = int_to_ptr.vmem [resolvable:$false] %s11426_s22 }
  0xaf   : > { %s11428_s5 = scalar_lea.vmem %s11427_s22, 2048  ;;  %p11429_p7 = scmp.lt.s32.totalorder %s11938_s27, %s11427_s22 }
  0xb0   : > { %p11424_p10 = pnand %p11422_p2, %p11786_p12  ;;  %p11430_p4 = scmp.lt.s32.totalorder %s11428_s5, %s11421_s12 }
  0xb2   : > { %p11425_p3 = pneg %p11424_p10  ;;  %p11431_p8 = por %p11430_p4, %p11429_p7 }
  0xb4   : > { %p11432_p0 = pnand %p11431_p8, %p11425_p3 }
  0xb6   : > { %11435 = shalt.err (!%p11432_p0)
}
  0xb7   : > { %s14092_s2 = scalar_lea.sflag [#allocation8], %s11769_s24  ;;  %s14093_s11 = sld [smem:[#allocation50_spill]] }
  0xb8   : > { %10759 = dma.hbm_to_vmem [thread:$0]  (!%p11764_p9), %s11935_s10, 1024, %s11938_s27, %s14092_s2, %s14087_s23, %s14087_s23, %s14086_s18  }
  0xb9   : > { %s648_s9 = scalar_lea.vmem [#allocation12], %s11762_s29 }
  0xba   : > { %s655_s12 = sshll.u32 %s648_s9, 4  ;;  %s11973_s12 = int_to_ptr.vmem [resolvable:$true] %s655_s12 }
  0xbd   : > { %s11970_s20 = scalar_lea.hbm %s14093_s11, %s11758_s28  ;;  %s11441_s27 = scalar_lea.hbm %s14093_s11, 2048 }
  0xbe   : > { %s11436_s16 = scalar_lea.hbm %s11970_s20, 1024  ;;  %p11442_p1 = scmp.lt.u32.totalorder %s11970_s20, %s14093_s11 }
  0xbf   : > { %p11437_p6 = scmp.ne.s32.totalorder %s11970_s20, %s11436_s16  ;;  %p11443_p11 = scmp.lt.u32.totalorder %s11441_s27, %s11436_s16 }
  0xc0   : > { %p11445_p10 = scmp.lt.u32.totalorder %s11436_s16, %s11970_s20 }
  0xc1   : > { %p11439_p5 = pnand %p11437_p6, %p11786_p12  ;;  %p11444_p2 = por %p11443_p11, %p11442_p1 }
  0xc3   : > { %p11440_p13 = pneg %p11439_p5  ;;  %p11446_p3 = por %p11445_p10, %p11444_p2 }
  0xc5   : > { %p11447_p7 = pnand %p11446_p3, %p11440_p13 }
  0xc7   : > { %11450 = shalt.err (!%p11447_p7)
}
  0xc8   : > { %s11451_s26 = scalar_lea.vmem %s11973_s12, 1024  ;;  %s11597_s13 = smov [#allocation12]  }
  0xc9   : > { %p11452_p4 = scmp.ne.s32.totalorder %s11973_s12, %s11451_s26  ;;  %s11456_s9 = sshll.u32 %s11597_s13, 4  ;;  %s11457_s9 = int_to_ptr.vmem [resolvable:$false] %s11456_s9 }
  0xca   : > { %s11458_s22 = scalar_lea.vmem %s11457_s9, 2048  ;;  %p11459_p6 = scmp.lt.s32.totalorder %s11973_s12, %s11457_s9 }
  0xcb   : > { %p11454_p8 = pnand %p11452_p4, %p11786_p12  ;;  %p11460_p5 = scmp.lt.s32.totalorder %s11458_s22, %s11451_s26 }
  0xcd   : > { %p11455_p0 = pneg %p11454_p8  ;;  %p11461_p1 = por %p11460_p5, %p11459_p6 }
  0xcf   : > { %p11462_p11 = pnand %p11461_p1, %p11455_p0 }
  0xd1   : > { %11465 = shalt.err (!%p11462_p11)
}
  0xd2   : > { %s14094_s16 = scalar_lea.sflag [#allocation11], %s11769_s24  ;;  %s14095_s15 = sld [smem:[#allocation54_spill]] }
  0xd3   : > { %10765 = dma.hbm_to_vmem [thread:$0]  (!%p11764_p9), %s11970_s20, 1024, %s11973_s12, %s14094_s16, %s14087_s23, %s14087_s23, %s14086_s18  }
  0xd4   : > { %s702_s2 = scalar_lea.vmem [#allocation15], %s11762_s29 }
  0xd5   : > { %s709_s26 = sshll.u32 %s702_s2, 4  ;;  %s12008_s26 = int_to_ptr.vmem [resolvable:$true] %s709_s26 }
  0xd8   : > { %s12005_s5 = scalar_lea.hbm %s14095_s15, %s11758_s28  ;;  %s11471_s12 = scalar_lea.hbm %s14095_s15, 2048 }
  0xd9   : > { %s11466_s13 = scalar_lea.hbm %s12005_s5, 1024  ;;  %p11472_p3 = scmp.lt.u32.totalorder %s12005_s5, %s14095_s15 }
  0xda   : > { %p11467_p13 = scmp.ne.s32.totalorder %s12005_s5, %s11466_s13  ;;  %p11473_p7 = scmp.lt.u32.totalorder %s11471_s12, %s11466_s13 }
  0xdb   : > { %p11475_p8 = scmp.lt.u32.totalorder %s11466_s13, %s12005_s5 }
  0xdc   : > { %p11469_p2 = pnand %p11467_p13, %p11786_p12  ;;  %p11474_p4 = por %p11473_p7, %p11472_p3 }
  0xde   : > { %p11470_p10 = pneg %p11469_p2  ;;  %p11476_p0 = por %p11475_p8, %p11474_p4 }
  0xe0   : > { %p11477_p6 = pnand %p11476_p0, %p11470_p10 }
  0xe2   : > { %11480 = shalt.err (!%p11477_p6)
}
  0xe3   : > { %s11481_s29 = scalar_lea.vmem %s12008_s26, 1024  ;;  %s11598_s16 = smov [#allocation15]  }
  0xe4   : > { %p11482_p5 = scmp.ne.s32.totalorder %s12008_s26, %s11481_s29  ;;  %s11486_s10 = sshll.u32 %s11598_s16, 4  ;;  %s11487_s10 = int_to_ptr.vmem [resolvable:$false] %s11486_s10 }
  0xe5   : > { %s11488_s27 = scalar_lea.vmem %s11487_s10, 2048  ;;  %p11489_p13 = scmp.lt.s32.totalorder %s12008_s26, %s11487_s10 }
  0xe6   : > { %p11484_p1 = pnand %p11482_p5, %p11786_p12  ;;  %p11490_p2 = scmp.lt.s32.totalorder %s11488_s27, %s11481_s29 }
  0xe8   : > { %p11485_p11 = pneg %p11484_p1  ;;  %p11491_p3 = por %p11490_p2, %p11489_p13 }
  0xea   : > { %p11492_p7 = pnand %p11491_p3, %p11485_p11 }
  0xec   : > { %11495 = shalt.err (!%p11492_p7)
}
  0xed   : > { %s14096_s2 = scalar_lea.sflag [#allocation14], %s11769_s24  ;;  %p14097_p12 = scmp.ne.s32.totalorder %s14085_s14, 0 }
  0xee   : > { %10771 = dma.hbm_to_vmem [thread:$0]  (!%p11764_p9), %s12005_s5, 1024, %s12008_s26, %s14096_s2, %s14087_s23, %s14087_s23, %s14086_s18  }
  0xef   : > { %733 = sbr.rel (%p14097_p12) target bundleno = 7452 (0x1d1c), region = 88 }
  0xf6   : > { %s735_s17 = sand.u32 1, %s11572_s0   ;;  %p14098_p10 = scmp.ne.s32.totalorder %s14077_s25, 0 }
  0xf7   : > { %s12039_s13 = sshll.u32 %s735_s17, 6  ;;  %s736_s9 = scalar_lea.sflag [#allocation6], %s735_s17 }
  0xf8   : > { %s12042_s20 = scalar_lea.vmem [#allocation5], %s12039_s13 }
  0xf9   : > { %11547 = dma.done.wait (%p14098_p10), %s736_s9, 1024  }
  0xfa   : > { %11549 = vsyncadd (%p14098_p10), %s736_s9, 4294966272  ;;  %s14099_s30 = sadd.s32 4294967295, %s11588_s21   ;;  %s12051_s18 = scalar_lea.vmem [#allocation7], %s12039_s13 }
  0xfb   : > { %s744_s24 = sand.u32 1, %s14099_s30  }
  0xfc   : > { %s745_s14 = scalar_lea.sflag [#allocation8], %s744_s24 }
  0xfd   : > { %11551 = dma.done.wait (%p14098_p10), %s745_s14, 2048  }
  0xfe   : > { %11553 = vsyncadd (%p14098_p10), %s745_s14, 4294965248  ;;  %s12058_s23 = scalar_lea.vmem [#allocation9], %s12039_s13  ;;  %s763_s5 = scalar_lea.sflag [#allocation11], %s744_s24 }
  0xff   : > { %s12061_s26 = scalar_lea.vmem [#allocation10], %s12039_s13 }
 0x100   : > { %14100 = sst [smem:[#allocation31_spill]] %s12061_s26 }
 0x101   : > { %11555 = dma.done.wait (%p14098_p10), %s763_s5, 2048  }
 0x102   : > { %11557 = vsyncadd (%p14098_p10), %s763_s5, 4294965248  ;;  %s12068_s12 = scalar_lea.vmem [#allocation12], %s12039_s13  ;;  %s781_s22 = scalar_lea.sflag [#allocation14], %s744_s24 }
 0x103   : > { %14101 = sst [smem:[#allocation32_spill]] %s12068_s12  ;;  %s12071_s28 = scalar_lea.vmem [#allocation13], %s12039_s13 }
 0x104   : > { %14102 = sst [smem:[#allocation33_spill]] %s12071_s28 }
 0x105   : > { %11559 = dma.done.wait (%p14098_p10), %s781_s22, 2048  }
 0x106   : > { %11561 = vsyncadd (%p14098_p10), %s781_s22, 4294965248  ;;  %p897_p9 = scmp.lt.s32.totalorder %s11580_s1, 1  ;;  %p10773_p4 = scmp.eq.s32.totalorder %s11580_s1, 0 }
 0x107   : > { %s14103_s22 = sld [smem:[#allocation49_spill]]  ;;  %s14104_s15 = sld [smem:[#allocation52_spill]] }
 0x108   : > { %s12079_s29 = scalar_select %p897_p9, %s11580_s1, 1 }
 0x109   : > { %s14105_s16 = sld [smem:[#allocation53_spill]]  ;;  %s14106_s27 = sld [smem:[#allocation55_spill]] }
 0x10a   : > { %s14107_s9 = sld [smem:[#allocation56_spill]]  ;;  %s11599_s24 = smov [#allocation2]  }
 0x10b   : > { %s941_s26 = sshll.u32 %s11599_s24, 4  ;;  %s14108_s3 = sld [smem:[#allocation42_spill]]  ;;  %s942_s26 = int_to_ptr.vmem [resolvable:$true] %s941_s26 }
 0x10f   : > { %s914_s10 = scalar_lea.vmem %s14105_s16, %s12079_s29  ;;  %s917_s2 = scalar_lea.vmem %s14106_s27, %s12079_s29 }
 0x110   : > { %s920_s30 = scalar_lea.vmem %s14107_s9, %s12079_s29 }
 0x111   : > { %s11496_s7 = scalar_lea.hbm %s14108_s3, 1536 }
 0x112   : > { %p11497_p8 = scmp.ne.s32.totalorder %s14108_s3, %s11496_s7  ;;  %p11502_p5 = scmp.lt.u32.totalorder %s11496_s7, %s14108_s3 }
 0x114   : > { %p11498_p0 = pnand %p11497_p8, %p10773_p4 }
 0x116   : > { %p11499_p6 = pneg %p11498_p0 }
 0x118   : > { %p11504_p1 = pnand %p11502_p5, %p11499_p6 }
 0x11a   : > { %11507 = shalt.err (!%p11504_p1)  }
 0x11b   : > { %s11508_s12 = scalar_lea.vmem %s942_s26, 1536  ;;  %p11515_p3 = scmp.lt.s32.totalorder %s942_s26, %s942_s26 }
 0x11c   : > { %p11509_p11 = scmp.ne.s32.totalorder %s942_s26, %s11508_s12  ;;  %p11516_p7 = scmp.lt.s32.totalorder %s11508_s12, %s11508_s12 }
 0x11e   : > { %p11510_p13 = pnand %p11509_p11, %p10773_p4  ;;  %p11517_p12 = por %p11516_p7, %p11515_p3 }
 0x120   : > { %p11511_p2 = pneg %p11510_p13 }
 0x122   : > { %p11518_p10 = pnand %p11517_p12, %p11511_p2 }
 0x124   : > { %11521 = shalt.err (!%p11518_p10)  }
 0x125   : > { %10748 = dma.hbm_to_vmem [thread:$0]  (%p10773_p4), %s14108_s3, 1536, %s942_s26, [#allocation3] }
 0x126   : > { %s12133_s25 = scalar_lea.vmem [#allocation15], %s12039_s13 }
 0x127   : > { %11563 = dma.done.wait (%p10773_p4), [#allocation3], 1536 }
 0x128   : > { %11565 = vsyncadd (%p10773_p4), [#allocation3], 4294965760  ;;  %v10834_v1 = vld [vmem:[%s12051_s18] sm:$0xff]   ;;  %v10835_v2 = vld [vmem:[%s12051_s18 + $0x8] sm:$0xff]   ;;  %v14045_v43 = vmov 0.0   ;;  %vm11601_vm0 = vmmov 0   ;;  %s14116_s17 = scalar_lea.vmem %s14007_s4, %s12079_s29  ;;  %s14117_s5 = scalar_lea.vmem %s14011_s8, %s12079_s29 }
 0x129   : > { %9809 = vmatprep.subr.bf16.mxu1 %v10834_v1  ;;  %v10836_v3 = vld [vmem:[%s12042_s20] sm:$0xff]   ;;  %v10837_v4 = vld [vmem:[%s12051_s18 + $0x10] sm:$0xff]   ;;  %v10838_v5 = vld [vmem:[%s12042_s20 + $0x8] sm:$0xff]   ;;  %vm1441_vm1 = vcmask 130048   ;;  %s11602_s7 = smov 112   ;;  %s11603_s11 = smov 96  }
 0x12a   : > { %9810 = vmatpush3.bf16.msra.mxu1 %v10834_v1  ;;  %9781 = vmatprep.subr.bf16.mxu0 %v10836_v3  ;;  %v10840_v6 = vld [vmem:[%s12042_s20 + $0x10] sm:$0xff]   ;;  %v10839_v7 = vld [vmem:[%s12051_s18 + $0x18] sm:$0xff]   ;;  %v10841_v9 = vld [vmem:[%s12051_s18 + $0x20] sm:$0xff]   ;;  %s14121_s0 = sld [smem:[#allocation31_spill]]  ;;  %s11604_s21 = smov 80  }
 0x12b   : > { %9811 = vmatprep.subr.bf16.mxu1 %v10835_v2  ;;  %9782 = vmatpush3.bf16.msra.mxu0 %v10836_v3  ;;  %v10842_v8 = vld [vmem:[%s12042_s20 + $0x18] sm:$0xff]   ;;  %v10844_v10 = vld [vmem:[%s12042_s20 + $0x20] sm:$0xff]   ;;  %v10843_v14 = vld [vmem:[%s12051_s18 + $0x28] sm:$0xff]   ;;  %s11605_s12 = smov 64   ;;  %s11606_s19 = smov 48  }
 0x12c   : > { %9783 = vmatprep.subr.bf16.mxu0 %v10838_v5  ;;  %v949_v11 = vld [vmem:[#allocation2] sm:$0xff]  ;;  %v950_v12 = vld [vmem:[#allocation2 + $0x8] sm:$0xff]  ;;  %v10845_v16 = vld [vmem:[%s12051_s18 + $0x30] sm:$0xff]   ;;  %s11607_s28 = smov 32   ;;  %s11608_s13 = smov 16  }
 0x12d   : > { %v12149_v13 = vpack.c.bf16 %v950_v12, %v949_v11  ;;  %v10846_v15 = vld [vmem:[%s12042_s20 + $0x28] sm:$0xff]   ;;  %v10848_v17 = vld [vmem:[%s12042_s20 + $0x30] sm:$0xff]   ;;  %v10847_v18 = vld [vmem:[%s12051_s18 + $0x38] sm:$0xff]   ;;  %s14115_s18 = scalar_lea.vmem %s14009_s6, %s12079_s29  ;;  %p9435_p9 = scmp.ne.s32.totalorder %s11580_s1, 1 }
 0x12e   : > { %9812 = vmatpush3.bf16.msra.mxu1 %v10835_v2  ;;  %v951_v19 = vld [vmem:[#allocation2 + $0x10] sm:$0xff]  ;;  %v952_v20 = vld [vmem:[#allocation2 + $0x18] sm:$0xff]  ;;  %v953_v22 = vld [vmem:[#allocation2 + $0x20] sm:$0xff]  ;;  %vm8872_vm2 = vcmask (!%p9435_p9), 1041409   ;;  %vm8875_vm3 = vcmask (!%p9435_p9), 1042434   ;;  %vm8878_vm4 = vcmask (!%p9435_p9), 1043459  }
 0x12f   : > { %9813 = vmatprep.subr.bf16.mxu1 %v10837_v4  ;;  %9784 = vmatpush3.bf16.msra.mxu0 %v10838_v5  ;;  %14109 = vst [vmem:[#allocation34_spill] sm:$0xff] %v12149_v13  ;;  %v10849_v21 = vld [vmem:[%s12042_s20 + $0x38] sm:$0xff]   ;;  %v954_v23 = vld [vmem:[#allocation2 + $0x28] sm:$0xff]  ;;  %v12160_v25 = vpack.c.bf16 %v952_v20, %v951_v19  ;;  %v955_v28 = vld [vmem:[#allocation2 + $0x30] sm:$0xff]  ;;  %s14134_s20 = sld [smem:[#allocation33_spill]]  ;;  %vm8881_vm5 = vcmask (!%p9435_p9), 1044484  }
 0x130   : > { %9785 = vmatprep.subr.bf16.mxu0 %v10840_v6  ;;  %9825 = vmatprep.mubr.bf16.mxu1 %v12149_v13  ;;  %v10850_v24 = vld [vmem:[%s12058_s23] sm:$0xff]   ;;  %v12162_v26 = vpack.c.bf16 %v954_v23, %v953_v22  ;;  %v10851_v27 = vld [vmem:[%s12058_s23 + $0x8] sm:$0xff]   ;;  %v956_v29 = vld [vmem:[#allocation2 + $0x38] sm:$0xff]  ;;  %vm8884_vm6 = vcmask (!%p9435_p9), 1045509   ;;  %vm8887_vm7 = vcmask (!%p9435_p9), 1045504   ;;  %vm8899_vm8 = vcmask (!%p9435_p9), 5120  }
 0x131   : > { %9797 = vmatprep.mubr.bf16.mxu0 %v12149_v13  ;;  %14110 = vst [vmem:[#allocation35_spill] sm:$0xff] %v12160_v25  ;;  %v957_v30 = vld [vmem:[#allocation2 + $0x40] sm:$0xff]  ;;  %v958_v31 = vld [vmem:[#allocation2 + $0x48] sm:$0xff]  ;;  %v10852_v32 = vld [vmem:[%s12058_s23 + $0x10] sm:$0xff]   ;;  %v12170_v33 = vpack.c.bf16 %v956_v29, %v955_v28 }
 0x132   : > { %9814 = vmatpush3.bf16.msra.mxu1 %v10837_v4  ;;  %14111 = vst [vmem:[#allocation36_spill] sm:$0xff] %v12162_v26  ;;  %v12172_v34 = vpack.c.bf16 %v958_v31, %v957_v30  ;;  %v10853_v35 = vld [vmem:[%s12058_s23 + $0x18] sm:$0xff]   ;;  %v959_v36 = vld [vmem:[#allocation2 + $0x50] sm:$0xff]  ;;  %v10854_v38 = vld [vmem:[%s12058_s23 + $0x20] sm:$0xff]  }
 0x133   : > { %9815 = vmatprep.subr.bf16.mxu1 %v10839_v7  ;;  %9786 = vmatpush3.bf16.msra.mxu0 %v10840_v6  ;;  %14112 = vst [vmem:[#allocation37_spill] sm:$0xff] %v12170_v33  ;;  %v960_v37 = vld [vmem:[#allocation2 + $0x58] sm:$0xff]  ;;  %v10855_v40 = vld [vmem:[%s12058_s23 + $0x28] sm:$0xff]   ;;  %v12204_v45 = vld [vmem:[%s14115_s18] ss:$0 sm:$0xff]  ;;  %s14135_s18 = sld [smem:[#allocation32_spill]] }
 0x134   : > { %9787 = vmatprep.subr.bf16.mxu0 %v10842_v8  ;;  %14113 = vst [vmem:[#allocation38_spill] sm:$0xff] %v12172_v34  ;;  %v12180_v39 = vpack.c.bf16 %v960_v37, %v959_v36  ;;  %v10856_v41 = vld [vmem:[%s12058_s23 + $0x30] sm:$0xff]   ;;  %v10857_v42 = vld [vmem:[%s12058_s23 + $0x38] sm:$0xff]  }
 0x135   : > { %v12211_v46 = vld [vmem:[%s14116_s17] ss:$0 sm:$0xff]  ;;  %s14141_s17 = scalar_lea.vmem %s14103_s22, %s12079_s29 }
 0x136   : > { %9816 = vmatpush3.bf16.msra.mxu1 %v10839_v7  ;;  %14114 = vst [vmem:[#allocation39_spill] sm:$0xff] %v12180_v39 }
 0x137   : > { %9817 = vmatprep.subr.bf16.mxu1 %v10841_v9  ;;  %9788 = vmatpush3.bf16.msra.mxu0 %v10842_v8 }
 0x138   : > { %9789 = vmatprep.subr.bf16.mxu0 %v10844_v10 }
 0x13a   : > { %9818 = vmatpush3.bf16.msra.mxu1 %v10841_v9 }
 0x13b   : > { %9819 = vmatprep.subr.bf16.mxu1 %v10843_v14  ;;  %9790 = vmatpush3.bf16.msra.mxu0 %v10844_v10 }
 0x13c   : > { %9791 = vmatprep.subr.bf16.mxu0 %v10846_v15 }
 0x13e   : > { %9820 = vmatpush3.bf16.msra.mxu1 %v10843_v14 }
 0x13f   : > { %9821 = vmatprep.subr.bf16.mxu1 %v10845_v16  ;;  %9792 = vmatpush3.bf16.msra.mxu0 %v10846_v15 }
 0x140   : > { %9793 = vmatprep.subr.bf16.mxu0 %v10848_v17 }
 0x142   : > { %9822 = vmatpush3.bf16.msra.mxu1 %v10845_v16 }
 0x143   : > { %9823 = vmatprep.subr.bf16.mxu1 %v10847_v18  ;;  %9794 = vmatpush3.bf16.msra.mxu0 %v10848_v17 }
 0x144   : > { %9795 = vmatprep.subr.bf16.mxu0 %v10849_v21 }
 0x146   : > { %9824 = vmatpush3.bf16.msra.mxu1 %v10847_v18 }
 0x147   : > { %9796 = vmatpush3.bf16.msra.mxu0 %v10849_v21  ;;  %9871 = vmatprep.subr.bf16.mxu1 %v14045_v43 }
 0x148   : > { %9837 = vmatprep.subr.bf16.mxu0 %v10850_v24 }
 0x149   : > { %9826 = vmatmul.mubr.bf16.vlgmr.msra.gmra.mrb[0].mxu1 %v12160_v25 }
 0x14a   : > { %9829 = vmatprep.mubr.bf16.mxu1 %v12162_v26  ;;  %9798 = vmatmul.mubr.bf16.vlgmr.msra.gmra.mrb[0].mxu0 %v12160_v25 }
 0x14b   : > { %9801 = vmatprep.mubr.bf16.mxu0 %v12162_v26  ;;  %9838 = vmatpush3.bf16.msra.mxu0 %v10850_v24 }
 0x14c   : > { %9839 = vmatprep.subr.bf16.mxu0 %v10851_v27 }
 0x14f   : > { %9840 = vmatpush3.bf16.msra.mxu0 %v10851_v27 }
 0x150   : > { %9841 = vmatprep.subr.bf16.mxu0 %v10852_v32 }
 0x151   : > { %9830 = vmatmul.mubr.bf16.gmra.mrb[4].mxu1 %v12170_v33 }
 0x152   : > { %9833 = vmatprep.mubr.bf16.mxu1 %v12172_v34  ;;  %9802 = vmatmul.mubr.bf16.gmra.mrb[4].mxu0 %v12170_v33 }
 0x153   : > { %9805 = vmatprep.mubr.bf16.mxu0 %v12172_v34  ;;  %9842 = vmatpush3.bf16.msra.mxu0 %v10852_v32 }
 0x154   : > { %9843 = vmatprep.subr.bf16.mxu0 %v10853_v35 }
 0x157   : > { %9844 = vmatpush3.bf16.msra.mxu0 %v10853_v35 }
 0x158   : > { %9845 = vmatprep.subr.bf16.mxu0 %v10854_v38 }
 0x159   : > { %9834 = vmatmul.mubr.bf16.gmra.mrb[8].mxu1 %v12180_v39 }
 0x15a   : > { %9806 = vmatmul.mubr.bf16.gmra.mrb[8].mxu0 %v12180_v39  ;;  %9873 = vmatprep.mubr.msk.bf16.mxu1 %vm11601_vm0, %v14045_v43 }
 0x15b   : > { %9846 = vmatpush3.bf16.msra.mxu0 %v10854_v38  ;;  %9853 = vmatprep.mubr.bf16.mxu0 %v12149_v13 }
 0x15c   : > { %9847 = vmatprep.subr.bf16.mxu0 %v10855_v40 }
 0x15f   : > { %9848 = vmatpush3.bf16.msra.mxu0 %v10855_v40 }
 0x160   : > { %9849 = vmatprep.subr.bf16.mxu0 %v10856_v41 }
 0x163   : > { %9850 = vmatpush3.bf16.msra.mxu0 %v10856_v41 }
 0x164   : > { %9851 = vmatprep.subr.bf16.mxu0 %v10857_v42 }
 0x167   : > { %9852 = vmatpush3.bf16.msra.mxu0 %v10857_v42 }
 0x168   : > { %9865 = vmatprep.subr.bf16.mxu0 %v14045_v43 }
 0x16a   : > { %9854 = vmatmul.mubr.bf16.vlgmr.msra.gmra.mrb[12].mxu0 %v12160_v25 }
 0x16b   : > { %9857 = vmatprep.mubr.bf16.mxu0 %v12162_v26 }
 0x172   : > { %9858 = vmatmul.mubr.bf16.gmra.mrb[16].mxu0 %v12170_v33 }
 0x173   : > { %9861 = vmatprep.mubr.bf16.mxu0 %v12172_v34 }
 0x17a   : > { %9862 = vmatmul.mubr.bf16.gmra.mrb[20].mxu0 %v12180_v39 }
 0x17b   : > { %9867 = vmatprep.mubr.msk.bf16.mxu0 %vm11601_vm0, %v14045_v43 }
 0x21c   : > { %v9827_v44 = vpop.f32.mrb[0].mxu1 }
 0x21d   : > { %v1224_v47 = vpop.f32.mrb[1].mxu1  ;;  %v9799_v49 = vpop.f32.mrb[0].mxu0  ;;  %v1233_v50 = vadd.f32 %v9827_v44, %v12204_v45 }
 0x21e   : > { %v9828_v48 = vpop.f32.mrb[2].mxu1  ;;  %v1081_v53 = vadd.f32 %v9799_v49, %v12211_v46  ;;  %v1072_v54 = vpop.f32.mrb[1].mxu0  ;;  %v1225_v55 = vadd.f32 %v12204_v45, %v1224_v47 }
 0x21f   : > { %v1236_v51 = vadd.f32 %v9828_v48, %v12204_v45  ;;  %v1227_v52 = vpop.f32.mrb[3].mxu1  ;;  %v1073_v57 = vadd.f32 %v12211_v46, %v1072_v54  ;;  %v9800_v58 = vpop.f32.mrb[2].mxu0 }
 0x220   : > { %v1228_v56 = vadd.f32 %v12204_v45, %v1227_v52  ;;  %v1084_v60 = vadd.f32 %v9800_v58, %v12211_v46  ;;  %v1075_v61 = vpop.f32.mrb[3].mxu0 }
 0x221   : > { %v12219_v59 = vpack.c.bf16 %v1236_v51, %v1233_v50  ;;  %v1076_v63 = vadd.f32 %v12211_v46, %v1075_v61 }
 0x222   : > { %v12222_v62 = vpack.c.bf16 %v1228_v56, %v1225_v55  ;;  %v12227_v1 = vpack.c.bf16 %v1084_v60, %v1081_v53  ;;  %v9231_v55 = vld [vmem:[%s14117_s5] ss:$0 sm:$0xff]  ;;  %s14142_s5 = scalar_lea.vmem %s14104_s15, %s12079_s29 }
 0x223   : > { %v1493_v0 = vsel %vm1441_vm1, %v12219_v59, 0  ;;  %v12231_v4 = vpack.c.bf16 %v1076_v63, %v1073_v57 }
 0x224   : > { %v9831_v2 = vpop.f32.mrb[4].mxu1  ;;  %9872 = vmatpush3.bf16.xpose.msra.mxu1 %v1493_v0  ;;  %v1446_v3 = vsel %vm1441_vm1, %v12222_v62, 0 }
 0x225   : > { %v1240_v5 = vpop.f32.mrb[5].mxu1  ;;  %9866 = vmatpush3.bf16.xpose.msra.mxu0 %v1446_v3  ;;  %9877 = vmatprep.subr.bf16.mxu1 %v14045_v43  ;;  %v9803_v7 = vpop.f32.mrb[4].mxu0  ;;  %v1249_v8 = vadd.f32 %v9831_v2, %v12204_v45 }
 0x226   : > { %v9832_v6 = vpop.f32.mrb[6].mxu1  ;;  %9889 = vmatprep.subr.bf16.mxu0 %v14045_v43  ;;  %v1097_v11 = vadd.f32 %v9803_v7, %v12211_v46  ;;  %v1088_v12 = vpop.f32.mrb[5].mxu0  ;;  %v1241_v14 = vadd.f32 %v12204_v45, %v1240_v5 }
 0x227   : > { %v1252_v9 = vadd.f32 %v9832_v6, %v12204_v45  ;;  %v1243_v10 = vpop.f32.mrb[7].mxu1  ;;  %v1089_v16 = vadd.f32 %v12211_v46, %v1088_v12  ;;  %v9804_v17 = vpop.f32.mrb[6].mxu0 }
 0x228   : > { %v1244_v15 = vadd.f32 %v12204_v45, %v1243_v10  ;;  %v1100_v19 = vadd.f32 %v9804_v17, %v12211_v46  ;;  %v1091_v20 = vpop.f32.mrb[7].mxu0 }
 0x229   : > { %v12241_v18 = vpack.c.bf16 %v1252_v9, %v1249_v8  ;;  %v1092_v22 = vadd.f32 %v12211_v46, %v1091_v20 }
 0x22a   : > { %v12244_v21 = vpack.c.bf16 %v1244_v15, %v1241_v14  ;;  %v12249_v23 = vpack.c.bf16 %v1100_v19, %v1097_v11 }
 0x22b   : > { %9874 = vmatmul.mubr.msk.bf16.vlgmr.msra.gmra.mrb[12].mxu1 %vm1441_vm1, %v12227_v1  ;;  %v12253_v27 = vpack.c.bf16 %v1092_v22, %v1089_v16  ;;  %v1587_v53 = vsel %vm1441_vm1, %v12241_v18, 0 }
 0x22c   : > { %v1540_v24 = vsel %vm1441_vm1, %v12244_v21, 0  ;;  %9879 = vmatprep.mubr.msk.bf16.mxu1 %vm11601_vm0, %v14045_v43  ;;  %v9835_v28 = vpop.f32.mrb[8].mxu1  ;;  %9868 = vmatmul.mubr.msk.bf16.vlgmr.msra.gmra.mrb[24].mxu0 %vm1441_vm1, %v12231_v4 }
 0x22d   : > { %9878 = vmatpush3.bf16.xpose.msra.mxu1 %v1540_v24  ;;  %v1265_v29 = vadd.f32 %v9835_v28, %v12204_v45  ;;  %v1256_v30 = vpop.f32.mrb[9].mxu1  ;;  %9891 = vmatprep.mubr.msk.bf16.mxu0 %vm11601_vm0, %v14045_v43  ;;  %v9807_v35 = vpop.f32.mrb[8].mxu0 }
 0x22e   : > { %9883 = vmatprep.subr.bf16.mxu1 %v14045_v43  ;;  %v1257_v31 = vadd.f32 %v12204_v45, %v1256_v30  ;;  %v9836_v32 = vpop.f32.mrb[10].mxu1  ;;  %v1113_v37 = vadd.f32 %v9807_v35, %v12211_v46  ;;  %v1104_v38 = vpop.f32.mrb[9].mxu0 }
 0x22f   : > { %v1268_v36 = vadd.f32 %v9836_v32, %v12204_v45  ;;  %v1259_v40 = vpop.f32.mrb[11].mxu1  ;;  %v1105_v41 = vadd.f32 %v12211_v46, %v1104_v38  ;;  %v9808_v42 = vpop.f32.mrb[10].mxu0 }
 0x230   : > { %v1260_v44 = vadd.f32 %v12204_v45, %v1259_v40  ;;  %v1116_v48 = vadd.f32 %v9808_v42, %v12211_v46  ;;  %v1107_v49 = vpop.f32.mrb[11].mxu0 }
 0x231   : > { %v12268_v47 = vpack.c.bf16 %v1268_v36, %v1265_v29  ;;  %v1108_v51 = vadd.f32 %v12211_v46, %v1107_v49 }
 0x232   : > { %v12271_v50 = vpack.c.bf16 %v1260_v44, %v1257_v31  ;;  %v12274_v52 = vpack.c.bf16 %v1116_v48, %v1113_v37 }
 0x233   : > { %v12282_v54 = vpack.c.bf16 %v1108_v51, %v1105_v41  ;;  %v1681_v46 = vsel %vm1441_vm1, %v12268_v47, 0 }
 0x234   : > { %9880 = vmatmul.mubr.msk.bf16.vlgmr.msra.gmra.mrb[16].mxu1 %vm1441_vm1, %v12253_v27  ;;  %v1634_v45 = vsel %vm1441_vm1, %v12271_v50, 0 }
 0x235   : > { %9884 = vmatpush3.bf16.xpose.msra.mxu1 %v1587_v53  ;;  %9885 = vmatprep.mubr.msk.bf16.mxu1 %vm11601_vm0, %v14045_v43 }
 0x236   : > { %9895 = vmatprep.subr.bf16.mxu1 %v14045_v43  ;;  %9890 = vmatpush3.bf16.xpose.msra.mxu0 %v1634_v45 }
 0x237   : > { %9901 = vmatprep.subr.bf16.mxu0 %v14045_v43 }
 0x23c   : > { %9886 = vmatmul.mubr.msk.bf16.vlgmr.msra.gmra.mrb[20].mxu1 %vm1441_vm1, %v12249_v23 }
 0x23d   : > { %9896 = vmatpush3.bf16.xpose.msra.mxu1 %v1681_v46  ;;  %9897 = vmatprep.mubr.msk.bf16.mxu1 %vm11601_vm0, %v14045_v43  ;;  %v9855_v56 = vpop.f32.mrb[12].mxu0 }
 0x23e   : > { %9892 = vmatmul.mubr.msk.bf16.vlgmr.msra.gmra.mrb[28].mxu0 %vm1441_vm1, %v12282_v54  ;;  %9907 = vmatprep.subr.bf16.mxu1 %v14045_v43  ;;  %v1385_v57 = vadd.f32 %v9855_v56, %v9231_v55  ;;  %v1376_v58 = vpop.f32.mrb[13].mxu0 }
 0x23f   : > { %9903 = vmatprep.mubr.msk.bf16.mxu0 %vm11601_vm0, %v14045_v43  ;;  %v9856_v60 = vpop.f32.mrb[14].mxu0  ;;  %v1377_v8 = vadd.f32 %v9231_v55, %v1376_v58 }
 0x240   : > { %v1388_v61 = vadd.f32 %v9856_v60, %v9231_v55  ;;  %v1379_v0 = vpop.f32.mrb[15].mxu0 }
 0x241   : > { %v1380_v11 = vadd.f32 %v9231_v55, %v1379_v0 }
 0x242   : > { %v12304_v63 = vpack.c.bf16 %v1388_v61, %v1385_v57 }
 0x243   : > { %v12312_v14 = vpack.c.bf16 %v1380_v11, %v1377_v8 }
 0x244   : > { %9898 = vmatmul.mubr.msk.bf16.vlgmr.msra.gmra.mrb[24].mxu1 %vm1441_vm1, %v12274_v52 }
 0x245   : > { %9908 = vmatpush3.bf16.msra.mxu1 %v12304_v63  ;;  %9909 = vmatprep.mubr.msk.bf16.mxu1 %vm11601_vm0, %v14045_v43  ;;  %v9859_v2 = vpop.f32.mrb[16].mxu0 }
 0x246   : > { %9919 = vmatprep.subr.bf16.mxu1 %v14045_v43  ;;  %v1392_v3 = vpop.f32.mrb[17].mxu0  ;;  %v1401_v15 = vadd.f32 %v9859_v2, %v9231_v55  ;;  %9902 = vmatpush3.bf16.msra.mxu0 %v12312_v14 }
 0x247   : > { %v9860_v5 = vpop.f32.mrb[18].mxu0  ;;  %v1393_v16 = vadd.f32 %v9231_v55, %v1392_v3  ;;  %9913 = vmatprep.subr.bf16.mxu0 %v14045_v43 }
 0x248   : > { %v1395_v6 = vpop.f32.mrb[19].mxu0  ;;  %v1404_v17 = vadd.f32 %v9860_v5, %v9231_v55 }
 0x249   : > { %v1396_v19 = vadd.f32 %v9231_v55, %v1395_v6 }
 0x24a   : > { %v12314_v20 = vpack.c.bf16 %v1404_v17, %v1401_v15 }
 0x24b   : > { %v12317_v22 = vpack.c.bf16 %v1396_v19, %v1393_v16 }
 0x24d   : > { %v9863_v7 = vpop.f32.mrb[20].mxu0 }
 0x24e   : > { %v1408_v9 = vpop.f32.mrb[21].mxu0  ;;  %v1417_v24 = vadd.f32 %v9863_v7, %v9231_v55 }
 0x24f   : > { %v9864_v10 = vpop.f32.mrb[22].mxu0  ;;  %v1409_v28 = vadd.f32 %v9231_v55, %v1408_v9 }
 0x250   : > { %v1411_v12 = vpop.f32.mrb[23].mxu0  ;;  %v1420_v29 = vadd.f32 %v9864_v10, %v9231_v55 }
 0x251   : > { %v1412_v30 = vadd.f32 %v9231_v55, %v1411_v12 }
 0x252   : > { %v12320_v31 = vpack.c.bf16 %v1420_v29, %v1417_v24 }
 0x253   : > { %v12322_v32 = vpack.c.bf16 %v1412_v30, %v1409_v28 }
 0x2fe   : > { %v1529_v35 = vpop.f32.mrb[12].mxu1 }
 0x2ff   : > { %v1730_v36 = vsel %vm1441_vm1, %v1529_v35, -inf  ;;  %v9875_v37 = vpop.f32.mrb[13].mxu1  ;;  %v12325_v38 = vpop.f32.mrb[24].mxu0 }
 0x300   : > { %1731 = vmax.xlane.f32.xlu0 %v1730_v36  ;;  %v1532_v40 = vpop.f32.mrb[14].mxu1  ;;  %v9869_v41 = vpop.f32.mrb[25].mxu0 }
 0x301   : > { %v12327_v42 = vpop.f32.mrb[26].mxu0  ;;  %v9876_v44 = vpop.f32.mrb[15].mxu1  ;;  %v1733_v49 = vsel %vm1441_vm1, %v1532_v40, -inf }
 0x302   : > { %v9870_v48 = vpop.f32.mrb[27].mxu0 }
 0x304   : > { %1734 = vmax.xlane.f32.xlu0 %v1733_v49 }
 0x307   : > { %v12330_v51 = vpop.f32.mrb[16].mxu1 }
 0x308   : > { %v9881_v53 = vpop.f32.mrb[17].mxu1 }
 0x309   : > { %v12332_v45 = vpop.f32.mrb[18].mxu1 }
 0x30a   : > { %v9882_v46 = vpop.f32.mrb[19].mxu1 }
 0x30f   : > { %v1623_v55 = vpop.f32.mrb[20].mxu1 }
 0x310   : > { %v1742_v56 = vsel %vm1441_vm1, %v1623_v55, -inf  ;;  %v9887_v57 = vpop.f32.mrb[21].mxu1 }
 0x311   : > { %1743 = vmax.xlane.f32.xlu1 %v1742_v56  ;;  %v1626_v58 = vpop.f32.mrb[22].mxu1  ;;  %v12335_v60 = vpop.f32.mrb[28].mxu0 }
 0x312   : > { %v9888_v61 = vpop.f32.mrb[23].mxu1  ;;  %v9893_v0 = vpop.f32.mrb[29].mxu0  ;;  %v1745_v3 = vsel %vm1441_vm1, %v1626_v58, -inf }
 0x313   : > { %v12337_v2 = vpop.f32.mrb[30].mxu0 }
 0x314   : > { %v9894_v5 = vpop.f32.mrb[31].mxu0 }
 0x315   : > { %1746 = vmax.xlane.f32.xlu1 %v1745_v3 }
 0x317   : > { %v1717_v6 = vpop.f32.mrb[24].mxu1 }
 0x318   : > { %v9899_v7 = vpop.f32.mrb[25].mxu1  ;;  %v1754_v8 = vsel %vm1441_vm1, %v1717_v6, -inf }
 0x319   : > { %1755 = vmax.xlane.f32.xlu0 %v1754_v8  ;;  %v1720_v9 = vpop.f32.mrb[26].mxu1 }
 0x31a   : > { %v1757_v10 = vsel %vm1441_vm1, %v1720_v9, -inf  ;;  %v9900_v11 = vpop.f32.mrb[27].mxu1 }
 0x31b   : > { %1758 = vmax.xlane.f32.xlu1 %v1757_v10  ;;  %v1736_v10 = vsel %vm1441_vm1, %v12330_v51, -inf  ;;  %v1739_v11 = vsel %vm1441_vm1, %v12332_v45, -inf }
 0x38d   : > { %v1732_v12 = vpop.xlane.xlu0 %1731 }
 0x38e   : > { %v1762_v15 = vsub.f32 %v1529_v35, %v1732_v12  ;;  %v1727_v12 = vsel %vm1441_vm1, %v12327_v42, -inf }
 0x390   : > { %v1776_v16 = vmul.f32 1.442695, %v1762_v15  ;;  %v1748_v15 = vsel %vm1441_vm1, %v12335_v60, -inf }
 0x391   : > { %v1735_v17 = vpop.xlane.xlu0 %1734 }
 0x392   : > { %10890 = vpow2.f32 %v1776_v16  ;;  %v1763_v19 = vsub.f32 %v1532_v40, %v1735_v17  ;;  %v1751_v16 = vsel %vm1441_vm1, %v12337_v2, -inf }
 0x394   : > { %v1778_v24 = vmul.f32 1.442695, %v1763_v19 }
 0x396   : > { %10892 = vpow2.f32 %v1778_v24 }
 0x39c   : > { %v10891_v28 = vpop.eup %10890 }
 0x39d   : > { %v1802_v29 = vsel %vm1441_vm1, %v10891_v28, 0.0 }
 0x39e   : > { %v1744_v30 = vpop.xlane.xlu1 %1743  ;;  %1803 = vadd.xlane.f32.xlu0 %v1802_v29 }
 0x39f   : > { %v1766_v36 = vsub.f32 %v1623_v55, %v1744_v30 }
 0x3a0   : > { %v10893_v37 = vpop.eup %10892 }
 0x3a1   : > { %v1784_v41 = vmul.f32 1.442695, %v1766_v36  ;;  %v1805_v44 = vsel %vm1441_vm1, %v10893_v37, 0.0 }
 0x3a2   : > { %v1747_v48 = vpop.xlane.xlu1 %1746  ;;  %1806 = vadd.xlane.f32.xlu1 %v1805_v44 }
 0x3a3   : > { %10894 = vpow2.f32 %v1784_v41  ;;  %v1767_v35 = vsub.f32 %v1626_v58, %v1747_v48 }
 0x3a5   : > { %v1786_v49 = vmul.f32 1.442695, %v1767_v35 }
 0x3a6   : > { %v1756_v53 = vpop.xlane.xlu0 %1755 }
 0x3a7   : > { %10896 = vpow2.f32 %v1786_v49  ;;  %v1770_v40 = vsub.f32 %v1717_v6, %v1756_v53 }
 0x3a8   : > { %v1759_v46 = vpop.xlane.xlu1 %1758 }
 0x3a9   : > { %v1792_v56 = vmul.f32 1.442695, %v1770_v40  ;;  %v1771_v57 = vsub.f32 %v1720_v9, %v1759_v46  ;;  %v1724_v9 = vsel %vm1441_vm1, %v12325_v38, -inf }
 0x3ab   : > { %10898 = vpow2.f32 %v1792_v56  ;;  %v1794_v61 = vmul.f32 1.442695, %v1771_v57 }
 0x3ad   : > { %v10895_v0 = vpop.eup %10894  ;;  %10900 = vpow2.f32 %v1794_v61 }
 0x3ae   : > { %v1814_v55 = vsel %vm1441_vm1, %v10895_v0, 0.0 }
 0x3af   : > { %1815 = vadd.xlane.f32.xlu0 %v1814_v55 }
 0x3b1   : > { %v10897_v3 = vpop.eup %10896 }
 0x3b2   : > { %v1817_v5 = vsel %vm1441_vm1, %v10897_v3, 0.0 }
 0x3b3   : > { %1818 = vadd.xlane.f32.xlu1 %v1817_v5 }
 0x3b5   : > { %v10899_v7 = vpop.eup %10898 }
 0x3b6   : > { %v1826_v58 = vsel %vm1441_vm1, %v10899_v7, 0.0 }
 0x3b7   : > { %v10901_v8 = vpop.eup %10900  ;;  %1827 = vadd.xlane.f32.xlu0 %v1826_v58 }
 0x3b8   : > { %v1829_v6 = vsel %vm1441_vm1, %v10901_v8, 0.0 }
 0x3b9   : > { %1830 = vadd.xlane.f32.xlu1 %v1829_v6 }
 0x3ca   : > { %2188 = vrot.lane.b32.xlu1 %v12227_v1, %s11602_s7 }
 0x3cd   : > { %2191 = vrot.lane.b32.xlu0 %v12219_v59, %s11602_s7 }
 0x3ce   : > { %2297 = vrot.lane.b32.xlu1 %v12241_v18, %s11602_s7 }
 0x3d1   : > { %2403 = vrot.lane.b32.xlu0 %v12268_v47, %s11602_s7 }
 0x3d2   : > { %2294 = vrot.lane.b32.xlu1 %v12249_v23, %s11602_s7 }
 0x3d6   : > { %2400 = vrot.lane.b32.xlu1 %v12274_v52, %s11602_s7 }
 0x3f0   : > { %1725 = vmax.xlane.f32.xlu0 %v1724_v9 }
 0x3f4   : > { %1737 = vmax.xlane.f32.xlu0 %v1736_v10 }
 0x3f8   : > { %1740 = vmax.xlane.f32.xlu0 %v1739_v11 }
 0x3fa   : > { %1728 = vmax.xlane.f32.xlu1 %v1727_v12 }
 0x3fc   : > { %1749 = vmax.xlane.f32.xlu0 %v1748_v15 }
 0x3fe   : > { %1752 = vmax.xlane.f32.xlu1 %v1751_v16 }
 0x42b   : > { %v1804_v17 = vpop.xlane.xlu0 %1803 }
 0x42c   : > { %10902 = vrcp.f32 %v1804_v17 }
 0x42f   : > { %v1807_v19 = vpop.xlane.xlu1 %1806 }
 0x430   : > { %10904 = vrcp.f32 %v1807_v19 }
 0x436   : > { %v10903_v24 = vpop.eup %10902 }
 0x437   : > { %v1846_v30 = vmul.f32 %v10903_v24, %v10891_v28 }
 0x43a   : > { %v10905_v29 = vpop.eup %10904 }
 0x43b   : > { %v1847_v36 = vmul.f32 %v10905_v29, %v10893_v37 }
 0x43c   : > { %v1816_v41 = vpop.xlane.xlu0 %1815 }
 0x43d   : > { %v1857_v44 = vpack.c.bf16 %v1847_v36, %v1846_v30  ;;  %10906 = vrcp.f32 %v1816_v41 }
 0x43f   : > { %9910 = vmatmul.mubr.msk.bf16.vlgmr.msra.gmra.mrb[28].mxu1 %vm1441_vm1, %v1857_v44 }
 0x440   : > { %9920 = vmatpush3.bf16.msra.mxu1 %v12314_v20  ;;  %v1819_v48 = vpop.xlane.xlu1 %1818  ;;  %9921 = vmatprep.mubr.msk.bf16.mxu1 %vm11601_vm0, %v14045_v43 }
 0x441   : > { %10908 = vrcp.f32 %v1819_v48  ;;  %9931 = vmatprep.subr.bf16.mxu1 %v14045_v43 }
 0x444   : > { %v1828_v35 = vpop.xlane.xlu0 %1827 }
 0x445   : > { %10910 = vrcp.f32 %v1828_v35 }
 0x446   : > { %v1831_v49 = vpop.xlane.xlu1 %1830 }
 0x447   : > { %10912 = vrcp.f32 %v1831_v49  ;;  %v10907_v28 = vpop.eup %10906 }
 0x448   : > { %v1850_v53 = vmul.f32 %v10907_v28, %v10895_v0  ;;  %v2192_v5 = vpop.permute.xlu0 %2191 }
 0x449   : > { %v2197_v0 = vsel %vm1441_vm1, %v2192_v5, 0 }
 0x44a   : > { %v2189_v6 = vpop.permute.xlu1 %2188 }
 0x44b   : > { %v10909_v37 = vpop.eup %10908 }
 0x44c   : > { %v1851_v40 = vmul.f32 %v10909_v37, %v10897_v3 }
 0x44e   : > { %v1859_v46 = vpack.c.bf16 %v1851_v40, %v1850_v53  ;;  %v2298_v3 = vpop.permute.xlu1 %2297 }
 0x44f   : > { %v10911_v56 = vpop.eup %10910  ;;  %v2303_v9 = vsel %vm1441_vm1, %v2298_v3, 0 }
 0x450   : > { %9922 = vmatmul.mubr.msk.bf16.vlgmr.msra.gmra.mrb[32].mxu1 %vm1441_vm1, %v1859_v46  ;;  %v1854_v55 = vmul.f32 %v10911_v56, %v10899_v7  ;;  %v2404_v7 = vpop.permute.xlu0 %2403 }
 0x451   : > { %v10913_v57 = vpop.eup %10912  ;;  %9932 = vmatpush3.bf16.msra.mxu1 %v12320_v31  ;;  %9933 = vmatprep.mubr.msk.bf16.mxu1 %vm11601_vm0, %v14045_v43  ;;  %v2409_v10 = vsel %vm1441_vm1, %v2404_v7, 0 }
 0x452   : > { %v1855_v61 = vmul.f32 %v10913_v57, %v10901_v8  ;;  %9943 = vmatprep.subr.bf16.mxu1 %v14045_v43  ;;  %v2295_v8 = vpop.permute.xlu1 %2294 }
 0x454   : > { %v1861_v58 = vpack.c.bf16 %v1855_v61, %v1854_v55 }
 0x456   : > { %v2401_v11 = vpop.permute.xlu1 %2400 }
 0x458   : > { %9934 = vmatmul.mubr.msk.bf16.vlgmr.msra.gmra.mrb[36].mxu1 %vm1441_vm1, %v1861_v58 }
 0x459   : > { %9945 = vmatprep.mubr.msk.bf16.mxu1 %vm11601_vm0, %v14045_v43 }
 0x45a   : > { %9944 = vmatpush3.bf16.xpose.msra.mxu1 %v2197_v0 }
 0x45b   : > { %9955 = vmatprep.subr.bf16.mxu1 %v14045_v43 }
 0x461   : > { %9946 = vmatmul.mubr.msk.bf16.vlgmr.msra.gmra.mrb[40].mxu1 %vm1441_vm1, %v2189_v6 }
 0x462   : > { %9956 = vmatpush3.bf16.xpose.msra.mxu1 %v2303_v9  ;;  %9957 = vmatprep.mubr.msk.bf16.mxu1 %vm11601_vm0, %v14045_v43 }
 0x463   : > { %9967 = vmatprep.subr.bf16.mxu1 %v14045_v43 }
 0x469   : > { %9958 = vmatmul.mubr.msk.bf16.vlgmr.msra.gmra.mrb[44].mxu1 %vm1441_vm1, %v2295_v8 }
 0x46a   : > { %9968 = vmatpush3.bf16.xpose.msra.mxu1 %v2409_v10  ;;  %9969 = vmatprep.mubr.msk.bf16.mxu1 %vm11601_vm0, %v14045_v43 }
 0x46b   : > { %9979 = vmatprep.subr.bf16.mxu1 %v14045_v43 }
 0x471   : > { %9970 = vmatmul.mubr.msk.bf16.vlgmr.msra.gmra.mrb[48].mxu1 %vm1441_vm1, %v2401_v11 }
 0x472   : > { %9981 = vmatprep.mubr.msk.bf16.mxu1 %vm11601_vm0, %v14045_v43 }
 0x47d   : > { %v1726_v12 = vpop.xlane.xlu0 %1725 }
 0x47e   : > { %v1760_v15 = vsub.f32 %v12325_v38, %v1726_v12 }
 0x480   : > { %v1772_v16 = vmul.f32 1.442695, %v1760_v15 }
 0x481   : > { %v1738_v17 = vpop.xlane.xlu0 %1737 }
 0x482   : > { %10914 = vpow2.f32 %v1772_v16  ;;  %v1764_v19 = vsub.f32 %v12330_v51, %v1738_v17 }
 0x484   : > { %v1780_v24 = vmul.f32 1.442695, %v1764_v19 }
 0x485   : > { %v1741_v29 = vpop.xlane.xlu0 %1740 }
 0x486   : > { %10916 = vpow2.f32 %v1780_v24  ;;  %v1765_v30 = vsub.f32 %v12332_v45, %v1741_v29 }
 0x487   : > { %v1729_v36 = vpop.xlane.xlu1 %1728 }
 0x488   : > { %v1761_v41 = vsub.f32 %v12327_v42, %v1729_v36  ;;  %v1782_v44 = vmul.f32 1.442695, %v1765_v30 }
 0x489   : > { %v1750_v48 = vpop.xlane.xlu0 %1749 }
 0x48a   : > { %v1774_v35 = vmul.f32 1.442695, %v1761_v41  ;;  %v1768_v49 = vsub.f32 %v12335_v60, %v1750_v48 }
 0x48b   : > { %v1753_v28 = vpop.xlane.xlu1 %1752 }
 0x48c   : > { %v10915_v38 = vpop.eup %10914  ;;  %10918 = vpow2.f32 %v1774_v35  ;;  %v1788_v37 = vmul.f32 1.442695, %v1768_v49  ;;  %v1769_v53 = vsub.f32 %v12337_v2, %v1753_v28 }
 0x48d   : > { %10920 = vpow2.f32 %v1782_v44  ;;  %v1796_v51 = vsel %vm1441_vm1, %v10915_v38, 0.0 }
 0x48e   : > { %10922 = vpow2.f32 %v1788_v37  ;;  %v1790_v40 = vmul.f32 1.442695, %v1769_v53  ;;  %1797 = vadd.xlane.f32.xlu0 %v1796_v51 }
 0x490   : > { %v12407_v45 = vpop.eup %10916  ;;  %10924 = vpow2.f32 %v1790_v40 }
 0x491   : > { %v1808_v42 = vsel %vm1441_vm1, %v12407_v45, 0.0 }
 0x492   : > { %1809 = vadd.xlane.f32.xlu0 %v1808_v42 }
 0x496   : > { %v10919_v60 = vpop.eup %10918 }
 0x497   : > { %v10921_v46 = vpop.eup %10920  ;;  %v1799_v56 = vsel %vm1441_vm1, %v10919_v60, 0.0 }
 0x498   : > { %v12412_v57 = vpop.eup %10922  ;;  %1800 = vadd.xlane.f32.xlu1 %v1799_v56  ;;  %v1811_v61 = vsel %vm1441_vm1, %v10921_v46, 0.0 }
 0x499   : > { %v1820_v2 = vsel %vm1441_vm1, %v12412_v57, 0.0 }
 0x49a   : > { %1821 = vadd.xlane.f32.xlu0 %v1820_v2  ;;  %v12417_v55 = vpop.eup %10924 }
 0x49b   : > { %v1823_v5 = vsel %vm1441_vm1, %v12417_v55, 0.0 }
 0x49c   : > { %1812 = vadd.xlane.f32.xlu1 %v1811_v61 }
 0x4a0   : > { %1824 = vadd.xlane.f32.xlu1 %v1823_v5 }
 0x4b0   : > { %2138 = vrot.lane.b32.xlu0 %v12222_v62, %s11602_s7 }
 0x4b1   : > { %2135 = vrot.lane.b32.xlu1 %v12231_v4, %s11602_s7 }
 0x4b4   : > { %2350 = vrot.lane.b32.xlu0 %v12271_v50, %s11602_s7 }
 0x4b5   : > { %2244 = vrot.lane.b32.xlu1 %v12244_v21, %s11602_s7 }
 0x4b9   : > { %2241 = vrot.lane.b32.xlu1 %v12253_v27, %s11602_s7 }
 0x4bd   : > { %2347 = vrot.lane.b32.xlu1 %v12282_v54, %s11602_s7 }
 0x512   : > { %v12433_v58 = vpop.f32.mrb[28].mxu1 }
 0x513   : > { %v9911_v6 = vpop.f32.mrb[29].mxu1 }
 0x514   : > { %v12435_v0 = vpop.f32.mrb[30].mxu1 }
 0x515   : > { %v9912_v9 = vpop.f32.mrb[31].mxu1 }
 0x51b   : > { %v1798_v7 = vpop.xlane.xlu0 %1797 }
 0x51c   : > { %10926 = vrcp.f32 %v1798_v7 }
 0x51f   : > { %v1810_v17 = vpop.xlane.xlu0 %1809 }
 0x523   : > { %v12439_v8 = vpop.f32.mrb[32].mxu1 }
 0x524   : > { %v9923_v10 = vpop.f32.mrb[33].mxu1 }
 0x525   : > { %v12441_v11 = vpop.f32.mrb[34].mxu1  ;;  %v1801_v12 = vpop.xlane.xlu1 %1800 }
 0x526   : > { %10928 = vrcp.f32 %v1801_v12  ;;  %v9924_v16 = vpop.f32.mrb[35].mxu1  ;;  %v10927_v36 = vpop.eup %10926 }
 0x527   : > { %v1844_v49 = vmul.f32 %v10927_v36, %v10915_v38  ;;  %v1822_v37 = vpop.xlane.xlu0 %1821 }
 0x529   : > { %v1813_v19 = vpop.xlane.xlu1 %1812 }
 0x52a   : > { %10930 = vrcp.f32 %v1813_v19 }
 0x52b   : > { %v12445_v24 = vpop.f32.mrb[36].mxu1  ;;  %10932 = vrcp.f32 %v1810_v17 }
 0x52c   : > { %14118 = vst [vmem:[#allocation40_spill] sm:$0xff] %v12445_v24  ;;  %v9935_v29 = vpop.f32.mrb[37].mxu1 }
 0x52d   : > { %v12447_v30 = vpop.f32.mrb[38].mxu1  ;;  %v1825_v48 = vpop.xlane.xlu1 %1824 }
 0x52e   : > { %14119 = vst [vmem:[#allocation41_spill] sm:$0xff] %v12447_v30  ;;  %v9936_v44 = vpop.f32.mrb[39].mxu1  ;;  %10934 = vrcp.f32 %v1825_v48 }
 0x52f   : > { %10936 = vrcp.f32 %v1822_v37  ;;  %v2139_v44 = vpop.permute.xlu0 %2138 }
 0x530   : > { %v10929_v35 = vpop.eup %10928  ;;  %v2144_v37 = vsel %vm1441_vm1, %v2139_v44, 0 }
 0x531   : > { %v1845_v28 = vmul.f32 %v10929_v35, %v10919_v60 }
 0x533   : > { %v1856_v53 = vpack.c.bf16 %v1845_v28, %v1844_v49  ;;  %v2136_v49 = vpop.permute.xlu1 %2135 }
 0x534   : > { %v10931_v51 = vpop.eup %10930  ;;  %v12451_v40 = vpop.f32.mrb[40].mxu1 }
 0x535   : > { %v9947_v42 = vpop.f32.mrb[41].mxu1  ;;  %v2458_v56 = vsel %vm1441_vm1, %v12451_v40, -inf  ;;  %9904 = vmatmul.mubr.msk.bf16.vlgmr.msra.gmra.mrb[32].mxu0 %vm1441_vm1, %v1856_v53  ;;  %v10933_v2 = vpop.eup %10932  ;;  %v1849_v38 = vmul.f32 %v10931_v51, %v10921_v46 }
 0x536   : > { %v12456_v61 = vpop.f32.mrb[42].mxu1  ;;  %2459 = vmax.xlane.f32.xlu0 %v2458_v56  ;;  %9914 = vmatpush3.bf16.msra.mxu0 %v12317_v22  ;;  %v1848_v6 = vmul.f32 %v10933_v2, %v12407_v45  ;;  %v2351_v56 = vpop.permute.xlu0 %2350 }
 0x537   : > { %v9948_v60 = vpop.f32.mrb[43].mxu1  ;;  %v2461_v5 = vsel %vm1441_vm1, %v12456_v61, -inf  ;;  %9915 = vmatprep.mubr.msk.bf16.mxu0 %vm11601_vm0, %v14045_v43  ;;  %9925 = vmatprep.subr.bf16.mxu0 %v14045_v43  ;;  %v2245_v51 = vpop.permute.xlu1 %2244 }
 0x538   : > { %2462 = vmax.xlane.f32.xlu1 %v2461_v5  ;;  %v1858_v9 = vpack.c.bf16 %v1849_v38, %v1848_v6  ;;  %v10935_v7 = vpop.eup %10934  ;;  %v2250_v42 = vsel %vm1441_vm1, %v2245_v51, 0  ;;  %v2356_v38 = vsel %vm1441_vm1, %v2351_v56, 0 }
 0x539   : > { %v10937_v16 = vpop.eup %10936  ;;  %v1853_v19 = vmul.f32 %v10935_v7, %v12417_v55 }
 0x53a   : > { %v1852_v45 = vmul.f32 %v10937_v16, %v12412_v57 }
 0x53b   : > { %v2242_v2 = vpop.permute.xlu1 %2241 }
 0x53c   : > { %v12465_v10 = vpop.f32.mrb[44].mxu1  ;;  %v1860_v48 = vpack.c.bf16 %v1853_v19, %v1852_v45 }
 0x53d   : > { %v9959_v12 = vpop.f32.mrb[45].mxu1  ;;  %v2470_v46 = vsel %vm1441_vm1, %v12465_v10, -inf  ;;  %9916 = vmatmul.mubr.msk.bf16.vlgmr.msra.gmra.mrb[36].mxu0 %vm1441_vm1, %v1858_v9 }
 0x53e   : > { %v12470_v17 = vpop.f32.mrb[46].mxu1  ;;  %2471 = vmax.xlane.f32.xlu0 %v2470_v46  ;;  %9926 = vmatpush3.bf16.msra.mxu0 %v12322_v32 }
 0x53f   : > { %v9960_v29 = vpop.f32.mrb[47].mxu1  ;;  %9927 = vmatprep.mubr.msk.bf16.mxu0 %vm11601_vm0, %v14045_v43  ;;  %9937 = vmatprep.subr.bf16.mxu0 %v14045_v43  ;;  %v2473_v36 = vsel %vm1441_vm1, %v12470_v17, -inf  ;;  %v2348_v60 = vpop.permute.xlu1 %2347 }
 0x542   : > { %2474 = vmax.xlane.f32.xlu0 %v2473_v36 }
 0x544   : > { %v12480_v35 = vpop.f32.mrb[48].mxu1 }
 0x545   : > { %v9971_v28 = vpop.f32.mrb[49].mxu1  ;;  %v2482_v55 = vsel %vm1441_vm1, %v12480_v35, -inf  ;;  %9928 = vmatmul.mubr.msk.bf16.vlgmr.msra.gmra.mrb[40].mxu0 %vm1441_vm1, %v1860_v48 }
 0x546   : > { %v12486_v53 = vpop.f32.mrb[50].mxu1  ;;  %2483 = vmax.xlane.f32.xlu0 %v2482_v55  ;;  %9939 = vmatprep.mubr.msk.bf16.mxu0 %vm11601_vm0, %v14045_v43 }
 0x547   : > { %9938 = vmatpush3.bf16.xpose.msra.mxu0 %v2144_v37  ;;  %v9972_v57 = vpop.f32.mrb[51].mxu1  ;;  %v2485_v5 = vsel %vm1441_vm1, %v12486_v53, -inf }
 0x548   : > { %9949 = vmatprep.subr.bf16.mxu0 %v14045_v43 }
 0x549   : > { %2735 = vrot.lane.b32.xlu1 %v12314_v20, %s11602_s7 }
 0x54d   : > { %2831 = vrot.lane.b32.xlu1 %v12320_v31, %s11602_s7 }
 0x54e   : > { %9940 = vmatmul.mubr.msk.bf16.vlgmr.msra.gmra.mrb[44].mxu0 %vm1441_vm1, %v2136_v49 }
 0x54f   : > { %9950 = vmatpush3.bf16.xpose.msra.mxu0 %v2250_v42  ;;  %9951 = vmatprep.mubr.msk.bf16.mxu0 %vm11601_vm0, %v14045_v43 }
 0x550   : > { %9961 = vmatprep.subr.bf16.mxu0 %v14045_v43 }
 0x551   : > { %3099 = vrot.lane.b32.xlu1 %v12222_v62, %s11603_s11 }
 0x555   : > { %3150 = vrot.lane.b32.xlu1 %v12219_v59, %s11603_s11 }
 0x556   : > { %9952 = vmatmul.mubr.msk.bf16.vlgmr.msra.gmra.mrb[48].mxu0 %vm1441_vm1, %v2242_v2 }
 0x557   : > { %9962 = vmatpush3.bf16.xpose.msra.mxu0 %v2356_v38  ;;  %9963 = vmatprep.mubr.msk.bf16.mxu0 %vm11601_vm0, %v14045_v43 }
 0x558   : > { %9973 = vmatprep.subr.bf16.mxu0 %v14045_v43 }
 0x559   : > { %3201 = vrot.lane.b32.xlu1 %v12244_v21, %s11603_s11 }
 0x55c   : > { %2639 = vrot.lane.b32.xlu0 %v12304_v63, %s11602_s7 }
 0x55e   : > { %9964 = vmatmul.mubr.msk.bf16.vlgmr.msra.gmra.mrb[52].mxu0 %vm1441_vm1, %v2348_v60 }
 0x55f   : > { %9975 = vmatprep.mubr.msk.bf16.mxu0 %vm11601_vm0, %v14045_v43 }
 0x560   : > { %3097 = vrot.lane.b32.xlu0 %v12231_v4, %s11603_s11 }
 0x564   : > { %3148 = vrot.lane.b32.xlu0 %v12227_v1, %s11603_s11 }
 0x568   : > { %3199 = vrot.lane.b32.xlu0 %v12253_v27, %s11603_s11 }
 0x56c   : > { %3250 = vrot.lane.b32.xlu0 %v12249_v23, %s11603_s11 }
 0x57d   : > { %2486 = vmax.xlane.f32.xlu1 %v2485_v5 }
 0x58e   : > { %3252 = vrot.lane.b32.xlu1 %v12241_v18, %s11603_s11 }
 0x5c3   : > { %v2460_v6 = vpop.xlane.xlu0 %2459 }
 0x5c4   : > { %v2490_v9 = vsub.f32 %v12451_v40, %v2460_v6 }
 0x5c5   : > { %v2463_v7 = vpop.xlane.xlu1 %2462 }
 0x5c6   : > { %v2504_v12 = vmul.f32 1.442695, %v2490_v9  ;;  %v2491_v46 = vsub.f32 %v12456_v61, %v2463_v7 }
 0x5c8   : > { %10938 = vpow2.f32 %v2504_v12  ;;  %v2506_v16 = vmul.f32 1.442695, %v2491_v46 }
 0x5c9   : > { %v12554_v38 = vpop.permute.xlu1 %2735 }
 0x5ca   : > { %10940 = vpow2.f32 %v2506_v16 }
 0x5cb   : > { %v2472_v19 = vpop.xlane.xlu0 %2471 }
 0x5cc   : > { %v2494_v29 = vsub.f32 %v12465_v10, %v2472_v19 }
 0x5cd   : > { %v12556_v60 = vpop.permute.xlu1 %2831 }
 0x5ce   : > { %v2512_v45 = vmul.f32 1.442695, %v2494_v29 }
 0x5cf   : > { %v2475_v36 = vpop.xlane.xlu0 %2474 }
 0x5d0   : > { %10942 = vpow2.f32 %v2512_v45  ;;  %v2495_v44 = vsub.f32 %v12470_v17, %v2475_v36 }
 0x5d1   : > { %v12558_v5 = vpop.permute.xlu1 %3099 }
 0x5d2   : > { %v12532_v48 = vpop.eup %10938  ;;  %v2514_v49 = vmul.f32 1.442695, %v2495_v44 }
 0x5d3   : > { %v2484_v28 = vpop.xlane.xlu0 %2483  ;;  %v2530_v40 = vsel %vm1441_vm1, %v12532_v48, 0.0 }
 0x5d4   : > { %v12536_v55 = vpop.eup %10940  ;;  %10944 = vpow2.f32 %v2514_v49  ;;  %v2498_v61 = vsub.f32 %v12480_v35, %v2484_v28  ;;  %2531 = vadd.xlane.f32.xlu0 %v2530_v40 }
 0x5d5   : > { %v2533_v10 = vsel %vm1441_vm1, %v12536_v55, 0.0  ;;  %v12560_v6 = vpop.permute.xlu1 %3150 }
 0x5d6   : > { %v2520_v37 = vmul.f32 1.442695, %v2498_v61  ;;  %2534 = vadd.xlane.f32.xlu1 %v2533_v10 }
 0x5d7   : > { %v2640_v57 = vpop.permute.xlu0 %2639 }
 0x5d8   : > { %10946 = vpow2.f32 %v2520_v37  ;;  %9980 = vmatpush3.bf16.msra.mxu1 %v2640_v57 }
 0x5d9   : > { %9991 = vmatprep.subr.bf16.mxu1 %v14045_v43  ;;  %v12562_v9 = vpop.permute.xlu1 %3201 }
 0x5da   : > { %v12542_v17 = vpop.eup %10942 }
 0x5db   : > { %v2542_v51 = vsel %vm1441_vm1, %v12542_v17, 0.0 }
 0x5dc   : > { %2543 = vadd.xlane.f32.xlu0 %v2542_v51 }
 0x5de   : > { %v12546_v42 = vpop.eup %10944 }
 0x5df   : > { %v2545_v35 = vsel %vm1441_vm1, %v12546_v42, 0.0 }
 0x5e0   : > { %2546 = vadd.xlane.f32.xlu1 %v2545_v35 }
 0x5e2   : > { %v12550_v56 = vpop.eup %10946 }
 0x5e3   : > { %v2554_v2 = vsel %vm1441_vm1, %v12550_v56, 0.0 }
 0x5e4   : > { %2555 = vadd.xlane.f32.xlu0 %v2554_v2 }
 0x608   : > { %v12564_v7 = vpop.f32.mrb[32].mxu0 }
 0x609   : > { %v9905_v12 = vpop.f32.mrb[33].mxu0 }
 0x60a   : > { %v2487_v46 = vpop.xlane.xlu1 %2486  ;;  %v12566_v16 = vpop.f32.mrb[34].mxu0 }
 0x60b   : > { %v2499_v19 = vsub.f32 %v12486_v53, %v2487_v46  ;;  %v9906_v45 = vpop.f32.mrb[35].mxu0 }
 0x60d   : > { %v2522_v36 = vmul.f32 1.442695, %v2499_v19 }
 0x60f   : > { %10948 = vpow2.f32 %v2522_v36 }
 0x610   : > { %v12571_v44 = vpop.f32.mrb[36].mxu0 }
 0x611   : > { %v9917_v49 = vpop.f32.mrb[37].mxu0 }
 0x612   : > { %v12573_v28 = vpop.f32.mrb[38].mxu0 }
 0x613   : > { %v9918_v61 = vpop.f32.mrb[39].mxu0 }
 0x618   : > { %v12577_v10 = vpop.f32.mrb[40].mxu0 }
 0x619   : > { %v12579_v37 = vpop.eup %10948  ;;  %v9929_v53 = vpop.f32.mrb[41].mxu0 }
 0x61a   : > { %v2557_v57 = vsel %vm1441_vm1, %v12579_v37, 0.0  ;;  %v12583_v51 = vpop.f32.mrb[42].mxu0 }
 0x61b   : > { %2558 = vadd.xlane.f32.xlu1 %v2557_v57  ;;  %v9930_v2 = vpop.f32.mrb[43].mxu0 }
 0x621   : > { %v12587_v12 = vpop.f32.mrb[44].mxu0 }
 0x622   : > { %v9941_v46 = vpop.f32.mrb[45].mxu0  ;;  %v2452_v19 = vsel %vm1441_vm1, %v12587_v12, -inf }
 0x623   : > { %2453 = vmax.xlane.f32.xlu0 %v2452_v19  ;;  %v12591_v45 = vpop.f32.mrb[46].mxu0  ;;  %v12605_v19 = vpop.permute.xlu0 %3097 }
 0x624   : > { %v9942_v36 = vpop.f32.mrb[47].mxu0 }
 0x625   : > { %v2455_v36 = vsel %vm1441_vm1, %v12591_v45, -inf }
 0x629   : > { %v12593_v49 = vpop.f32.mrb[48].mxu0 }
 0x62a   : > { %v9953_v61 = vpop.f32.mrb[49].mxu0 }
 0x62b   : > { %v12595_v53 = vpop.f32.mrb[50].mxu0  ;;  %v12609_v61 = vpop.permute.xlu0 %3148 }
 0x62c   : > { %3303 = vrot.lane.b32.xlu1 %v12271_v50, %s11603_s11  ;;  %v9954_v57 = vpop.f32.mrb[51].mxu0 }
 0x62d   : > { %v2464_v57 = vsel %vm1441_vm1, %v12593_v49, -inf }
 0x62f   : > { %v12611_v15 = vpop.permute.xlu0 %3199 }
 0x631   : > { %v12599_v2 = vpop.f32.mrb[52].mxu0 }
 0x632   : > { %v9965_v41 = vpop.f32.mrb[53].mxu0 }
 0x633   : > { %v12601_v46 = vpop.f32.mrb[54].mxu0  ;;  %v12615_v41 = vpop.permute.xlu0 %3250 }
 0x634   : > { %v9966_v35 = vpop.f32.mrb[55].mxu0 }
 0x635   : > { %v12617_v35 = vpop.permute.xlu1 %3252 }
 0x639   : > { %3301 = vrot.lane.b32.xlu0 %v12282_v54, %s11603_s11 }
 0x650   : > { %2456 = vmax.xlane.f32.xlu1 %v2455_v36 }
 0x658   : > { %2465 = vmax.xlane.f32.xlu0 %v2464_v57 }
 0x661   : > { %v2532_v40 = vpop.xlane.xlu0 %2531  ;;  %3354 = vrot.lane.b32.xlu1 %v12268_v47, %s11603_s11 }
 0x662   : > { %10950 = vrcp.f32 %v2532_v40  ;;  %v14120_v40 = vmov 0.0  }
 0x663   : > { %v2535_v3 = vpop.xlane.xlu1 %2534 }
 0x664   : > { %10952 = vrcp.f32 %v2535_v3 }
 0x669   : > { %v2544_v36 = vpop.xlane.xlu0 %2543 }
 0x66a   : > { %10954 = vrcp.f32 %v2544_v36 }
 0x66c   : > { %v10951_v29 = vpop.eup %10950 }
 0x66d   : > { %v2547_v43 = vpop.xlane.xlu1 %2546  ;;  %v2574_v57 = vmul.f32 %v10951_v29, %v12532_v48 }
 0x66e   : > { %v10953_v39 = vpop.eup %10952  ;;  %10956 = vrcp.f32 %v2547_v43  ;;  %3352 = vrot.lane.b32.xlu0 %v12274_v52, %s11603_s11 }
 0x66f   : > { %v2575_v34 = vmul.f32 %v10953_v39, %v12536_v55 }
 0x671   : > { %v2585_v33 = vpack.c.bf16 %v2575_v34, %v2574_v57  ;;  %v2476_v34 = vsel %vm1441_vm1, %v12599_v2, -inf }
 0x673   : > { %9982 = vmatmul.mubr.msk.bf16.vlgmr.msra.gmra.mrb[52].mxu1 %vm1441_vm1, %v2585_v33  ;;  %v2467_v33 = vsel %vm1441_vm1, %v12595_v53, -inf }
 0x674   : > { %9992 = vmatpush3.bf16.msra.mxu1 %v12554_v38  ;;  %9993 = vmatprep.mubr.msk.bf16.mxu1 %vm11601_vm0, %v14120_v40  ;;  %v10955_v3 = vpop.eup %10954 }
 0x675   : > { %10003 = vmatprep.subr.bf16.mxu1 %v14120_v40  ;;  %v2578_v43 = vmul.f32 %v10955_v3, %v12542_v17  ;;  %v3105_v3 = vsel %vm1441_vm1, %v12558_v5, 0  ;;  %v3207_v5 = vsel %vm1441_vm1, %v12562_v9, 0 }
 0x678   : > { %v10957_v36 = vpop.eup %10956 }
 0x679   : > { %v2579_v26 = vmul.f32 %v10957_v36, %v12546_v42 }
 0x67b   : > { %v2587_v25 = vpack.c.bf16 %v2579_v26, %v2578_v43  ;;  %v2479_v26 = vsel %vm1441_vm1, %v12601_v46, -inf }
 0x67d   : > { %9994 = vmatmul.mubr.msk.bf16.vlgmr.msra.gmra.mrb[56].mxu1 %vm1441_vm1, %v2587_v25  ;;  %v2556_v25 = vpop.xlane.xlu0 %2555 }
 0x67e   : > { %10004 = vmatpush3.bf16.msra.mxu1 %v12556_v60  ;;  %10005 = vmatprep.mubr.msk.bf16.mxu1 %vm11601_vm0, %v14120_v40  ;;  %10958 = vrcp.f32 %v2556_v25 }
 0x67f   : > { %10037 = vmatprep.subr.bf16.mxu1 %v14120_v40 }
 0x685   : > { %2468 = vmax.xlane.f32.xlu1 %v2467_v33 }
 0x688   : > { %v10959_v55 = vpop.eup %10958 }
 0x689   : > { %2477 = vmax.xlane.f32.xlu1 %v2476_v34  ;;  %v2582_v60 = vmul.f32 %v10959_v55, %v12550_v56  ;;  %v3156_v56 = vsel %vm1441_vm1, %v12560_v6, 0  ;;  %v3258_v6 = vsel %vm1441_vm1, %v12617_v35, 0 }
 0x68d   : > { %2480 = vmax.xlane.f32.xlu1 %v2479_v26 }
 0x6a8   : > { %v2559_v39 = vpop.xlane.xlu1 %2558 }
 0x6a9   : > { %10960 = vrcp.f32 %v2559_v39 }
 0x6ac   : > { %v3304_v9 = vpop.permute.xlu1 %3303 }
 0x6b0   : > { %v2454_v48 = vpop.xlane.xlu0 %2453 }
 0x6b1   : > { %v2488_v17 = vsub.f32 %v12587_v12, %v2454_v48 }
 0x6b3   : > { %v10961_v42 = vpop.eup %10960  ;;  %v2500_v38 = vmul.f32 1.442695, %v2488_v17 }
 0x6b4   : > { %v2583_v29 = vmul.f32 %v10961_v42, %v12579_v37  ;;  %v3302_v35 = vpop.permute.xlu0 %3301 }
 0x6b5   : > { %10962 = vpow2.f32 %v2500_v38 }
 0x6b6   : > { %v2589_v57 = vpack.c.bf16 %v2583_v29, %v2582_v60 }
 0x6b8   : > { %10006 = vmatmul.mubr.msk.bf16.vlgmr.msra.gmra.mrb[60].mxu1 %vm1441_vm1, %v2589_v57 }
 0x6b9   : > { %10038 = vmatpush3.bf16.xpose.msra.mxu1 %v3105_v3  ;;  %10039 = vmatprep.mubr.msk.bf16.mxu1 %vm11601_vm0, %v14120_v40 }
 0x6ba   : > { %10043 = vmatprep.subr.bf16.mxu1 %v14120_v40 }
 0x6bf   : > { %v12652_v12 = vpop.eup %10962 }
 0x6c0   : > { %10040 = vmatmul.mubr.msk.bf16.vlgmr.msra.gmra.mrb[64].mxu1 %vm1441_vm1, %v12605_v19  ;;  %v2524_v37 = vsel %vm1441_vm1, %v12652_v12, 0.0  ;;  %v3309_v19 = vsel %vm1441_vm1, %v3304_v9, 0 }
 0x6c1   : > { %10044 = vmatpush3.bf16.xpose.msra.mxu1 %v3156_v56  ;;  %2525 = vadd.xlane.f32.xlu1 %v2524_v37 }
 0x6c2   : > { %10045 = vmatprep.mubr.msk.bf16.mxu1 %vm11601_vm0, %v14120_v40  ;;  %10049 = vmatprep.subr.bf16.mxu1 %v14120_v40 }
 0x6c8   : > { %10046 = vmatmul.mubr.msk.bf16.vlgmr.msra.gmra.mrb[68].mxu1 %vm1441_vm1, %v12609_v61 }
 0x6c9   : > { %10050 = vmatpush3.bf16.xpose.msra.mxu1 %v3207_v5  ;;  %10051 = vmatprep.mubr.msk.bf16.mxu1 %vm11601_vm0, %v14120_v40 }
 0x6ca   : > { %10055 = vmatprep.subr.bf16.mxu1 %v14120_v40 }
 0x6d0   : > { %10052 = vmatmul.mubr.msk.bf16.vlgmr.msra.gmra.mrb[72].mxu1 %vm1441_vm1, %v12611_v15 }
 0x6d1   : > { %10056 = vmatpush3.bf16.xpose.msra.mxu1 %v3258_v6  ;;  %10057 = vmatprep.mubr.msk.bf16.mxu1 %vm11601_vm0, %v14120_v40 }
 0x6d2   : > { %10061 = vmatprep.subr.bf16.mxu1 %v14120_v40 }
 0x6d8   : > { %10058 = vmatmul.mubr.msk.bf16.vlgmr.msra.gmra.mrb[76].mxu1 %vm1441_vm1, %v12615_v41 }
 0x6d9   : > { %10062 = vmatpush3.bf16.xpose.msra.mxu1 %v3309_v19  ;;  %10063 = vmatprep.mubr.msk.bf16.mxu1 %vm11601_vm0, %v14120_v40 }
 0x6da   : > { %10067 = vmatprep.subr.bf16.mxu1 %v14120_v40 }
 0x6dd   : > { %v2457_v61 = vpop.xlane.xlu1 %2456 }
 0x6de   : > { %v2489_v15 = vsub.f32 %v12591_v45, %v2457_v61 }
 0x6e0   : > { %v2502_v36 = vmul.f32 1.442695, %v2489_v15  ;;  %10064 = vmatmul.mubr.msk.bf16.vlgmr.msra.gmra.mrb[80].mxu1 %vm1441_vm1, %v3302_v35 }
 0x6e1   : > { %v3355_v43 = vpop.permute.xlu1 %3354  ;;  %10069 = vmatprep.mubr.msk.bf16.mxu1 %vm11601_vm0, %v14120_v40 }
 0x6e2   : > { %10964 = vpow2.f32 %v2502_v36  ;;  %v3360_v41 = vsel %vm1441_vm1, %v3355_v43, 0 }
 0x6e3   : > { %10068 = vmatpush3.bf16.xpose.msra.mxu1 %v3360_v41 }
 0x6e4   : > { %10079 = vmatprep.subr.bf16.mxu1 %v14120_v40 }
 0x6e5   : > { %v2466_v33 = vpop.xlane.xlu0 %2465 }
 0x6e6   : > { %v2492_v34 = vsub.f32 %v12593_v49, %v2466_v33 }
 0x6e8   : > { %v2508_v26 = vmul.f32 1.442695, %v2492_v34 }
 0x6e9   : > { %v3353_v25 = vpop.permute.xlu0 %3352 }
 0x6ea   : > { %10966 = vpow2.f32 %v2508_v26  ;;  %10070 = vmatmul.mubr.msk.bf16.vlgmr.msra.gmra.mrb[84].mxu1 %vm1441_vm1, %v3353_v25 }
 0x6eb   : > { %10081 = vmatprep.mubr.msk.bf16.mxu1 %vm11601_vm0, %v14120_v40 }
 0x6ec   : > { %v12693_v45 = vpop.eup %10964 }
 0x6ed   : > { %v2527_v39 = vsel %vm1441_vm1, %v12693_v45, 0.0 }
 0x6ee   : > { %2528 = vadd.xlane.f32.xlu1 %v2527_v39 }
 0x6f4   : > { %v12697_v48 = vpop.eup %10966 }
 0x6f5   : > { %v2536_v55 = vsel %vm1441_vm1, %v12697_v48, 0.0 }
 0x6f6   : > { %2537 = vadd.xlane.f32.xlu0 %v2536_v55 }
 0x70c   : > { %2687 = vrot.lane.b32.xlu0 %v12317_v22, %s11602_s7 }
 0x712   : > { %v2469_v49 = vpop.xlane.xlu1 %2468 }
 0x713   : > { %v2493_v17 = vsub.f32 %v12595_v53, %v2469_v49 }
 0x715   : > { %v2510_v42 = vmul.f32 1.442695, %v2493_v17 }
 0x716   : > { %v2478_v38 = vpop.xlane.xlu1 %2477 }
 0x717   : > { %10968 = vpow2.f32 %v2510_v42  ;;  %v2496_v60 = vsub.f32 %v12599_v2, %v2478_v38 }
 0x719   : > { %v2516_v29 = vmul.f32 1.442695, %v2496_v60 }
 0x71a   : > { %v2481_v57 = vpop.xlane.xlu1 %2480 }
 0x71b   : > { %10970 = vpow2.f32 %v2516_v29  ;;  %v2497_v3 = vsub.f32 %v12601_v46, %v2481_v57 }
 0x71d   : > { %v2518_v56 = vmul.f32 1.442695, %v2497_v3 }
 0x71f   : > { %10972 = vpow2.f32 %v2518_v56 }
 0x721   : > { %v12706_v37 = vpop.eup %10968 }
 0x722   : > { %v2539_v5 = vsel %vm1441_vm1, %v12706_v37, 0.0 }
 0x723   : > { %2540 = vadd.xlane.f32.xlu1 %v2539_v5 }
 0x725   : > { %v12710_v6 = vpop.eup %10970 }
 0x726   : > { %v2548_v53 = vsel %vm1441_vm1, %v12710_v6, 0.0 }
 0x727   : > { %2549 = vadd.xlane.f32.xlu1 %v2548_v53 }
 0x729   : > { %v12714_v2 = vpop.eup %10972 }
 0x72a   : > { %v2551_v9 = vsel %vm1441_vm1, %v12714_v2, 0.0 }
 0x72b   : > { %2552 = vadd.xlane.f32.xlu1 %v2551_v9 }
 0x73c   : > { %2591 = vrot.lane.b32.xlu1 %v12312_v14, %s11602_s7 }
 0x740   : > { %2783 = vrot.lane.b32.xlu1 %v12322_v32, %s11602_s7 }
 0x746   : > { %v12722_v46 = vpop.f32.mrb[52].mxu1 }
 0x747   : > { %v9983_v19 = vpop.f32.mrb[53].mxu1 }
 0x748   : > { %v12724_v61 = vpop.f32.mrb[54].mxu1 }
 0x749   : > { %v9984_v35 = vpop.f32.mrb[55].mxu1 }
 0x750   : > { %v12728_v36 = vpop.f32.mrb[56].mxu1 }
 0x751   : > { %v9995_v43 = vpop.f32.mrb[57].mxu1 }
 0x752   : > { %v12730_v41 = vpop.f32.mrb[58].mxu1 }
 0x753   : > { %v9996_v34 = vpop.f32.mrb[59].mxu1 }
 0x78b   : > { %v12734_v26 = vpop.f32.mrb[60].mxu1 }
 0x78c   : > { %v10007_v25 = vpop.f32.mrb[61].mxu1 }
 0x78d   : > { %v12736_v39 = vpop.f32.mrb[62].mxu1 }
 0x78e   : > { %v10008_v49 = vpop.f32.mrb[63].mxu1 }
 0x78f   : > { %v2526_v49 = vpop.xlane.xlu1 %2525 }
 0x793   : > { %v12740_v17 = vpop.f32.mrb[64].mxu1 }
 0x794   : > { %v10041_v42 = vpop.f32.mrb[65].mxu1  ;;  %v3403_v38 = vsel %vm1441_vm1, %v12740_v17, -inf }
 0x795   : > { %v12744_v60 = vpop.f32.mrb[66].mxu1  ;;  %3404 = vmax.xlane.f32.xlu1 %v3403_v38 }
 0x796   : > { %v10042_v29 = vpop.f32.mrb[67].mxu1  ;;  %v3406_v57 = vsel %vm1441_vm1, %v12744_v60, -inf }
 0x797   : > { %3407 = vmax.xlane.f32.xlu0 %v3406_v57  ;;  %v2529_v29 = vpop.xlane.xlu1 %2528 }
 0x798   : > { %10974 = vrcp.f32 %v2529_v29 }
 0x799   : > { %10976 = vrcp.f32 %v2526_v49 }
 0x79b   : > { %v12748_v3 = vpop.f32.mrb[68].mxu1 }
 0x79c   : > { %v10047_v56 = vpop.f32.mrb[69].mxu1  ;;  %v3409_v5 = vsel %vm1441_vm1, %v12748_v3, -inf }
 0x79d   : > { %v12752_v53 = vpop.f32.mrb[70].mxu1  ;;  %3410 = vmax.xlane.f32.xlu1 %v3409_v5 }
 0x79e   : > { %v10048_v9 = vpop.f32.mrb[71].mxu1  ;;  %v3412_v19 = vsel %vm1441_vm1, %v12752_v53, -inf }
 0x7a1   : > { %3413 = vmax.xlane.f32.xlu1 %v3412_v19 }
 0x7a2   : > { %v10975_v15 = vpop.eup %10974 }
 0x7a3   : > { %v12756_v35 = vpop.f32.mrb[72].mxu1  ;;  %v2573_v13 = vmul.f32 %v10975_v15, %v12693_v45 }
 0x7a4   : > { %v10053_v43 = vpop.f32.mrb[73].mxu1  ;;  %v3415_v34 = vsel %vm1441_vm1, %v12756_v35, -inf }
 0x7a5   : > { %v12760_v25 = vpop.f32.mrb[74].mxu1  ;;  %3416 = vmax.xlane.f32.xlu1 %v3415_v34 }
 0x7a6   : > { %v10054_v42 = vpop.f32.mrb[75].mxu1  ;;  %v3418_v38 = vsel %vm1441_vm1, %v12760_v25, -inf }
 0x7a7   : > { %v2538_v42 = vpop.xlane.xlu0 %2537 }
 0x7a9   : > { %3419 = vmax.xlane.f32.xlu1 %v3418_v38 }
 0x7ab   : > { %v12764_v57 = vpop.f32.mrb[76].mxu1  ;;  %v2688_v45 = vpop.permute.xlu0 %2687 }
 0x7ac   : > { %v10059_v56 = vpop.f32.mrb[77].mxu1  ;;  %v3421_v5 = vsel %vm1441_vm1, %v12764_v57, -inf }
 0x7ad   : > { %v12768_v9 = vpop.f32.mrb[78].mxu1  ;;  %3422 = vmax.xlane.f32.xlu0 %v3421_v5 }
 0x7ae   : > { %v10060_v19 = vpop.f32.mrb[79].mxu1  ;;  %v3424_v43 = vsel %vm1441_vm1, %v12768_v9, -inf }
 0x7af   : > { %3425 = vmax.xlane.f32.xlu1 %v3424_v43  ;;  %v10977_v43 = vpop.eup %10976 }
 0x7b0   : > { %v2541_v34 = vpop.xlane.xlu1 %2540 }
 0x7b1   : > { %10978 = vrcp.f32 %v2541_v34 }
 0x7b2   : > { %10980 = vrcp.f32 %v2538_v42 }
 0x7b3   : > { %v12772_v38 = vpop.f32.mrb[80].mxu1 }
 0x7b4   : > { %v10065_v55 = vpop.f32.mrb[81].mxu1  ;;  %v2550_v33 = vpop.xlane.xlu1 %2549  ;;  %v3427_v56 = vsel %vm1441_vm1, %v12772_v38, -inf }
 0x7b5   : > { %v12776_v29 = vpop.f32.mrb[82].mxu1  ;;  %3428 = vmax.xlane.f32.xlu0 %v3427_v56  ;;  %v2572_v55 = vmul.f32 %v10977_v43, %v12652_v12 }
 0x7b6   : > { %v10066_v5 = vpop.f32.mrb[83].mxu1  ;;  %v3430_v19 = vsel %vm1441_vm1, %v12776_v29, -inf }
 0x7b7   : > { %3431 = vmax.xlane.f32.xlu1 %v3430_v19  ;;  %v2584_v5 = vpack.c.bf16 %v2573_v13, %v2572_v55 }
 0x7b8   : > { %v2553_v49 = vpop.xlane.xlu1 %2552 }
 0x7b9   : > { %10982 = vrcp.f32 %v2553_v49 }
 0x7ba   : > { %10984 = vrcp.f32 %v2550_v33 }
 0x7bb   : > { %v10979_v42 = vpop.eup %10978 }
 0x7bc   : > { %v2592_v24 = vpop.permute.xlu1 %2591  ;;  %v10981_v15 = vpop.eup %10980 }
 0x7bd   : > { %9974 = vmatpush3.bf16.msra.mxu0 %v2592_v24  ;;  %v12782_v34 = vpop.f32.mrb[84].mxu1  ;;  %v2576_v13 = vmul.f32 %v10981_v15, %v12697_v48  ;;  %v10858_v48 = vld [vmem:[%s14121_s0 + $0x8] sm:$0xff]  }
 0x7be   : > { %v10071_v30 = vpop.f32.mrb[85].mxu1  ;;  %v3433_v56 = vsel %vm1441_vm1, %v12782_v34, -inf  ;;  %9985 = vmatprep.subr.bf16.mxu0 %v14120_v40 }
 0x7bf   : > { %3434 = vmax.xlane.f32.xlu0 %v3433_v56  ;;  %v12787_v19 = vpop.f32.mrb[86].mxu1  ;;  %v2577_v30 = vmul.f32 %v10979_v42, %v12706_v37 }
 0x7c0   : > { %9976 = vmatmul.mubr.msk.bf16.vlgmr.msra.gmra.mrb[56].mxu0 %vm1441_vm1, %v2584_v5  ;;  %v10072_v12 = vpop.f32.mrb[87].mxu1  ;;  %v3436_v24 = vsel %vm1441_vm1, %v12787_v19, -inf  ;;  %v2784_v43 = vpop.permute.xlu1 %2783 }
 0x7c1   : > { %3437 = vmax.xlane.f32.xlu1 %v3436_v24  ;;  %9986 = vmatpush3.bf16.msra.mxu0 %v2688_v45  ;;  %v2586_v33 = vpack.c.bf16 %v2577_v30, %v2576_v13  ;;  %v12815_v30 = vld [vmem:[%s14121_s0] sm:$0xff]  }
 0x7c2   : > { %9987 = vmatprep.mubr.msk.bf16.mxu0 %vm11601_vm0, %v14120_v40  ;;  %9997 = vmatprep.subr.bf16.mxu0 %v14120_v40 }
 0x7c3   : > { %v10983_v49 = vpop.eup %10982 }
 0x7c4   : > { %v10985_v55 = vpop.eup %10984  ;;  %v2581_v37 = vmul.f32 %v10983_v49, %v12714_v2 }
 0x7c5   : > { %v2580_v56 = vmul.f32 %v10985_v55, %v12710_v6 }
 0x7c7   : > { %v2588_v5 = vpack.c.bf16 %v2581_v37, %v2580_v56 }
 0x7c8   : > { %9988 = vmatmul.mubr.msk.bf16.vlgmr.msra.gmra.mrb[60].mxu0 %vm1441_vm1, %v2586_v33 }
 0x7c9   : > { %9998 = vmatpush3.bf16.msra.mxu0 %v2784_v43  ;;  %9999 = vmatprep.mubr.msk.bf16.mxu0 %vm11601_vm0, %v14120_v40 }
 0x7ca   : > { %10009 = vmatprep.subr.bf16.mxu0 %v10858_v48 }
 0x7d0   : > { %10000 = vmatmul.mubr.msk.bf16.vlgmr.msra.gmra.mrb[64].mxu0 %vm1441_vm1, %v2588_v5 }
 0x7d1   : > { %10010 = vmatpush3.bf16.msra.mxu0 %v10858_v48 }
 0x7d2   : > { %3588 = vrot.lane.b32.xlu1 %v12304_v63, %s11603_s11  ;;  %10023 = vmatprep.subr.bf16.mxu0 %v12815_v30 }
 0x7d5   : > { %3541 = vrot.lane.b32.xlu0 %v12312_v14, %s11603_s11 }
 0x7d6   : > { %3635 = vrot.lane.b32.xlu1 %v12317_v22, %s11603_s11 }
 0x7d9   : > { %3682 = vrot.lane.b32.xlu0 %v12314_v20, %s11603_s11 }
 0x822   : > { %v3405_v6 = vpop.xlane.xlu1 %3404 }
 0x823   : > { %v3439_v2 = vsub.f32 %v12740_v17, %v3405_v6 }
 0x824   : > { %v3408_v42 = vpop.xlane.xlu0 %3407 }
 0x825   : > { %v3451_v45 = vmul.f32 1.442695, %v3439_v2  ;;  %v3440_v12 = vsub.f32 %v12744_v60, %v3408_v42 }
 0x827   : > { %10986 = vpow2.f32 %v3451_v45  ;;  %v3453_v24 = vmul.f32 1.442695, %v3440_v12 }
 0x829   : > { %10988 = vpow2.f32 %v3453_v24 }
 0x82a   : > { %v3411_v15 = vpop.xlane.xlu1 %3410 }
 0x82b   : > { %v3441_v13 = vsub.f32 %v12748_v3, %v3411_v15 }
 0x82d   : > { %v3455_v33 = vmul.f32 1.442695, %v3441_v13 }
 0x82e   : > { %v3414_v49 = vpop.xlane.xlu1 %3413 }
 0x82f   : > { %10990 = vpow2.f32 %v3455_v33  ;;  %v3442_v43 = vsub.f32 %v12752_v53, %v3414_v49 }
 0x831   : > { %v12820_v17 = vpop.eup %10986  ;;  %v3457_v55 = vmul.f32 1.442695, %v3442_v43 }
 0x832   : > { %v3417_v37 = vpop.xlane.xlu1 %3416  ;;  %v3475_v60 = vsel %vm1441_vm1, %v12820_v17, 0.0 }
 0x833   : > { %v12824_v56 = vpop.eup %10988  ;;  %10992 = vpow2.f32 %v3457_v55  ;;  %v3443_v5 = vsub.f32 %v12756_v35, %v3417_v37  ;;  %3476 = vadd.xlane.f32.xlu0 %v3475_v60 }
 0x834   : > { %v3478_v3 = vsel %vm1441_vm1, %v12824_v56, 0.0 }
 0x835   : > { %v3459_v48 = vmul.f32 1.442695, %v3443_v5  ;;  %3479 = vadd.xlane.f32.xlu1 %v3478_v3 }
 0x836   : > { %v3420_v6 = vpop.xlane.xlu1 %3419 }
 0x837   : > { %10994 = vpow2.f32 %v3459_v48  ;;  %v3444_v53 = vsub.f32 %v12760_v25, %v3420_v6 }
 0x839   : > { %v12830_v2 = vpop.eup %10990  ;;  %v3461_v42 = vmul.f32 1.442695, %v3444_v53 }
 0x83a   : > { %v3423_v45 = vpop.xlane.xlu0 %3422  ;;  %v3481_v12 = vsel %vm1441_vm1, %v12830_v2, 0.0 }
 0x83b   : > { %10996 = vpow2.f32 %v3461_v42  ;;  %v3445_v35 = vsub.f32 %v12764_v57, %v3423_v45  ;;  %3482 = vadd.xlane.f32.xlu0 %v3481_v12 }
 0x83c   : > { %v3426_v24 = vpop.xlane.xlu1 %3425 }
 0x83d   : > { %v12835_v15 = vpop.eup %10992  ;;  %v3463_v13 = vmul.f32 1.442695, %v3445_v35  ;;  %v3446_v33 = vsub.f32 %v12768_v9, %v3426_v24 }
 0x83e   : > { %v3484_v25 = vsel %vm1441_vm1, %v12835_v15, 0.0 }
 0x83f   : > { %10998 = vpow2.f32 %v3463_v13  ;;  %v3465_v49 = vmul.f32 1.442695, %v3446_v33  ;;  %3485 = vadd.xlane.f32.xlu1 %v3484_v25 }
 0x841   : > { %v12840_v43 = vpop.eup %10994  ;;  %11000 = vpow2.f32 %v3465_v49 }
 0x842   : > { %v3429_v55 = vpop.xlane.xlu0 %3428  ;;  %v3487_v57 = vsel %vm1441_vm1, %v12840_v43, 0.0 }
 0x843   : > { %v3447_v37 = vsub.f32 %v12772_v38, %v3429_v55  ;;  %3488 = vadd.xlane.f32.xlu0 %v3487_v57 }
 0x844   : > { %v3432_v60 = vpop.xlane.xlu1 %3431 }
 0x845   : > { %v12845_v5 = vpop.eup %10996  ;;  %v3467_v9 = vmul.f32 1.442695, %v3447_v37  ;;  %v3448_v3 = vsub.f32 %v12776_v29, %v3432_v60 }
 0x846   : > { %v3490_v48 = vsel %vm1441_vm1, %v12845_v5, 0.0 }
 0x847   : > { %11002 = vpow2.f32 %v3467_v9  ;;  %v3469_v6 = vmul.f32 1.442695, %v3448_v3  ;;  %3491 = vadd.xlane.f32.xlu1 %v3490_v48 }
 0x849   : > { %v12850_v53 = vpop.eup %10998  ;;  %11004 = vpow2.f32 %v3469_v6 }
 0x84a   : > { %v3493_v42 = vsel %vm1441_vm1, %v12850_v53, 0.0 }
 0x84b   : > { %v12854_v38 = vpop.eup %11000  ;;  %3494 = vadd.xlane.f32.xlu0 %v3493_v42 }
 0x84c   : > { %v3435_v45 = vpop.xlane.xlu0 %3434  ;;  %v3496_v12 = vsel %vm1441_vm1, %v12854_v38, 0.0 }
 0x84d   : > { %v3449_v29 = vsub.f32 %v12782_v34, %v3435_v45  ;;  %3497 = vadd.xlane.f32.xlu1 %v3496_v12  ;;  %v14122_v12 = vpack.c.bf16 %v12724_v61, %v12722_v46 }
 0x84e   : > { %v3438_v35 = vpop.xlane.xlu1 %3437 }
 0x84f   : > { %v3471_v24 = vmul.f32 1.442695, %v3449_v29  ;;  %v3450_v13 = vsub.f32 %v12787_v19, %v3438_v35 }
 0x851   : > { %v12860_v33 = vpop.eup %11002  ;;  %11006 = vpow2.f32 %v3471_v24  ;;  %v3473_v25 = vmul.f32 1.442695, %v3450_v13 }
 0x852   : > { %v3589_v49 = vpop.permute.xlu1 %3588  ;;  %v3499_v55 = vsel %vm1441_vm1, %v12860_v33, 0.0 }
 0x853   : > { %v12864_v57 = vpop.eup %11004  ;;  %11008 = vpow2.f32 %v3473_v25  ;;  %3500 = vadd.xlane.f32.xlu0 %v3499_v55  ;;  %10080 = vmatpush3.bf16.msra.mxu1 %v3589_v49  ;;  %v14123_v49 = vpack.c.bf16 %v12730_v41, %v12728_v36  ;;  %v3542_v36 = vpop.permute.xlu0 %3541  ;;  %v14126_v41 = vpack.c.bf16 %v12435_v0, %v12433_v58 }
 0x854   : > { %v3502_v34 = vsel %vm1441_vm1, %v12864_v57, 0.0  ;;  %10091 = vmatprep.subr.bf16.mxu1 %v14120_v40 }
 0x855   : > { %3503 = vadd.xlane.f32.xlu1 %v3502_v34 }
 0x856   : > { %v3636_v0 = vpop.permute.xlu1 %3635 }
 0x857   : > { %v3683_v58 = vpop.permute.xlu0 %3682 }
 0x85b   : > { %v12869_v19 = vpop.eup %11006 }
 0x85c   : > { %v3505_v37 = vsel %vm1441_vm1, %v12869_v19, 0.0 }
 0x85d   : > { %v12873_v60 = vpop.eup %11008  ;;  %3506 = vadd.xlane.f32.xlu0 %v3505_v37 }
 0x85e   : > { %v3508_v9 = vsel %vm1441_vm1, %v12873_v60, 0.0 }
 0x85f   : > { %3509 = vadd.xlane.f32.xlu1 %v3508_v9  ;;  %v14125_v9 = vpack.c.bf16 %v12566_v16, %v12564_v7  ;;  %v14129_v7 = vpack.c.bf16 %v12583_v51, %v12577_v10 }
 0x870   : > { %3729 = vrot.lane.b32.xlu1 %v12322_v32, %s11603_s11 }
 0x873   : > { %3776 = vrot.lane.b32.xlu0 %v12320_v31, %s11603_s11 }
 0x874   : > { %3951 = vrot.lane.b32.xlu1 %v12222_v62, %s11604_s21 }
 0x877   : > { %3949 = vrot.lane.b32.xlu0 %v12231_v4, %s11604_s21 }
 0x878   : > { %4002 = vrot.lane.b32.xlu1 %v12219_v59, %s11604_s21 }
 0x87b   : > { %4000 = vrot.lane.b32.xlu0 %v12227_v1, %s11604_s21 }
 0x87c   : > { %4053 = vrot.lane.b32.xlu1 %v12244_v21, %s11604_s21 }
 0x87f   : > { %4104 = vrot.lane.b32.xlu0 %v12241_v18, %s11604_s21 }
 0x880   : > { %4051 = vrot.lane.b32.xlu1 %v12253_v27, %s11604_s21 }
 0x883   : > { %4155 = vrot.lane.b32.xlu0 %v12271_v50, %s11604_s21 }
 0x884   : > { %4102 = vrot.lane.b32.xlu1 %v12249_v23, %s11604_s21 }
 0x887   : > { %4206 = vrot.lane.b32.xlu0 %v12268_v47, %s11604_s21 }
 0x888   : > { %4153 = vrot.lane.b32.xlu1 %v12282_v54, %s11604_s21 }
 0x88b   : > { %4204 = vrot.lane.b32.xlu0 %v12274_v52, %s11604_s21 }
 0x893   : > { %v2631_v3 = vpop.f32.mrb[56].mxu0 }
 0x894   : > { %v9977_v48 = vpop.f32.mrb[57].mxu0 }
 0x895   : > { %v2634_v6 = vpop.f32.mrb[58].mxu0 }
 0x896   : > { %v2878_v42 = vpack.c.bf16 %v2634_v6, %v2631_v3  ;;  %v9978_v45 = vpop.f32.mrb[59].mxu0  ;;  %v14127_v3 = vpack.c.bf16 %v12573_v28, %v12571_v44  ;;  %v14131_v44 = vld [vmem:[#allocation40_spill] sm:$0xff] }
 0x898   : > { %10011 = vmatprep.mubr.msk.bf16.mxu0 %vm1441_vm1, %v2878_v42 }
 0x899   : > { %10012 = vmatmul.mubr.msk.bf16.vlgmr.msra.gmra.mrb[68].mxu0 %vm1441_vm1, %v14122_v12 }
 0x89a   : > { %10024 = vmatpush3.bf16.msra.mxu0 %v12815_v30  ;;  %v14124_v30 = vpack.c.bf16 %v12736_v39, %v12734_v26  ;;  %v14128_v26 = vpack.c.bf16 %v12441_v11, %v12439_v8  ;;  %v14130_v39 = vld [vmem:[#allocation41_spill] sm:$0xff] }
 0x89b   : > { %v2727_v29 = vpop.f32.mrb[60].mxu0  ;;  %10073 = vmatprep.subr.bf16.mxu0 %v14120_v40  ;;  %v14132_v28 = vpack.c.bf16 %v14130_v39, %v14131_v44 }
 0x89c   : > { %v9989_v35 = vpop.f32.mrb[61].mxu0 }
 0x89d   : > { %v2730_v24 = vpop.f32.mrb[62].mxu0 }
 0x89e   : > { %v2880_v13 = vpack.c.bf16 %v2730_v24, %v2727_v29  ;;  %v9990_v25 = vpop.f32.mrb[63].mxu0 }
 0x8a0   : > { %10015 = vmatprep.mubr.msk.bf16.mxu0 %vm1441_vm1, %v2880_v13 }
 0x8a1   : > { %10016 = vmatmul.mubr.msk.bf16.gmra.mrb[72].mxu0 %vm1441_vm1, %v14123_v49 }
 0x8a3   : > { %v2823_v55 = vpop.f32.mrb[64].mxu0 }
 0x8a4   : > { %v10001_v46 = vpop.f32.mrb[65].mxu0 }
 0x8a5   : > { %v2826_v61 = vpop.f32.mrb[66].mxu0 }
 0x8a6   : > { %v2882_v34 = vpack.c.bf16 %v2826_v61, %v2823_v55  ;;  %v10002_v37 = vpop.f32.mrb[67].mxu0 }
 0x8a8   : > { %10019 = vmatprep.mubr.msk.bf16.mxu0 %vm1441_vm1, %v2882_v34 }
 0x8a9   : > { %10020 = vmatmul.mubr.msk.bf16.gmra.mrb[76].mxu0 %vm1441_vm1, %v14124_v30 }
 0x8aa   : > { %10025 = vmatprep.mubr.msk.bf16.mxu0 %vm1441_vm1, %v14125_v9 }
 0x8b1   : > { %10026 = vmatmul.mubr.msk.bf16.vlgmr.msra.gmra.mrb[68].mxu0 %vm1441_vm1, %v14126_v41 }
 0x8b2   : > { %10074 = vmatpush3.bf16.msra.mxu0 %v3542_v36  ;;  %10029 = vmatprep.mubr.msk.bf16.mxu0 %vm1441_vm1, %v14127_v3 }
 0x8b3   : > { %10085 = vmatprep.subr.bf16.mxu0 %v14120_v40 }
 0x8b9   : > { %10030 = vmatmul.mubr.msk.bf16.gmra.mrb[72].mxu0 %vm1441_vm1, %v14128_v26 }
 0x8ba   : > { %10033 = vmatprep.mubr.msk.bf16.mxu0 %vm1441_vm1, %v14129_v7 }
 0x8c0   : > { %v3477_v16 = vpop.xlane.xlu0 %3476 }
 0x8c1   : > { %11010 = vrcp.f32 %v3477_v16  ;;  %10034 = vmatmul.mubr.msk.bf16.gmra.mrb[76].mxu0 %vm1441_vm1, %v14132_v28 }
 0x8c2   : > { %v3480_v48 = vpop.xlane.xlu1 %3479  ;;  %10075 = vmatprep.mubr.msk.bf16.mxu0 %vm11601_vm0, %v14120_v40 }
 0x8c3   : > { %11012 = vrcp.f32 %v3480_v48 }
 0x8c8   : > { %v3483_v8 = vpop.xlane.xlu0 %3482 }
 0x8c9   : > { %11014 = vrcp.f32 %v3483_v8 }
 0x8cb   : > { %v11011_v11 = vpop.eup %11010 }
 0x8cc   : > { %v3486_v10 = vpop.xlane.xlu1 %3485  ;;  %v3523_v6 = vmul.f32 %v11011_v11, %v12820_v17 }
 0x8cd   : > { %v11013_v51 = vpop.eup %11012  ;;  %11016 = vrcp.f32 %v3486_v10 }
 0x8ce   : > { %v3524_v42 = vmul.f32 %v11013_v51, %v12824_v56 }
 0x8d0   : > { %v3535_v45 = vpack.c.bf16 %v3524_v42, %v3523_v6  ;;  %v3489_v12 = vpop.xlane.xlu0 %3488 }
 0x8d1   : > { %11018 = vrcp.f32 %v3489_v12 }
 0x8d2   : > { %10076 = vmatmul.mubr.msk.bf16.vlgmr.msra.gmra.mrb[80].mxu0 %vm1441_vm1, %v3535_v45 }
 0x8d3   : > { %10086 = vmatpush3.bf16.msra.mxu0 %v3636_v0  ;;  %10087 = vmatprep.mubr.msk.bf16.mxu0 %vm11601_vm0, %v14120_v40  ;;  %v11015_v35 = vpop.eup %11014 }
 0x8d4   : > { %v3492_v29 = vpop.xlane.xlu1 %3491  ;;  %10097 = vmatprep.subr.bf16.mxu0 %v14120_v40  ;;  %v3525_v13 = vmul.f32 %v11015_v35, %v12830_v2 }
 0x8d5   : > { %11020 = vrcp.f32 %v3492_v29 }
 0x8d7   : > { %v11017_v24 = vpop.eup %11016 }
 0x8d8   : > { %v3526_v17 = vmul.f32 %v11017_v24, %v12835_v15  ;;  %v3495_v56 = vpop.xlane.xlu0 %3494 }
 0x8d9   : > { %11022 = vrcp.f32 %v3495_v56 }
 0x8da   : > { %v3498_v25 = vpop.xlane.xlu1 %3497  ;;  %v3536_v49 = vpack.c.bf16 %v3526_v17, %v3525_v13  ;;  %v10860_v13 = vld [vmem:[%s14121_s0 + $0x10] sm:$0xff]  }
 0x8db   : > { %11024 = vrcp.f32 %v3498_v25  ;;  %v11019_v55 = vpop.eup %11018 }
 0x8dc   : > { %10082 = vmatmul.mubr.msk.bf16.vlgmr.msra.gmra.mrb[88].mxu1 %vm1441_vm1, %v3536_v49  ;;  %v3527_v61 = vmul.f32 %v11019_v55, %v12840_v43 }
 0x8dd   : > { %10092 = vmatpush3.bf16.msra.mxu1 %v3683_v58  ;;  %10093 = vmatprep.mubr.msk.bf16.mxu1 %vm11601_vm0, %v14120_v40 }
 0x8de   : > { %10103 = vmatprep.subr.bf16.mxu1 %v14120_v40 }
 0x8df   : > { %v11021_v46 = vpop.eup %11020 }
 0x8e0   : > { %v3528_v2 = vmul.f32 %v11021_v46, %v12845_v5  ;;  %v3501_v15 = vpop.xlane.xlu0 %3500 }
 0x8e1   : > { %11026 = vrcp.f32 %v3501_v15 }
 0x8e2   : > { %v3504_v34 = vpop.xlane.xlu1 %3503  ;;  %v3537_v37 = vpack.c.bf16 %v3528_v2, %v3527_v61 }
 0x8e3   : > { %v11023_v30 = vpop.eup %11022  ;;  %11028 = vrcp.f32 %v3504_v34 }
 0x8e4   : > { %10088 = vmatmul.mubr.msk.bf16.vlgmr.msra.gmra.mrb[84].mxu0 %vm1441_vm1, %v3537_v37  ;;  %v3529_v36 = vmul.f32 %v11023_v30, %v12850_v53 }
 0x8e5   : > { %v11025_v9 = vpop.eup %11024  ;;  %10099 = vmatprep.mubr.msk.bf16.mxu0 %vm11601_vm0, %v14120_v40 }
 0x8e6   : > { %v3530_v41 = vmul.f32 %v11025_v9, %v12854_v38 }
 0x8e8   : > { %v3538_v3 = vpack.c.bf16 %v3530_v41, %v3529_v36 }
 0x8ea   : > { %v3507_v43 = vpop.xlane.xlu0 %3506  ;;  %10094 = vmatmul.mubr.msk.bf16.vlgmr.msra.gmra.mrb[92].mxu1 %vm1441_vm1, %v3538_v3 }
 0x8eb   : > { %11030 = vrcp.f32 %v3507_v43  ;;  %10105 = vmatprep.mubr.msk.bf16.mxu1 %vm11601_vm0, %v14120_v40  ;;  %v11027_v5 = vpop.eup %11026 }
 0x8ec   : > { %v3510_v26 = vpop.xlane.xlu1 %3509  ;;  %v3531_v53 = vmul.f32 %v11027_v5, %v12860_v33 }
 0x8ed   : > { %v11029_v7 = vpop.eup %11028  ;;  %11032 = vrcp.f32 %v3510_v26 }
 0x8ee   : > { %v3532_v58 = vmul.f32 %v11029_v7, %v12864_v57  ;;  %v3777_v0 = vpop.permute.xlu0 %3776 }
 0x8ef   : > { %10104 = vmatpush3.bf16.msra.mxu1 %v3777_v0 }
 0x8f0   : > { %v3730_v16 = vpop.permute.xlu1 %3729  ;;  %10123 = vmatprep.subr.bf16.mxu1 %v14120_v40  ;;  %v3539_v38 = vpack.c.bf16 %v3532_v58, %v3531_v53 }
 0x8f1   : > { %10098 = vmatpush3.bf16.msra.mxu0 %v3730_v16 }
 0x8f2   : > { %v3950_v33 = vpop.permute.xlu0 %3949  ;;  %10109 = vmatprep.subr.bf16.mxu0 %v10860_v13 }
 0x8f4   : > { %10100 = vmatmul.mubr.msk.bf16.vlgmr.msra.gmra.mrb[88].mxu0 %vm1441_vm1, %v3539_v38  ;;  %v3952_v8 = vpop.permute.xlu1 %3951 }
 0x8f5   : > { %v11031_v39 = vpop.eup %11030  ;;  %v3957_v57 = vsel %vm1441_vm1, %v3952_v8, 0  ;;  %10110 = vmatpush3.bf16.msra.mxu0 %v10860_v13 }
 0x8f6   : > { %v3533_v28 = vmul.f32 %v11031_v39, %v12869_v19  ;;  %v4001_v19 = vpop.permute.xlu0 %4000  ;;  %10141 = vmatprep.subr.bf16.mxu0 %v14120_v40 }
 0x8f7   : > { %v11033_v44 = vpop.eup %11032 }
 0x8f8   : > { %v3534_v48 = vmul.f32 %v11033_v44, %v12873_v60  ;;  %v4003_v10 = vpop.permute.xlu1 %4002 }
 0x8f9   : > { %v4008_v51 = vsel %vm1441_vm1, %v4003_v10, 0 }
 0x8fa   : > { %v3540_v11 = vpack.c.bf16 %v3534_v48, %v3533_v28  ;;  %v4105_v6 = vpop.permute.xlu0 %4104 }
 0x8fb   : > { %v4110_v37 = vsel %vm1441_vm1, %v4105_v6, 0 }
 0x8fc   : > { %10106 = vmatmul.mubr.msk.bf16.vlgmr.msra.gmra.mrb[96].mxu1 %vm1441_vm1, %v3540_v11  ;;  %v4054_v60 = vpop.permute.xlu1 %4053 }
 0x8fd   : > { %10124 = vmatpush3.bf16.xpose.msra.mxu1 %v3957_v57  ;;  %10125 = vmatprep.mubr.msk.bf16.mxu1 %vm11601_vm0, %v14120_v40  ;;  %v4059_v42 = vsel %vm1441_vm1, %v4054_v60, 0 }
 0x8fe   : > { %10129 = vmatprep.subr.bf16.mxu1 %v14120_v40  ;;  %v4156_v12 = vpop.permute.xlu0 %4155 }
 0x8ff   : > { %v4161_v29 = vsel %vm1441_vm1, %v4156_v12, 0 }
 0x900   : > { %v4052_v45 = vpop.permute.xlu1 %4051 }
 0x904   : > { %10126 = vmatmul.mubr.msk.bf16.vlgmr.msra.gmra.mrb[100].mxu1 %vm1441_vm1, %v3950_v33  ;;  %v4103_v35 = vpop.permute.xlu1 %4102 }
 0x905   : > { %10130 = vmatpush3.bf16.xpose.msra.mxu1 %v4008_v51  ;;  %10131 = vmatprep.mubr.msk.bf16.mxu1 %vm11601_vm0, %v14120_v40  ;;  %v4207_v51 = vpop.permute.xlu0 %4206 }
 0x906   : > { %10135 = vmatprep.subr.bf16.mxu1 %v14120_v40 }
 0x908   : > { %v4154_v24 = vpop.permute.xlu1 %4153 }
 0x90c   : > { %10132 = vmatmul.mubr.msk.bf16.vlgmr.msra.gmra.mrb[104].mxu1 %vm1441_vm1, %v4001_v19 }
 0x90d   : > { %10136 = vmatpush3.bf16.xpose.msra.mxu1 %v4059_v42  ;;  %10137 = vmatprep.mubr.msk.bf16.mxu1 %vm11601_vm0, %v14120_v40  ;;  %v4212_v42 = vsel %vm1441_vm1, %v4207_v51, 0 }
 0x90e   : > { %10147 = vmatprep.subr.bf16.mxu1 %v14120_v40 }
 0x914   : > { %10138 = vmatmul.mubr.msk.bf16.vlgmr.msra.gmra.mrb[108].mxu1 %vm1441_vm1, %v4052_v45 }
 0x915   : > { %10148 = vmatpush3.bf16.xpose.msra.mxu1 %v4161_v29  ;;  %10149 = vmatprep.mubr.msk.bf16.mxu1 %vm11601_vm0, %v14120_v40 }
 0x916   : > { %10159 = vmatprep.subr.bf16.mxu1 %v14120_v40 }
 0x91c   : > { %10150 = vmatmul.mubr.msk.bf16.vlgmr.msra.gmra.mrb[112].mxu1 %vm1441_vm1, %v4154_v24 }
 0x91d   : > { %10161 = vmatprep.mubr.msk.bf16.mxu1 %vm11601_vm0, %v14120_v40 }
 0x9a5   : > { %v3581_v17 = vpop.f32.mrb[80].mxu0 }
 0x9a6   : > { %v10077_v56 = vpop.f32.mrb[81].mxu0 }
 0x9a7   : > { %v3584_v25 = vpop.f32.mrb[82].mxu0  ;;  %v4205_v56 = vpop.permute.xlu0 %4204 }
 0x9a8   : > { %v3823_v49 = vpack.c.bf16 %v3584_v25, %v3581_v17  ;;  %v10078_v55 = vpop.f32.mrb[83].mxu0 }
 0x9aa   : > { %10111 = vmatprep.mubr.msk.bf16.mxu0 %vm1441_vm1, %v3823_v49 }
 0x9af   : > { %v3628_v46 = vpop.f32.mrb[88].mxu1 }
 0x9b0   : > { %v10083_v61 = vpop.f32.mrb[89].mxu1 }
 0x9b1   : > { %v3631_v2 = vpop.f32.mrb[90].mxu1 }
 0x9b2   : > { %v3824_v15 = vpack.c.bf16 %v3631_v2, %v3628_v46  ;;  %v10084_v34 = vpop.f32.mrb[91].mxu1 }
 0x9b4   : > { %10112 = vmatmul.mubr.msk.bf16.vlgmr.msra.gmra.mrb[68].mxu0 %vm1441_vm1, %v3824_v15 }
 0x9b5   : > { %10142 = vmatpush3.bf16.xpose.msra.mxu0 %v4110_v37 }
 0x9b6   : > { %10153 = vmatprep.subr.bf16.mxu0 %v14120_v40 }
 0x9b7   : > { %v3675_v30 = vpop.f32.mrb[84].mxu0 }
 0x9b8   : > { %v10089_v9 = vpop.f32.mrb[85].mxu0 }
 0x9b9   : > { %v3678_v36 = vpop.f32.mrb[86].mxu0 }
 0x9ba   : > { %v3825_v41 = vpack.c.bf16 %v3678_v36, %v3675_v30  ;;  %v10090_v3 = vpop.f32.mrb[87].mxu0 }
 0x9bc   : > { %10115 = vmatprep.mubr.msk.bf16.mxu0 %vm1441_vm1, %v3825_v41 }
 0x9bd   : > { %v3722_v43 = vpop.f32.mrb[92].mxu1 }
 0x9be   : > { %v10095_v5 = vpop.f32.mrb[93].mxu1 }
 0x9bf   : > { %v3725_v26 = vpop.f32.mrb[94].mxu1 }
 0x9c0   : > { %v3826_v7 = vpack.c.bf16 %v3725_v26, %v3722_v43  ;;  %v10096_v58 = vpop.f32.mrb[95].mxu1 }
 0x9c2   : > { %10116 = vmatmul.mubr.msk.bf16.gmra.mrb[72].mxu0 %vm1441_vm1, %v3826_v7 }
 0x9c7   : > { %v3769_v0 = vpop.f32.mrb[88].mxu0 }
 0x9c8   : > { %v10101_v53 = vpop.f32.mrb[89].mxu0 }
 0x9c9   : > { %v3772_v16 = vpop.f32.mrb[90].mxu0 }
 0x9ca   : > { %v3827_v38 = vpack.c.bf16 %v3772_v16, %v3769_v0  ;;  %v10102_v39 = vpop.f32.mrb[91].mxu0 }
 0x9cc   : > { %10119 = vmatprep.mubr.msk.bf16.mxu0 %vm1441_vm1, %v3827_v38 }
 0x9cf   : > { %v3816_v44 = vpop.f32.mrb[96].mxu1 }
 0x9d0   : > { %v10107_v28 = vpop.f32.mrb[97].mxu1 }
 0x9d1   : > { %v3819_v48 = vpop.f32.mrb[98].mxu1 }
 0x9d2   : > { %v3828_v8 = vpack.c.bf16 %v3819_v48, %v3816_v44  ;;  %v10108_v11 = vpop.f32.mrb[99].mxu1 }
 0x9d4   : > { %10120 = vmatmul.mubr.msk.bf16.gmra.mrb[76].mxu0 %vm1441_vm1, %v3828_v8 }
 0x9d5   : > { %10143 = vmatprep.mubr.msk.bf16.mxu0 %vm11601_vm0, %v14120_v40 }
 0x9d7   : > { %v3993_v57 = vpop.f32.mrb[100].mxu1 }
 0x9d8   : > { %v10127_v33 = vpop.f32.mrb[101].mxu1  ;;  %v4255_v10 = vsel %vm1441_vm1, %v3993_v57, -inf }
 0x9d9   : > { %4256 = vmax.xlane.f32.xlu1 %v4255_v10  ;;  %v3996_v19 = vpop.f32.mrb[102].mxu1 }
 0x9da   : > { %v10128_v60 = vpop.f32.mrb[103].mxu1  ;;  %v4258_v6 = vsel %vm1441_vm1, %v3996_v19, -inf }
 0x9db   : > { %4259 = vmax.xlane.f32.xlu0 %v4258_v6 }
 0x9dc   : > { %10144 = vmatmul.mubr.msk.bf16.vlgmr.msra.gmra.mrb[92].mxu0 %vm1441_vm1, %v4103_v35 }
 0x9dd   : > { %10154 = vmatpush3.bf16.xpose.msra.mxu0 %v4212_v42  ;;  %10155 = vmatprep.mubr.msk.bf16.mxu0 %vm11601_vm0, %v14120_v40 }
 0x9de   : > { %10165 = vmatprep.subr.bf16.mxu0 %v14120_v40 }
 0x9df   : > { %v4044_v45 = vpop.f32.mrb[104].mxu1 }
 0x9e0   : > { %v10133_v12 = vpop.f32.mrb[105].mxu1  ;;  %v4261_v29 = vsel %vm1441_vm1, %v4044_v45, -inf }
 0x9e1   : > { %4262 = vmax.xlane.f32.xlu0 %v4261_v29  ;;  %v4047_v24 = vpop.f32.mrb[106].mxu1 }
 0x9e2   : > { %v10134_v13 = vpop.f32.mrb[107].mxu1  ;;  %v4264_v17 = vsel %vm1441_vm1, %v4047_v24, -inf }
 0x9e3   : > { %4265 = vmax.xlane.f32.xlu1 %v4264_v17 }
 0x9e4   : > { %10156 = vmatmul.mubr.msk.bf16.vlgmr.msra.gmra.mrb[96].mxu0 %vm1441_vm1, %v4205_v56 }
 0x9e5   : > { %10167 = vmatprep.mubr.msk.bf16.mxu0 %vm11601_vm0, %v14120_v40 }
 0x9e7   : > { %v4095_v35 = vpop.f32.mrb[108].mxu1 }
 0x9e8   : > { %v10139_v25 = vpop.f32.mrb[109].mxu1  ;;  %v4267_v49 = vsel %vm1441_vm1, %v4095_v35, -inf }
 0x9e9   : > { %4268 = vmax.xlane.f32.xlu0 %v4267_v49  ;;  %v4098_v55 = vpop.f32.mrb[110].mxu1 }
 0x9ea   : > { %v10140_v46 = vpop.f32.mrb[111].mxu1  ;;  %v4270_v61 = vsel %vm1441_vm1, %v4098_v55, -inf }
 0x9eb   : > { %4271 = vmax.xlane.f32.xlu1 %v4270_v61 }
 0x9ef   : > { %v13026_v2 = vpop.f32.mrb[112].mxu1 }
 0x9f0   : > { %v10151_v15 = vpop.f32.mrb[113].mxu1  ;;  %v4279_v51 = vsel %vm1441_vm1, %v13026_v2, -inf }
 0x9f1   : > { %v13028_v34 = vpop.f32.mrb[114].mxu1 }
 0x9f2   : > { %v10152_v37 = vpop.f32.mrb[115].mxu1  ;;  %v4282_v60 = vsel %vm1441_vm1, %v13028_v34, -inf }
 0xa66   : > { %v4257_v30 = vpop.xlane.xlu1 %4256 }
 0xa67   : > { %v4291_v36 = vsub.f32 %v3993_v57, %v4257_v30 }
 0xa68   : > { %v4260_v9 = vpop.xlane.xlu0 %4259 }
 0xa69   : > { %v4292_v3 = vsub.f32 %v3996_v19, %v4260_v9  ;;  %v4303_v5 = vmul.f32 1.442695, %v4291_v36 }
 0xa6b   : > { %v4305_v58 = vmul.f32 1.442695, %v4292_v3  ;;  %11034 = vpow2.f32 %v4303_v5 }
 0xa6d   : > { %11036 = vpow2.f32 %v4305_v58 }
 0xa6e   : > { %v4263_v41 = vpop.xlane.xlu0 %4262 }
 0xa6f   : > { %v4293_v26 = vsub.f32 %v4044_v45, %v4263_v41 }
 0xa70   : > { %v4266_v43 = vpop.xlane.xlu1 %4265 }
 0xa71   : > { %v4294_v0 = vsub.f32 %v4047_v24, %v4266_v43  ;;  %v4307_v16 = vmul.f32 1.442695, %v4293_v26 }
 0xa73   : > { %v4309_v48 = vmul.f32 1.442695, %v4294_v0  ;;  %11038 = vpow2.f32 %v4307_v16 }
 0xa75   : > { %11040 = vpow2.f32 %v4309_v48  ;;  %v13043_v12 = vpop.eup %11034 }
 0xa76   : > { %v4269_v7 = vpop.xlane.xlu0 %4268  ;;  %v4327_v56 = vsel %vm1441_vm1, %v13043_v12, 0.0 }
 0xa77   : > { %v4295_v38 = vsub.f32 %v4095_v35, %v4269_v7  ;;  %v13046_v17 = vpop.eup %11036 }
 0xa78   : > { %v4272_v53 = vpop.xlane.xlu1 %4271  ;;  %v4330_v25 = vsel %vm1441_vm1, %v13046_v17, 0.0 }
 0xa79   : > { %v4296_v8 = vsub.f32 %v4098_v55, %v4272_v53  ;;  %v4311_v10 = vmul.f32 1.442695, %v4295_v38 }
 0xa7b   : > { %v4313_v19 = vmul.f32 1.442695, %v4296_v8  ;;  %11042 = vpow2.f32 %v4311_v10 }
 0xa7d   : > { %11044 = vpow2.f32 %v4313_v19  ;;  %v13050_v35 = vpop.eup %11038 }
 0xa7e   : > { %v4333_v55 = vsel %vm1441_vm1, %v13050_v35, 0.0 }
 0xa7f   : > { %v13054_v49 = vpop.eup %11040 }
 0xa80   : > { %v4336_v61 = vsel %vm1441_vm1, %v13054_v49, 0.0 }
 0xa85   : > { %v13058_v46 = vpop.eup %11042 }
 0xa86   : > { %v4339_v37 = vsel %vm1441_vm1, %v13058_v46, 0.0 }
 0xa87   : > { %v13062_v15 = vpop.eup %11044 }
 0xa88   : > { %v4342_v30 = vsel %vm1441_vm1, %v13062_v15, 0.0 }
 0xaaf   : > { %v13030_v39 = vpop.f32.mrb[92].mxu0 }
 0xab0   : > { %v10145_v44 = vpop.f32.mrb[93].mxu0  ;;  %v4273_v28 = vsel %vm1441_vm1, %v13030_v39, -inf }
 0xab1   : > { %4274 = vmax.xlane.f32.xlu0 %v4273_v28  ;;  %v13034_v11 = vpop.f32.mrb[94].mxu0 }
 0xab2   : > { %v10146_v57 = vpop.f32.mrb[95].mxu0  ;;  %v4276_v33 = vsel %vm1441_vm1, %v13034_v11, -inf }
 0xab3   : > { %4277 = vmax.xlane.f32.xlu1 %v4276_v33 }
 0xab5   : > { %4280 = vmax.xlane.f32.xlu0 %v4279_v51 }
 0xab7   : > { %4283 = vmax.xlane.f32.xlu1 %v4282_v60  ;;  %v4248_v6 = vpop.f32.mrb[96].mxu0 }
 0xab8   : > { %v10157_v42 = vpop.f32.mrb[97].mxu0  ;;  %v4285_v45 = vsel %vm1441_vm1, %v4248_v6, -inf }
 0xab9   : > { %4286 = vmax.xlane.f32.xlu0 %v4285_v45  ;;  %v4251_v29 = vpop.f32.mrb[98].mxu0 }
 0xaba   : > { %v10158_v24 = vpop.f32.mrb[99].mxu0  ;;  %v4288_v13 = vsel %vm1441_vm1, %v4251_v29, -inf }
 0xabb   : > { %4289 = vmax.xlane.f32.xlu1 %v4288_v13 }
 0xabd   : > { %4328 = vadd.xlane.f32.xlu0 %v4327_v56 }
 0xabf   : > { %4331 = vadd.xlane.f32.xlu1 %v4330_v25 }
 0xac1   : > { %4334 = vadd.xlane.f32.xlu0 %v4333_v55 }
 0xac3   : > { %4337 = vadd.xlane.f32.xlu1 %v4336_v61 }
 0xac5   : > { %4340 = vadd.xlane.f32.xlu0 %v4339_v37 }
 0xac7   : > { %4343 = vadd.xlane.f32.xlu1 %v4342_v30 }
 0xb3e   : > { %v4275_v9 = vpop.xlane.xlu0 %4274 }
 0xb40   : > { %v4278_v36 = vpop.xlane.xlu1 %4277 }
 0xb41   : > { %v4298_v38 = vsub.f32 %v13034_v11, %v4278_v36 }
 0xb42   : > { %v4281_v41 = vpop.xlane.xlu0 %4280 }
 0xb43   : > { %v4299_v3 = vsub.f32 %v13026_v2, %v4281_v41  ;;  %v4297_v2 = vsub.f32 %v13030_v39, %v4275_v9  ;;  %v4317_v8 = vmul.f32 1.442695, %v4298_v38 }
 0xb44   : > { %v4284_v43 = vpop.xlane.xlu1 %4283 }
 0xb45   : > { %v4319_v5 = vmul.f32 1.442695, %v4299_v3  ;;  %v4300_v26 = vsub.f32 %v13028_v34, %v4284_v43  ;;  %v4315_v28 = vmul.f32 1.442695, %v4297_v2 }
 0xb46   : > { %v4287_v34 = vpop.xlane.xlu0 %4286 }
 0xb47   : > { %11046 = vpow2.f32 %v4319_v5  ;;  %v4321_v7 = vmul.f32 1.442695, %v4300_v26  ;;  %v4301_v48 = vsub.f32 %v4248_v6, %v4287_v34 }
 0xb48   : > { %v4290_v44 = vpop.xlane.xlu1 %4289 }
 0xb49   : > { %11048 = vpow2.f32 %v4321_v7  ;;  %v4302_v57 = vsub.f32 %v4251_v29, %v4290_v44  ;;  %v4323_v33 = vmul.f32 1.442695, %v4301_v48 }
 0xb4a   : > { %11050 = vpow2.f32 %v4315_v28  ;;  %v4329_v24 = vpop.xlane.xlu0 %4328 }
 0xb4b   : > { %11052 = vpow2.f32 %v4317_v8  ;;  %v4325_v10 = vmul.f32 1.442695, %v4302_v57 }
 0xb4c   : > { %11054 = vpow2.f32 %v4323_v33  ;;  %v4332_v29 = vpop.xlane.xlu1 %4331 }
 0xb4d   : > { %11056 = vpow2.f32 %v4325_v10 }
 0xb4e   : > { %11058 = vrcp.f32 %v4332_v29  ;;  %v4335_v56 = vpop.xlane.xlu0 %4334 }
 0xb4f   : > { %11060 = vrcp.f32 %v4329_v24 }
 0xb50   : > { %v4338_v13 = vpop.xlane.xlu1 %4337 }
 0xb51   : > { %v13070_v58 = vpop.eup %11046  ;;  %11062 = vrcp.f32 %v4338_v13 }
 0xb52   : > { %v4351_v0 = vsel %vm1441_vm1, %v13070_v58, 0.0  ;;  %11064 = vrcp.f32 %v4335_v56  ;;  %v4341_v55 = vpop.xlane.xlu0 %4340  ;;  %v10861_v56 = vld [vmem:[%s14121_s0 + $0x18] sm:$0xff]  }
 0xb53   : > { %v13074_v53 = vpop.eup %11048  ;;  %4352 = vadd.xlane.f32.xlu0 %v4351_v0 }
 0xb54   : > { %v4354_v16 = vsel %vm1441_vm1, %v13074_v53, 0.0  ;;  %v13088_v51 = vpop.eup %11050  ;;  %v4344_v25 = vpop.xlane.xlu1 %4343 }
 0xb55   : > { %4355 = vadd.xlane.f32.xlu1 %v4354_v16  ;;  %v13090_v19 = vpop.eup %11052  ;;  %v4345_v39 = vsel %vm1441_vm1, %v13088_v51, 0.0  ;;  %11066 = vrcp.f32 %v4344_v25 }
 0xb56   : > { %v13094_v60 = vpop.eup %11054  ;;  %v4348_v11 = vsel %vm1441_vm1, %v13090_v19, 0.0  ;;  %11068 = vrcp.f32 %v4341_v55 }
 0xb57   : > { %v13098_v6 = vpop.eup %11056  ;;  %v4357_v42 = vsel %vm1441_vm1, %v13094_v60, 0.0 }
 0xb58   : > { %v4360_v45 = vsel %vm1441_vm1, %v13098_v6, 0.0  ;;  %v11059_v61 = vpop.eup %11058 }
 0xb59   : > { %v11061_v37 = vpop.eup %11060  ;;  %v4376_v36 = vmul.f32 %v11059_v61, %v13046_v17 }
 0xb5a   : > { %v4375_v43 = vmul.f32 %v11061_v37, %v13043_v12 }
 0xb5b   : > { %v11063_v9 = vpop.eup %11062 }
 0xb5c   : > { %v11065_v3 = vpop.eup %11064  ;;  %v4378_v5 = vmul.f32 %v11063_v9, %v13054_v49  ;;  %v4387_v16 = vpack.c.bf16 %v4376_v36, %v4375_v43 }
 0xb5d   : > { %v4377_v7 = vmul.f32 %v11065_v3, %v13050_v35 }
 0xb5f   : > { %v11067_v2 = vpop.eup %11066  ;;  %v4388_v34 = vpack.c.bf16 %v4378_v5, %v4377_v7 }
 0xb60   : > { %v11069_v17 = vpop.eup %11068  ;;  %v4380_v12 = vmul.f32 %v11067_v2, %v13062_v15 }
 0xb61   : > { %v4379_v38 = vmul.f32 %v11069_v17, %v13058_v46 }
 0xb63   : > { %v4389_v44 = vpack.c.bf16 %v4380_v12, %v4379_v38 }
 0xb66   : > { %4440 = vrot.lane.b32.xlu1 %v12304_v63, %s11604_s21 }
 0xb69   : > { %4393 = vrot.lane.b32.xlu0 %v12312_v14, %s11604_s21 }
 0xb6a   : > { %4487 = vrot.lane.b32.xlu1 %v12317_v22, %s11604_s21 }
 0xb6d   : > { %4534 = vrot.lane.b32.xlu0 %v12314_v20, %s11604_s21 }
 0xb8c   : > { %4346 = vadd.xlane.f32.xlu0 %v4345_v39 }
 0xb8e   : > { %4349 = vadd.xlane.f32.xlu1 %v4348_v11 }
 0xb90   : > { %4358 = vadd.xlane.f32.xlu0 %v4357_v42 }
 0xb92   : > { %4361 = vadd.xlane.f32.xlu1 %v4360_v45 }
 0xba3   : > { %4581 = vrot.lane.b32.xlu1 %v12322_v32, %s11604_s21 }
 0xba6   : > { %4628 = vrot.lane.b32.xlu0 %v12320_v31, %s11604_s21 }
 0xba7   : > { %4803 = vrot.lane.b32.xlu1 %v12222_v62, %s11605_s12 }
 0xbaa   : > { %4801 = vrot.lane.b32.xlu0 %v12231_v4, %s11605_s12 }
 0xbab   : > { %4854 = vrot.lane.b32.xlu1 %v12219_v59, %s11605_s12 }
 0xbae   : > { %4852 = vrot.lane.b32.xlu0 %v12227_v1, %s11605_s12 }
 0xbaf   : > { %4905 = vrot.lane.b32.xlu1 %v12244_v21, %s11605_s12 }
 0xbb2   : > { %4903 = vrot.lane.b32.xlu0 %v12253_v27, %s11605_s12 }
 0xbb3   : > { %4956 = vrot.lane.b32.xlu1 %v12241_v18, %s11605_s12 }
 0xbb6   : > { %5007 = vrot.lane.b32.xlu0 %v12271_v50, %s11605_s12 }
 0xbb7   : > { %4954 = vrot.lane.b32.xlu1 %v12249_v23, %s11605_s12 }
 0xbba   : > { %5058 = vrot.lane.b32.xlu0 %v12268_v47, %s11605_s12 }
 0xbbb   : > { %5005 = vrot.lane.b32.xlu1 %v12282_v54, %s11605_s12 }
 0xbbe   : > { %5056 = vrot.lane.b32.xlu0 %v12274_v52, %s11605_s12 }
 0xbe0   : > { %v4353_v30 = vpop.xlane.xlu0 %4352 }
 0xbe2   : > { %v4356_v41 = vpop.xlane.xlu1 %4355 }
 0xbe3   : > { %11070 = vrcp.f32 %v4356_v41 }
 0xbe4   : > { %v4394_v26 = vpop.permute.xlu0 %4393  ;;  %11072 = vrcp.f32 %v4353_v30 }
 0xbe5   : > { %10160 = vmatpush3.bf16.msra.mxu1 %v4394_v26 }
 0xbe6   : > { %v4441_v0 = vpop.permute.xlu1 %4440  ;;  %10171 = vmatprep.subr.bf16.mxu1 %v14120_v40 }
 0xbe7   : > { %10166 = vmatpush3.bf16.msra.mxu0 %v4441_v0 }
 0xbe8   : > { %10162 = vmatmul.mubr.msk.bf16.vlgmr.msra.gmra.mrb[116].mxu1 %vm1441_vm1, %v4387_v16  ;;  %10177 = vmatprep.subr.bf16.mxu0 %v14120_v40  ;;  %v4535_v49 = vpop.permute.xlu0 %4534 }
 0xbe9   : > { %10173 = vmatprep.mubr.msk.bf16.mxu1 %vm11601_vm0, %v14120_v40 }
 0xbea   : > { %10168 = vmatmul.mubr.msk.bf16.vlgmr.msra.gmra.mrb[100].mxu0 %vm1441_vm1, %v4388_v34  ;;  %v4488_v35 = vpop.permute.xlu1 %4487 }
 0xbeb   : > { %10172 = vmatpush3.bf16.msra.mxu1 %v4488_v35  ;;  %10178 = vmatpush3.bf16.msra.mxu0 %v4535_v49 }
 0xbec   : > { %10183 = vmatprep.subr.bf16.mxu1 %v14120_v40  ;;  %10179 = vmatprep.mubr.msk.bf16.mxu0 %vm11601_vm0, %v14120_v40 }
 0xbed   : > { %10189 = vmatprep.subr.bf16.mxu0 %v14120_v40  ;;  %v11071_v46 = vpop.eup %11070 }
 0xbee   : > { %v11073_v57 = vpop.eup %11072  ;;  %v4384_v33 = vmul.f32 %v11071_v46, %v13074_v53 }
 0xbef   : > { %v4383_v10 = vmul.f32 %v11073_v57, %v13070_v58 }
 0xbf0   : > { %10174 = vmatmul.mubr.msk.bf16.vlgmr.msra.gmra.mrb[120].mxu1 %vm1441_vm1, %v4389_v44 }
 0xbf1   : > { %10185 = vmatprep.mubr.msk.bf16.mxu1 %vm11601_vm0, %v14120_v40  ;;  %v4391_v42 = vpack.c.bf16 %v4384_v33, %v4383_v10 }
 0xc19   : > { %v4347_v15 = vpop.xlane.xlu0 %4346 }
 0xc1a   : > { %11074 = vrcp.f32 %v4347_v15 }
 0xc1b   : > { %v4350_v28 = vpop.xlane.xlu1 %4349 }
 0xc1c   : > { %11076 = vrcp.f32 %v4350_v28 }
 0xc1d   : > { %v4359_v48 = vpop.xlane.xlu0 %4358 }
 0xc1f   : > { %v4362_v8 = vpop.xlane.xlu1 %4361 }
 0xc20   : > { %11078 = vrcp.f32 %v4362_v8 }
 0xc21   : > { %11080 = vrcp.f32 %v4359_v48  ;;  %v4629_v25 = vpop.permute.xlu0 %4628 }
 0xc23   : > { %v4582_v39 = vpop.permute.xlu1 %4581 }
 0xc24   : > { %v11075_v11 = vpop.eup %11074  ;;  %10184 = vmatpush3.bf16.msra.mxu1 %v4582_v39 }
 0xc25   : > { %10209 = vmatprep.subr.bf16.mxu1 %v14120_v40  ;;  %v4381_v29 = vmul.f32 %v11075_v11, %v13088_v51  ;;  %v4802_v37 = vpop.permute.xlu0 %4801 }
 0xc26   : > { %v11077_v45 = vpop.eup %11076 }
 0xc27   : > { %v4382_v24 = vmul.f32 %v11077_v45, %v13090_v19  ;;  %10186 = vmatmul.mubr.msk.bf16.vlgmr.msra.gmra.mrb[124].mxu1 %vm1441_vm1, %v4391_v42  ;;  %v4804_v53 = vpop.permute.xlu1 %4803 }
 0xc28   : > { %10211 = vmatprep.mubr.msk.bf16.mxu1 %vm11601_vm0, %v14120_v40  ;;  %v4809_v61 = vsel %vm1441_vm1, %v4804_v53, 0 }
 0xc29   : > { %v4390_v13 = vpack.c.bf16 %v4382_v24, %v4381_v29 }
 0xc2a   : > { %v11079_v58 = vpop.eup %11078 }
 0xc2b   : > { %10180 = vmatmul.mubr.msk.bf16.vlgmr.msra.gmra.mrb[104].mxu0 %vm1441_vm1, %v4390_v13  ;;  %v11081_v55 = vpop.eup %11080  ;;  %v4386_v51 = vmul.f32 %v11079_v58, %v13098_v6  ;;  %v4855_v30 = vpop.permute.xlu1 %4854 }
 0xc2c   : > { %10190 = vmatpush3.bf16.msra.mxu0 %v4629_v25  ;;  %10191 = vmatprep.mubr.msk.bf16.mxu0 %vm11601_vm0, %v14120_v40  ;;  %v4385_v19 = vmul.f32 %v11081_v55, %v13094_v60  ;;  %v4860_v36 = vsel %vm1441_vm1, %v4855_v30, 0  ;;  %v4853_v6 = vpop.permute.xlu0 %4852 }
 0xc2d   : > { %10210 = vmatpush3.bf16.xpose.msra.mxu1 %v4809_v61  ;;  %10195 = vmatprep.subr.bf16.mxu0 %v10861_v56 }
 0xc2e   : > { %10215 = vmatprep.subr.bf16.mxu1 %v14120_v40  ;;  %v4392_v9 = vpack.c.bf16 %v4386_v51, %v4385_v19 }
 0xc2f   : > { %v4906_v60 = vpop.permute.xlu1 %4905 }
 0xc30   : > { %v4911_v41 = vsel %vm1441_vm1, %v4906_v60, 0  ;;  %v4904_v3 = vpop.permute.xlu0 %4903 }
 0xc33   : > { %10192 = vmatmul.mubr.msk.bf16.vlgmr.msra.gmra.mrb[108].mxu0 %vm1441_vm1, %v4392_v9  ;;  %v4957_v43 = vpop.permute.xlu1 %4956 }
 0xc34   : > { %10212 = vmatmul.mubr.msk.bf16.vlgmr.msra.gmra.mrb[128].mxu1 %vm1441_vm1, %v4802_v37  ;;  %10196 = vmatpush3.bf16.msra.mxu0 %v10861_v56  ;;  %v5008_v5 = vpop.permute.xlu0 %5007  ;;  %v4962_v26 = vsel %vm1441_vm1, %v4957_v43, 0 }
 0xc35   : > { %10216 = vmatpush3.bf16.xpose.msra.mxu1 %v4860_v36  ;;  %10217 = vmatprep.mubr.msk.bf16.mxu1 %vm11601_vm0, %v14120_v40  ;;  %v5013_v48 = vsel %vm1441_vm1, %v5008_v5, 0 }
 0xc36   : > { %10221 = vmatprep.subr.bf16.mxu1 %v14120_v40  ;;  %10233 = vmatprep.subr.bf16.mxu0 %v14120_v40 }
 0xc37   : > { %v4955_v0 = vpop.permute.xlu1 %4954 }
 0xc38   : > { %v5059_v7 = vpop.permute.xlu0 %5058 }
 0xc39   : > { %v5064_v16 = vsel %vm1441_vm1, %v5059_v7, 0 }
 0xc3b   : > { %v5006_v7 = vpop.permute.xlu1 %5005 }
 0xc3c   : > { %10218 = vmatmul.mubr.msk.bf16.vlgmr.msra.gmra.mrb[132].mxu1 %vm1441_vm1, %v4853_v6  ;;  %v5057_v2 = vpop.permute.xlu0 %5056 }
 0xc3d   : > { %10222 = vmatpush3.bf16.xpose.msra.mxu1 %v4911_v41  ;;  %10223 = vmatprep.mubr.msk.bf16.mxu1 %vm11601_vm0, %v14120_v40 }
 0xc3e   : > { %10227 = vmatprep.subr.bf16.mxu1 %v14120_v40 }
 0xc44   : > { %10224 = vmatmul.mubr.msk.bf16.vlgmr.msra.gmra.mrb[136].mxu1 %vm1441_vm1, %v4904_v3 }
 0xc45   : > { %10228 = vmatpush3.bf16.xpose.msra.mxu1 %v4962_v26  ;;  %10229 = vmatprep.mubr.msk.bf16.mxu1 %vm11601_vm0, %v14120_v40 }
 0xc46   : > { %10239 = vmatprep.subr.bf16.mxu1 %v14120_v40 }
 0xc4c   : > { %10230 = vmatmul.mubr.msk.bf16.vlgmr.msra.gmra.mrb[140].mxu1 %vm1441_vm1, %v4955_v0 }
 0xc4d   : > { %10240 = vmatpush3.bf16.xpose.msra.mxu1 %v5064_v16  ;;  %10241 = vmatprep.mubr.msk.bf16.mxu1 %vm11601_vm0, %v14120_v40 }
 0xc4e   : > { %10251 = vmatprep.subr.bf16.mxu1 %v14120_v40 }
 0xc54   : > { %10242 = vmatmul.mubr.msk.bf16.vlgmr.msra.gmra.mrb[144].mxu1 %vm1441_vm1, %v5057_v2 }
 0xc55   : > { %10253 = vmatprep.mubr.msk.bf16.mxu1 %vm11601_vm0, %v14120_v40 }
 0xcbb   : > { %v4433_v34 = vpop.f32.mrb[116].mxu1 }
 0xcbc   : > { %v10163_v17 = vpop.f32.mrb[117].mxu1 }
 0xcbd   : > { %v4436_v12 = vpop.f32.mrb[118].mxu1  ;;  %v4480_v49 = vpop.f32.mrb[100].mxu0 }
 0xcbe   : > { %v4675_v35 = vpack.c.bf16 %v4436_v12, %v4433_v34  ;;  %v10164_v38 = vpop.f32.mrb[119].mxu1  ;;  %v10169_v44 = vpop.f32.mrb[101].mxu0 }
 0xcbf   : > { %v4483_v15 = vpop.f32.mrb[102].mxu0 }
 0xcc0   : > { %v4676_v28 = vpack.c.bf16 %v4483_v15, %v4480_v49  ;;  %v10170_v46 = vpop.f32.mrb[103].mxu0  ;;  %10197 = vmatprep.mubr.msk.bf16.mxu0 %vm1441_vm1, %v4675_v35 }
 0xcc2   : > { %10198 = vmatmul.mubr.msk.bf16.vlgmr.msra.gmra.mrb[68].mxu0 %vm1441_vm1, %v4676_v28 }
 0xcc3   : > { %10234 = vmatpush3.bf16.xpose.msra.mxu0 %v5013_v48  ;;  %v4527_v8 = vpop.f32.mrb[120].mxu1 }
 0xcc4   : > { %v10175_v57 = vpop.f32.mrb[121].mxu1  ;;  %10245 = vmatprep.subr.bf16.mxu0 %v14120_v40 }
 0xcc5   : > { %v4530_v33 = vpop.f32.mrb[122].mxu1 }
 0xcc6   : > { %v4677_v10 = vpack.c.bf16 %v4530_v33, %v4527_v8  ;;  %v10176_v39 = vpop.f32.mrb[123].mxu1 }
 0xcc8   : > { %10201 = vmatprep.mubr.msk.bf16.mxu0 %vm1441_vm1, %v4677_v10 }
 0xcfa   : > { %v4621_v11 = vpop.f32.mrb[124].mxu1 }
 0xcfb   : > { %v10187_v42 = vpop.f32.mrb[125].mxu1 }
 0xcfc   : > { %v4624_v45 = vpop.f32.mrb[126].mxu1 }
 0xcfd   : > { %v4679_v29 = vpack.c.bf16 %v4624_v45, %v4621_v11  ;;  %v10188_v24 = vpop.f32.mrb[127].mxu1 }
 0xcfe   : > { %v4574_v53 = vpop.f32.mrb[104].mxu0 }
 0xcff   : > { %v10181_v13 = vpop.f32.mrb[105].mxu0 }
 0xd00   : > { %v4577_v56 = vpop.f32.mrb[106].mxu0 }
 0xd01   : > { %v4678_v58 = vpack.c.bf16 %v4577_v56, %v4574_v53  ;;  %v10182_v25 = vpop.f32.mrb[107].mxu0 }
 0xd03   : > { %10202 = vmatmul.mubr.msk.bf16.gmra.mrb[72].mxu0 %vm1441_vm1, %v4678_v58 }
 0xd04   : > { %10205 = vmatprep.mubr.msk.bf16.mxu0 %vm1441_vm1, %v4679_v29 }
 0xd06   : > { %v4668_v55 = vpop.f32.mrb[108].mxu0 }
 0xd07   : > { %v10193_v61 = vpop.f32.mrb[109].mxu0  ;;  %v4845_v51 = vpop.f32.mrb[128].mxu1 }
 0xd08   : > { %v4671_v19 = vpop.f32.mrb[110].mxu0  ;;  %v10213_v37 = vpop.f32.mrb[129].mxu1  ;;  %v5107_v30 = vsel %vm1441_vm1, %v4845_v51, -inf }
 0xd09   : > { %v4680_v9 = vpack.c.bf16 %v4671_v19, %v4668_v55  ;;  %5108 = vmax.xlane.f32.xlu1 %v5107_v30  ;;  %v10194_v36 = vpop.f32.mrb[111].mxu0  ;;  %v4848_v6 = vpop.f32.mrb[130].mxu1 }
 0xd0a   : > { %v10214_v60 = vpop.f32.mrb[131].mxu1  ;;  %v5110_v41 = vsel %vm1441_vm1, %v4848_v6, -inf }
 0xd0b   : > { %5111 = vmax.xlane.f32.xlu0 %v5110_v41  ;;  %10206 = vmatmul.mubr.msk.bf16.gmra.mrb[76].mxu0 %vm1441_vm1, %v4680_v9 }
 0xd0c   : > { %10235 = vmatprep.mubr.msk.bf16.mxu0 %vm11601_vm0, %v14120_v40 }
 0xd0f   : > { %v4896_v3 = vpop.f32.mrb[132].mxu1 }
 0xd10   : > { %v10219_v43 = vpop.f32.mrb[133].mxu1  ;;  %v5113_v5 = vsel %vm1441_vm1, %v4896_v3, -inf }
 0xd11   : > { %5114 = vmax.xlane.f32.xlu0 %v5113_v5  ;;  %v4899_v26 = vpop.f32.mrb[134].mxu1 }
 0xd12   : > { %v10220_v0 = vpop.f32.mrb[135].mxu1  ;;  %v5116_v16 = vsel %vm1441_vm1, %v4899_v26, -inf }
 0xd13   : > { %5117 = vmax.xlane.f32.xlu1 %v5116_v16  ;;  %10236 = vmatmul.mubr.msk.bf16.vlgmr.msra.gmra.mrb[112].mxu0 %vm1441_vm1, %v5006_v7 }
 0xd14   : > { %10247 = vmatprep.mubr.msk.bf16.mxu0 %vm11601_vm0, %v14120_v40 }
 0xd17   : > { %v4947_v2 = vpop.f32.mrb[136].mxu1 }
 0xd18   : > { %v10225_v34 = vpop.f32.mrb[137].mxu1  ;;  %v5119_v17 = vsel %vm1441_vm1, %v4947_v2, -inf }
 0xd19   : > { %5120 = vmax.xlane.f32.xlu0 %v5119_v17  ;;  %v4950_v12 = vpop.f32.mrb[138].mxu1 }
 0xd1a   : > { %v10226_v49 = vpop.f32.mrb[139].mxu1  ;;  %v5122_v35 = vsel %vm1441_vm1, %v4950_v12, -inf }
 0xd1b   : > { %5123 = vmax.xlane.f32.xlu1 %v5122_v35 }
 0xd1f   : > { %v4998_v38 = vpop.f32.mrb[140].mxu1 }
 0xd20   : > { %v10231_v44 = vpop.f32.mrb[141].mxu1  ;;  %v5125_v15 = vsel %vm1441_vm1, %v4998_v38, -inf }
 0xd21   : > { %5126 = vmax.xlane.f32.xlu0 %v5125_v15  ;;  %v5001_v28 = vpop.f32.mrb[142].mxu1 }
 0xd22   : > { %v10232_v46 = vpop.f32.mrb[143].mxu1  ;;  %v5128_v48 = vsel %vm1441_vm1, %v5001_v28, -inf }
 0xd23   : > { %5129 = vmax.xlane.f32.xlu1 %v5128_v48 }
 0xd27   : > { %v13213_v8 = vpop.f32.mrb[144].mxu1 }
 0xd28   : > { %v10243_v57 = vpop.f32.mrb[145].mxu1 }
 0xd29   : > { %v13215_v33 = vpop.f32.mrb[146].mxu1 }
 0xd2a   : > { %v10244_v10 = vpop.f32.mrb[147].mxu1 }
 0xd96   : > { %v5109_v39 = vpop.xlane.xlu1 %5108 }
 0xd97   : > { %v5143_v42 = vsub.f32 %v4845_v51, %v5109_v39 }
 0xd98   : > { %v5112_v11 = vpop.xlane.xlu0 %5111 }
 0xd99   : > { %v5144_v29 = vsub.f32 %v4848_v6, %v5112_v11  ;;  %v5155_v53 = vmul.f32 1.442695, %v5143_v42 }
 0xd9b   : > { %v5157_v58 = vmul.f32 1.442695, %v5144_v29  ;;  %11082 = vpow2.f32 %v5155_v53 }
 0xd9d   : > { %11084 = vpow2.f32 %v5157_v58 }
 0xd9e   : > { %v5115_v45 = vpop.xlane.xlu0 %5114 }
 0xd9f   : > { %v5145_v13 = vsub.f32 %v4896_v3, %v5115_v45 }
 0xda0   : > { %v5118_v24 = vpop.xlane.xlu1 %5117 }
 0xda1   : > { %v5146_v25 = vsub.f32 %v4899_v26, %v5118_v24  ;;  %v5159_v61 = vmul.f32 1.442695, %v5145_v13 }
 0xda3   : > { %v5161_v30 = vmul.f32 1.442695, %v5146_v25  ;;  %11086 = vpow2.f32 %v5159_v61 }
 0xda5   : > { %11088 = vpow2.f32 %v5161_v30  ;;  %v13224_v34 = vpop.eup %11082 }
 0xda6   : > { %v5121_v56 = vpop.xlane.xlu0 %5120  ;;  %v5179_v35 = vsel %vm1441_vm1, %v13224_v34, 0.0 }
 0xda7   : > { %v5147_v19 = vsub.f32 %v4947_v2, %v5121_v56  ;;  %v5137_v2 = vsel %vm1441_vm1, %v13213_v8, -inf  ;;  %v13228_v49 = vpop.eup %11084 }
 0xda8   : > { %v5124_v55 = vpop.xlane.xlu1 %5123  ;;  %v5182_v44 = vsel %vm1441_vm1, %v13228_v49, 0.0 }
 0xda9   : > { %v5148_v9 = vsub.f32 %v4950_v12, %v5124_v55  ;;  %v5163_v60 = vmul.f32 1.442695, %v5147_v19  ;;  %v5140_v12 = vsel %vm1441_vm1, %v13215_v33, -inf }
 0xdab   : > { %v5165_v43 = vmul.f32 1.442695, %v5148_v9  ;;  %11090 = vpow2.f32 %v5163_v60 }
 0xdad   : > { %11092 = vpow2.f32 %v5165_v43 }
 0xdae   : > { %v5127_v37 = vpop.xlane.xlu0 %5126 }
 0xdaf   : > { %v5149_v51 = vsub.f32 %v4998_v38, %v5127_v37  ;;  %v13232_v38 = vpop.eup %11086 }
 0xdb0   : > { %v5130_v36 = vpop.xlane.xlu1 %5129  ;;  %v13236_v15 = vpop.eup %11088 }
 0xdb1   : > { %v5150_v5 = vsub.f32 %v5001_v28, %v5130_v36  ;;  %v5167_v16 = vmul.f32 1.442695, %v5149_v51  ;;  %v5185_v28 = vsel %vm1441_vm1, %v13232_v38, 0.0  ;;  %v5188_v48 = vsel %vm1441_vm1, %v13236_v15, 0.0 }
 0xdb3   : > { %v5169_v17 = vmul.f32 1.442695, %v5150_v5  ;;  %11094 = vpow2.f32 %v5167_v16 }
 0xdb5   : > { %11096 = vpow2.f32 %v5169_v17  ;;  %v13240_v46 = vpop.eup %11090 }
 0xdb6   : > { %v5191_v10 = vsel %vm1441_vm1, %v13240_v46, 0.0 }
 0xdb7   : > { %v13244_v57 = vpop.eup %11092 }
 0xdb8   : > { %v5194_v11 = vsel %vm1441_vm1, %v13244_v57, 0.0 }
 0xdbd   : > { %v13248_v39 = vpop.eup %11094 }
 0xdbe   : > { %v5197_v45 = vsel %vm1441_vm1, %v13248_v39, 0.0 }
 0xdbf   : > { %v13252_v42 = vpop.eup %11096 }
 0xdc0   : > { %v5200_v29 = vsel %vm1441_vm1, %v13252_v42, 0.0 }
 0xde6   : > { %v13217_v41 = vpop.f32.mrb[112].mxu0 }
 0xde7   : > { %v10237_v6 = vpop.f32.mrb[113].mxu0  ;;  %v5131_v3 = vsel %vm1441_vm1, %v13217_v41, -inf }
 0xde8   : > { %5132 = vmax.xlane.f32.xlu0 %v5131_v3  ;;  %v5052_v26 = vpop.f32.mrb[114].mxu0 }
 0xde9   : > { %v10238_v7 = vpop.f32.mrb[115].mxu0  ;;  %v5134_v0 = vsel %vm1441_vm1, %v5052_v26, -inf }
 0xdea   : > { %5135 = vmax.xlane.f32.xlu1 %v5134_v0 }
 0xdec   : > { %5138 = vmax.xlane.f32.xlu0 %v5137_v2 }
 0xdee   : > { %5141 = vmax.xlane.f32.xlu1 %v5140_v12 }
 0xdf0   : > { %5180 = vadd.xlane.f32.xlu0 %v5179_v35 }
 0xdf2   : > { %5183 = vadd.xlane.f32.xlu1 %v5182_v44 }
 0xdf4   : > { %5186 = vadd.xlane.f32.xlu0 %v5185_v28 }
 0xdf6   : > { %5189 = vadd.xlane.f32.xlu1 %v5188_v48 }
 0xdf8   : > { %5192 = vadd.xlane.f32.xlu0 %v5191_v10 }
 0xdfa   : > { %5195 = vadd.xlane.f32.xlu1 %v5194_v11 }
 0xdfc   : > { %5198 = vadd.xlane.f32.xlu0 %v5197_v45 }
 0xdfe   : > { %5201 = vadd.xlane.f32.xlu1 %v5200_v29 }
 0xe75   : > { %v5133_v24 = vpop.xlane.xlu0 %5132 }
 0xe77   : > { %v5136_v53 = vpop.xlane.xlu1 %5135 }
 0xe79   : > { %v5139_v13 = vpop.xlane.xlu0 %5138 }
 0xe7a   : > { %v5153_v56 = vsub.f32 %v13213_v8, %v5139_v13  ;;  %v5151_v8 = vsub.f32 %v13217_v41, %v5133_v24 }
 0xe7b   : > { %v5142_v58 = vpop.xlane.xlu1 %5141 }
 0xe7c   : > { %v5175_v25 = vmul.f32 1.442695, %v5153_v56  ;;  %v5154_v55 = vsub.f32 %v13215_v33, %v5142_v58  ;;  %v5152_v33 = vsub.f32 %v5052_v26, %v5136_v53  ;;  %v5171_v36 = vmul.f32 1.442695, %v5151_v8 }
 0xe7d   : > { %v5181_v41 = vpop.xlane.xlu0 %5180 }
 0xe7e   : > { %11098 = vpow2.f32 %v5175_v25  ;;  %v5177_v61 = vmul.f32 1.442695, %v5154_v55  ;;  %v5173_v60 = vmul.f32 1.442695, %v5152_v33 }
 0xe7f   : > { %v5184_v5 = vpop.xlane.xlu1 %5183 }
 0xe80   : > { %11100 = vpow2.f32 %v5177_v61 }
 0xe81   : > { %11102 = vpow2.f32 %v5171_v36  ;;  %v5187_v26 = vpop.xlane.xlu0 %5186 }
 0xe82   : > { %11104 = vpow2.f32 %v5173_v60 }
 0xe83   : > { %v5190_v7 = vpop.xlane.xlu1 %5189  ;;  %11106 = vrcp.f32 %v5184_v5 }
 0xe84   : > { %11108 = vrcp.f32 %v5181_v41  ;;  %v10862_v41 = vld [vmem:[%s14121_s0 + $0x20] sm:$0xff]  }
 0xe85   : > { %v5193_v0 = vpop.xlane.xlu0 %5192  ;;  %11110 = vrcp.f32 %v5190_v7 }
 0xe86   : > { %11112 = vrcp.f32 %v5187_v26 }
 0xe87   : > { %v5196_v16 = vpop.xlane.xlu1 %5195 }
 0xe88   : > { %v13260_v19 = vpop.eup %11098  ;;  %11114 = vrcp.f32 %v5196_v16 }
 0xe89   : > { %v5209_v37 = vsel %vm1441_vm1, %v13260_v19, 0.0  ;;  %v5199_v2 = vpop.xlane.xlu0 %5198  ;;  %11116 = vrcp.f32 %v5193_v0 }
 0xe8a   : > { %v13264_v30 = vpop.eup %11100  ;;  %5210 = vadd.xlane.f32.xlu0 %v5209_v37 }
 0xe8b   : > { %v5212_v9 = vsel %vm1441_vm1, %v13264_v30, 0.0  ;;  %v13277_v51 = vpop.eup %11102  ;;  %v5202_v17 = vpop.xlane.xlu1 %5201 }
 0xe8c   : > { %5213 = vadd.xlane.f32.xlu1 %v5212_v9  ;;  %v13279_v6 = vpop.eup %11104  ;;  %v5203_v3 = vsel %vm1441_vm1, %v13277_v51, 0.0  ;;  %11118 = vrcp.f32 %v5202_v17 }
 0xe8d   : > { %v5206_v43 = vsel %vm1441_vm1, %v13279_v6, 0.0  ;;  %v11107_v12 = vpop.eup %11106  ;;  %11120 = vrcp.f32 %v5199_v2 }
 0xe8e   : > { %v11109_v35 = vpop.eup %11108  ;;  %v5228_v48 = vmul.f32 %v11107_v12, %v13228_v49 }
 0xe8f   : > { %v11111_v28 = vpop.eup %11110  ;;  %v5227_v45 = vmul.f32 %v11109_v35, %v13224_v34 }
 0xe90   : > { %v11113_v11 = vpop.eup %11112  ;;  %v5230_v29 = vmul.f32 %v11111_v28, %v13236_v15 }
 0xe91   : > { %v5229_v53 = vmul.f32 %v11113_v11, %v13232_v38  ;;  %v5239_v56 = vpack.c.bf16 %v5228_v48, %v5227_v45 }
 0xe92   : > { %v11115_v58 = vpop.eup %11114 }
 0xe93   : > { %v11117_v25 = vpop.eup %11116  ;;  %v5240_v49 = vpack.c.bf16 %v5230_v29, %v5229_v53  ;;  %v5232_v34 = vmul.f32 %v11115_v58, %v13244_v57 }
 0xe94   : > { %v5231_v37 = vmul.f32 %v11117_v25, %v13240_v46 }
 0xe96   : > { %v11119_v55 = vpop.eup %11118  ;;  %v5241_v8 = vpack.c.bf16 %v5232_v34, %v5231_v37 }
 0xe97   : > { %v11121_v61 = vpop.eup %11120  ;;  %v5234_v9 = vmul.f32 %v11119_v55, %v13252_v42 }
 0xe98   : > { %v5233_v57 = vmul.f32 %v11121_v61, %v13248_v39 }
 0xe9a   : > { %v5242_v33 = vpack.c.bf16 %v5234_v9, %v5233_v57 }
 0xe9d   : > { %5292 = vrot.lane.b32.xlu1 %v12304_v63, %s11605_s12 }
 0xea0   : > { %5245 = vrot.lane.b32.xlu0 %v12312_v14, %s11605_s12 }
 0xea1   : > { %5339 = vrot.lane.b32.xlu1 %v12317_v22, %s11605_s12 }
 0xea4   : > { %5386 = vrot.lane.b32.xlu0 %v12314_v20, %s11605_s12 }
 0xec3   : > { %5204 = vadd.xlane.f32.xlu0 %v5203_v3 }
 0xec5   : > { %5207 = vadd.xlane.f32.xlu1 %v5206_v43 }
 0xed6   : > { %5433 = vrot.lane.b32.xlu1 %v12322_v32, %s11605_s12 }
 0xed9   : > { %5480 = vrot.lane.b32.xlu0 %v12320_v31, %s11605_s12 }
 0xeda   : > { %5655 = vrot.lane.b32.xlu1 %v12222_v62, %s11606_s19 }
 0xedd   : > { %5653 = vrot.lane.b32.xlu0 %v12231_v4, %s11606_s19 }
 0xede   : > { %5706 = vrot.lane.b32.xlu1 %v12219_v59, %s11606_s19 }
 0xee1   : > { %5704 = vrot.lane.b32.xlu0 %v12227_v1, %s11606_s19 }
 0xee2   : > { %5757 = vrot.lane.b32.xlu1 %v12244_v21, %s11606_s19 }
 0xee5   : > { %5808 = vrot.lane.b32.xlu0 %v12241_v18, %s11606_s19 }
 0xee6   : > { %5755 = vrot.lane.b32.xlu1 %v12253_v27, %s11606_s19 }
 0xee9   : > { %5859 = vrot.lane.b32.xlu0 %v12271_v50, %s11606_s19 }
 0xeea   : > { %5806 = vrot.lane.b32.xlu1 %v12249_v23, %s11606_s19 }
 0xeed   : > { %5910 = vrot.lane.b32.xlu0 %v12268_v47, %s11606_s19 }
 0xeee   : > { %5857 = vrot.lane.b32.xlu1 %v12282_v54, %s11606_s19 }
 0xef1   : > { %5908 = vrot.lane.b32.xlu0 %v12274_v52, %s11606_s19 }
 0xf17   : > { %v5211_v44 = vpop.xlane.xlu0 %5210 }
 0xf19   : > { %v5214_v10 = vpop.xlane.xlu1 %5213 }
 0xf1a   : > { %11122 = vrcp.f32 %v5214_v10 }
 0xf1b   : > { %v5246_v24 = vpop.permute.xlu0 %5245  ;;  %11124 = vrcp.f32 %v5211_v44 }
 0xf1c   : > { %10246 = vmatpush3.bf16.msra.mxu0 %v5246_v24 }
 0xf1d   : > { %v5293_v13 = vpop.permute.xlu1 %5292  ;;  %10257 = vmatprep.subr.bf16.mxu0 %v14120_v40 }
 0xf1e   : > { %10252 = vmatpush3.bf16.msra.mxu1 %v5293_v13 }
 0xf1f   : > { %10248 = vmatmul.mubr.msk.bf16.vlgmr.msra.gmra.mrb[116].mxu0 %vm1441_vm1, %v5239_v56  ;;  %10263 = vmatprep.subr.bf16.mxu1 %v14120_v40  ;;  %v5387_v15 = vpop.permute.xlu0 %5386 }
 0xf20   : > { %10259 = vmatprep.mubr.msk.bf16.mxu0 %vm11601_vm0, %v14120_v40 }
 0xf21   : > { %10254 = vmatmul.mubr.msk.bf16.vlgmr.msra.gmra.mrb[148].mxu1 %vm1441_vm1, %v5240_v49  ;;  %v5340_v38 = vpop.permute.xlu1 %5339 }
 0xf22   : > { %10258 = vmatpush3.bf16.msra.mxu0 %v5340_v38  ;;  %10264 = vmatpush3.bf16.msra.mxu1 %v5387_v15 }
 0xf23   : > { %10265 = vmatprep.mubr.msk.bf16.mxu1 %vm11601_vm0, %v14120_v40  ;;  %10275 = vmatprep.subr.bf16.mxu1 %v14120_v40 }
 0xf24   : > { %10269 = vmatprep.subr.bf16.mxu0 %v14120_v40  ;;  %v11123_v46 = vpop.eup %11122 }
 0xf25   : > { %v11125_v36 = vpop.eup %11124  ;;  %v5238_v39 = vmul.f32 %v11123_v46, %v13264_v30 }
 0xf26   : > { %v5237_v3 = vmul.f32 %v11125_v36, %v13260_v19 }
 0xf27   : > { %10260 = vmatmul.mubr.msk.bf16.vlgmr.msra.gmra.mrb[120].mxu0 %vm1441_vm1, %v5241_v8 }
 0xf28   : > { %10271 = vmatprep.mubr.msk.bf16.mxu0 %vm11601_vm0, %v14120_v40  ;;  %v5244_v26 = vpack.c.bf16 %v5238_v39, %v5237_v3 }
 0xf29   : > { %10266 = vmatmul.mubr.msk.bf16.vlgmr.msra.gmra.mrb[152].mxu1 %vm1441_vm1, %v5242_v33 }
 0xf2a   : > { %10277 = vmatprep.mubr.msk.bf16.mxu1 %vm11601_vm0, %v14120_v40 }
 0xf50   : > { %v5205_v42 = vpop.xlane.xlu0 %5204 }
 0xf51   : > { %11126 = vrcp.f32 %v5205_v42 }
 0xf52   : > { %v5208_v60 = vpop.xlane.xlu1 %5207 }
 0xf53   : > { %11128 = vrcp.f32 %v5208_v60 }
 0xf54   : > { %v5481_v43 = vpop.permute.xlu0 %5480 }
 0xf55   : > { %10276 = vmatpush3.bf16.msra.mxu1 %v5481_v43 }
 0xf56   : > { %v5434_v5 = vpop.permute.xlu1 %5433  ;;  %10295 = vmatprep.subr.bf16.mxu1 %v14120_v40 }
 0xf57   : > { %10270 = vmatpush3.bf16.msra.mxu0 %v5434_v5 }
 0xf58   : > { %10278 = vmatmul.mubr.msk.bf16.vlgmr.msra.gmra.mrb[156].mxu1 %vm1441_vm1, %v5244_v26  ;;  %10281 = vmatprep.subr.bf16.mxu0 %v10862_v41  ;;  %v5654_v17 = vpop.permute.xlu0 %5653 }
 0xf59   : > { %10297 = vmatprep.mubr.msk.bf16.mxu1 %vm11601_vm0, %v14120_v40 }
 0xf5a   : > { %v5656_v7 = vpop.permute.xlu1 %5655 }
 0xf5b   : > { %v11127_v30 = vpop.eup %11126  ;;  %v5661_v16 = vsel %vm1441_vm1, %v5656_v7, 0 }
 0xf5c   : > { %v5235_v19 = vmul.f32 %v11127_v30, %v13277_v51  ;;  %v5705_v28 = vpop.permute.xlu0 %5704 }
 0xf5d   : > { %v11129_v0 = vpop.eup %11128 }
 0xf5e   : > { %v5236_v2 = vmul.f32 %v11129_v0, %v13279_v6  ;;  %10296 = vmatpush3.bf16.xpose.msra.mxu1 %v5661_v16  ;;  %v5707_v35 = vpop.permute.xlu1 %5706 }
 0xf5f   : > { %10301 = vmatprep.subr.bf16.mxu1 %v14120_v40  ;;  %v5712_v44 = vsel %vm1441_vm1, %v5707_v35, 0 }
 0xf60   : > { %v5243_v12 = vpack.c.bf16 %v5236_v2, %v5235_v19  ;;  %v5809_v6 = vpop.permute.xlu0 %5808 }
 0xf61   : > { %v5814_v61 = vsel %vm1441_vm1, %v5809_v6, 0 }
 0xf62   : > { %10272 = vmatmul.mubr.msk.bf16.vlgmr.msra.gmra.mrb[124].mxu0 %vm1441_vm1, %v5243_v12  ;;  %v5758_v51 = vpop.permute.xlu1 %5757 }
 0xf63   : > { %10282 = vmatpush3.bf16.msra.mxu0 %v10862_v41  ;;  %v5763_v48 = vsel %vm1441_vm1, %v5758_v51, 0 }
 0xf64   : > { %10313 = vmatprep.subr.bf16.mxu0 %v14120_v40  ;;  %v5860_v11 = vpop.permute.xlu0 %5859 }
 0xf65   : > { %10298 = vmatmul.mubr.msk.bf16.vlgmr.msra.gmra.mrb[160].mxu1 %vm1441_vm1, %v5654_v17  ;;  %v5865_v45 = vsel %vm1441_vm1, %v5860_v11, 0 }
 0xf66   : > { %10302 = vmatpush3.bf16.xpose.msra.mxu1 %v5712_v44  ;;  %10303 = vmatprep.mubr.msk.bf16.mxu1 %vm11601_vm0, %v14120_v40  ;;  %v5756_v10 = vpop.permute.xlu1 %5755 }
 0xf67   : > { %10307 = vmatprep.subr.bf16.mxu1 %v14120_v40 }
 0xf68   : > { %v5911_v51 = vpop.permute.xlu0 %5910 }
 0xf6a   : > { %v13362_v29 = vpop.permute.xlu1 %5806 }
 0xf6d   : > { %10304 = vmatmul.mubr.msk.bf16.vlgmr.msra.gmra.mrb[164].mxu1 %vm1441_vm1, %v5705_v28 }
 0xf6e   : > { %10308 = vmatpush3.bf16.xpose.msra.mxu1 %v5763_v48  ;;  %10309 = vmatprep.mubr.msk.bf16.mxu1 %vm11601_vm0, %v14120_v40  ;;  %v5858_v24 = vpop.permute.xlu1 %5857 }
 0xf6f   : > { %10319 = vmatprep.subr.bf16.mxu1 %v14120_v40 }
 0xf75   : > { %10310 = vmatmul.mubr.msk.bf16.vlgmr.msra.gmra.mrb[168].mxu1 %vm1441_vm1, %v5756_v10 }
 0xf76   : > { %10320 = vmatpush3.bf16.xpose.msra.mxu1 %v5865_v45  ;;  %10321 = vmatprep.mubr.msk.bf16.mxu1 %vm11601_vm0, %v14120_v40  ;;  %v5916_v45 = vsel %vm1441_vm1, %v5911_v51, 0 }
 0xf77   : > { %10331 = vmatprep.subr.bf16.mxu1 %v14120_v40 }
 0xf7d   : > { %10322 = vmatmul.mubr.msk.bf16.vlgmr.msra.gmra.mrb[172].mxu1 %vm1441_vm1, %v5858_v24 }
 0xf7e   : > { %10333 = vmatprep.mubr.msk.bf16.mxu1 %vm11601_vm0, %v14120_v40 }
 0xff2   : > { %v5285_v53 = vpop.f32.mrb[116].mxu0 }
 0xff3   : > { %v10249_v13 = vpop.f32.mrb[117].mxu0 }
 0xff4   : > { %v5288_v56 = vpop.f32.mrb[118].mxu0  ;;  %v5332_v58 = vpop.f32.mrb[148].mxu1 }
 0xff5   : > { %v5527_v25 = vpack.c.bf16 %v5288_v56, %v5285_v53  ;;  %v10250_v49 = vpop.f32.mrb[119].mxu0  ;;  %v10255_v55 = vpop.f32.mrb[149].mxu1 }
 0xff6   : > { %v5335_v34 = vpop.f32.mrb[150].mxu1 }
 0xff7   : > { %v5528_v15 = vpack.c.bf16 %v5335_v34, %v5332_v58  ;;  %v10256_v38 = vpop.f32.mrb[151].mxu1  ;;  %10283 = vmatprep.mubr.msk.bf16.mxu0 %vm1441_vm1, %v5527_v25  ;;  %v5909_v25 = vpop.permute.xlu0 %5908 }
 0xff9   : > { %10284 = vmatmul.mubr.msk.bf16.vlgmr.msra.gmra.mrb[68].mxu0 %vm1441_vm1, %v5528_v15 }
 0xffa   : > { %10314 = vmatpush3.bf16.xpose.msra.mxu0 %v5814_v61  ;;  %v5379_v37 = vpop.f32.mrb[120].mxu0 }
 0xffb   : > { %v10261_v9 = vpop.f32.mrb[121].mxu0  ;;  %10325 = vmatprep.subr.bf16.mxu0 %v14120_v40 }
 0xffc   : > { %v5382_v57 = vpop.f32.mrb[122].mxu0  ;;  %v5426_v8 = vpop.f32.mrb[152].mxu1 }
 0xffd   : > { %v5529_v33 = vpack.c.bf16 %v5382_v57, %v5379_v37  ;;  %v10262_v46 = vpop.f32.mrb[123].mxu0  ;;  %v10267_v42 = vpop.f32.mrb[153].mxu1 }
 0xffe   : > { %v5429_v36 = vpop.f32.mrb[154].mxu1 }
 0xfff   : > { %v5530_v39 = vpack.c.bf16 %v5429_v36, %v5426_v8  ;;  %v10268_v60 = vpop.f32.mrb[155].mxu1  ;;  %10287 = vmatprep.mubr.msk.bf16.mxu0 %vm1441_vm1, %v5529_v33 }
0x1001   : > { %10288 = vmatmul.mubr.msk.bf16.gmra.mrb[72].mxu0 %vm1441_vm1, %v5530_v39 }
0x102b   : > { %v5520_v3 = vpop.f32.mrb[156].mxu1 }
0x102c   : > { %v10279_v43 = vpop.f32.mrb[157].mxu1 }
0x102d   : > { %v5523_v41 = vpop.f32.mrb[158].mxu1 }
0x102e   : > { %v5532_v5 = vpack.c.bf16 %v5523_v41, %v5520_v3  ;;  %v10280_v26 = vpop.f32.mrb[159].mxu1 }
0x1035   : > { %v5473_v7 = vpop.f32.mrb[124].mxu0 }
0x1036   : > { %v10273_v30 = vpop.f32.mrb[125].mxu0 }
0x1037   : > { %v5476_v0 = vpop.f32.mrb[126].mxu0 }
0x1038   : > { %v5531_v16 = vpack.c.bf16 %v5476_v0, %v5473_v7  ;;  %v10274_v19 = vpop.f32.mrb[127].mxu0  ;;  %v5697_v2 = vpop.f32.mrb[160].mxu1 }
0x1039   : > { %v10299_v17 = vpop.f32.mrb[161].mxu1  ;;  %v5959_v12 = vsel %vm1441_vm1, %v5697_v2, -inf }
0x103a   : > { %5960 = vmax.xlane.f32.xlu1 %v5959_v12  ;;  %10291 = vmatprep.mubr.msk.bf16.mxu0 %vm1441_vm1, %v5531_v16  ;;  %v5700_v35 = vpop.f32.mrb[162].mxu1 }
0x103b   : > { %10292 = vmatmul.mubr.msk.bf16.gmra.mrb[76].mxu0 %vm1441_vm1, %v5532_v5  ;;  %v10300_v44 = vpop.f32.mrb[163].mxu1  ;;  %v5962_v28 = vsel %vm1441_vm1, %v5700_v35, -inf }
0x103c   : > { %5963 = vmax.xlane.f32.xlu0 %v5962_v28  ;;  %10315 = vmatprep.mubr.msk.bf16.mxu0 %vm11601_vm0, %v14120_v40 }
0x1040   : > { %v5748_v6 = vpop.f32.mrb[164].mxu1 }
0x1041   : > { %v10305_v48 = vpop.f32.mrb[165].mxu1  ;;  %v5965_v10 = vsel %vm1441_vm1, %v5748_v6, -inf }
0x1042   : > { %5966 = vmax.xlane.f32.xlu0 %v5965_v10  ;;  %v5751_v11 = vpop.f32.mrb[166].mxu1 }
0x1043   : > { %v10306_v24 = vpop.f32.mrb[167].mxu1  ;;  %10316 = vmatmul.mubr.msk.bf16.vlgmr.msra.gmra.mrb[128].mxu0 %vm1441_vm1, %v13362_v29  ;;  %v5968_v53 = vsel %vm1441_vm1, %v5751_v11, -inf }
0x1044   : > { %10326 = vmatpush3.bf16.xpose.msra.mxu0 %v5916_v45  ;;  %5969 = vmax.xlane.f32.xlu1 %v5968_v53 }
0x1045   : > { %10327 = vmatprep.mubr.msk.bf16.mxu0 %vm11601_vm0, %v14120_v40  ;;  %10337 = vmatprep.subr.bf16.mxu0 %v14120_v40 }
0x1048   : > { %v5799_v13 = vpop.f32.mrb[168].mxu1 }
0x1049   : > { %v10311_v56 = vpop.f32.mrb[169].mxu1  ;;  %v5971_v58 = vsel %vm1441_vm1, %v5799_v13, -inf }
0x104a   : > { %5972 = vmax.xlane.f32.xlu0 %v5971_v58  ;;  %v5802_v49 = vpop.f32.mrb[170].mxu1 }
0x104b   : > { %v10312_v55 = vpop.f32.mrb[171].mxu1  ;;  %10328 = vmatmul.mubr.msk.bf16.vlgmr.msra.gmra.mrb[132].mxu0 %vm1441_vm1, %v5909_v25  ;;  %v5974_v29 = vsel %vm1441_vm1, %v5802_v49, -inf }
0x104c   : > { %5975 = vmax.xlane.f32.xlu1 %v5974_v29  ;;  %10339 = vmatprep.mubr.msk.bf16.mxu0 %vm11601_vm0, %v14120_v40 }
0x1050   : > { %v13395_v34 = vpop.f32.mrb[172].mxu1 }
0x1051   : > { %v10323_v15 = vpop.f32.mrb[173].mxu1 }
0x1052   : > { %v13397_v38 = vpop.f32.mrb[174].mxu1 }
0x1053   : > { %v10324_v61 = vpop.f32.mrb[175].mxu1  ;;  %v5986_v28 = vsel %vm1441_vm1, %v13397_v38, -inf }
0x10c7   : > { %v5961_v37 = vpop.xlane.xlu1 %5960 }
0x10c8   : > { %v5995_v57 = vsub.f32 %v5697_v2, %v5961_v37 }
0x10c9   : > { %v5964_v9 = vpop.xlane.xlu0 %5963 }
0x10ca   : > { %v5996_v33 = vsub.f32 %v5700_v35, %v5964_v9  ;;  %v6007_v42 = vmul.f32 1.442695, %v5995_v57  ;;  %v5983_v35 = vsel %vm1441_vm1, %v13395_v34, -inf }
0x10cc   : > { %v6009_v60 = vmul.f32 1.442695, %v5996_v33  ;;  %11130 = vpow2.f32 %v6007_v42 }
0x10ce   : > { %11132 = vpow2.f32 %v6009_v60 }
0x10cf   : > { %v5967_v8 = vpop.xlane.xlu0 %5966 }
0x10d0   : > { %v5997_v36 = vsub.f32 %v5748_v6, %v5967_v8 }
0x10d1   : > { %v5970_v46 = vpop.xlane.xlu1 %5969 }
0x10d2   : > { %v5998_v3 = vsub.f32 %v5751_v11, %v5970_v46  ;;  %v6011_v41 = vmul.f32 1.442695, %v5997_v36 }
0x10d4   : > { %v6013_v0 = vmul.f32 1.442695, %v5998_v3  ;;  %11134 = vpow2.f32 %v6011_v41 }
0x10d6   : > { %11136 = vpow2.f32 %v6013_v0  ;;  %v13412_v10 = vpop.eup %11130 }
0x10d7   : > { %v5973_v39 = vpop.xlane.xlu0 %5972 }
0x10d8   : > { %v5999_v5 = vsub.f32 %v5799_v13, %v5973_v39  ;;  %v13415_v53 = vpop.eup %11132  ;;  %v6031_v13 = vsel %vm1441_vm1, %v13412_v10, 0.0 }
0x10d9   : > { %v5976_v43 = vpop.xlane.xlu1 %5975  ;;  %v6034_v58 = vsel %vm1441_vm1, %v13415_v53, 0.0 }
0x10da   : > { %v6000_v16 = vsub.f32 %v5802_v49, %v5976_v43  ;;  %v6015_v12 = vmul.f32 1.442695, %v5999_v5 }
0x10dc   : > { %v6017_v44 = vmul.f32 1.442695, %v6000_v16  ;;  %11138 = vpow2.f32 %v6015_v12 }
0x10de   : > { %11140 = vpow2.f32 %v6017_v44  ;;  %v13419_v56 = vpop.eup %11134 }
0x10df   : > { %v6037_v49 = vsel %vm1441_vm1, %v13419_v56, 0.0 }
0x10e0   : > { %v13423_v25 = vpop.eup %11136 }
0x10e1   : > { %v6040_v29 = vsel %vm1441_vm1, %v13423_v25, 0.0 }
0x10e6   : > { %v13427_v55 = vpop.eup %11138 }
0x10e7   : > { %v6043_v61 = vsel %vm1441_vm1, %v13427_v55, 0.0 }
0x10e8   : > { %v13431_v15 = vpop.eup %11140 }
0x10e9   : > { %v6046_v37 = vsel %vm1441_vm1, %v13431_v15, 0.0 }
0x1116   : > { %v13399_v26 = vpop.f32.mrb[128].mxu0 }
0x1117   : > { %v10317_v7 = vpop.f32.mrb[129].mxu0  ;;  %v5977_v30 = vsel %vm1441_vm1, %v13399_v26, -inf }
0x1118   : > { %5978 = vmax.xlane.f32.xlu0 %v5977_v30  ;;  %v13403_v19 = vpop.f32.mrb[130].mxu0 }
0x1119   : > { %v10318_v2 = vpop.f32.mrb[131].mxu0  ;;  %v5980_v17 = vsel %vm1441_vm1, %v13403_v19, -inf }
0x111a   : > { %5981 = vmax.xlane.f32.xlu1 %v5980_v17 }
0x111c   : > { %5984 = vmax.xlane.f32.xlu0 %v5983_v35 }
0x111e   : > { %5987 = vmax.xlane.f32.xlu1 %v5986_v28  ;;  %v5952_v51 = vpop.f32.mrb[132].mxu0 }
0x111f   : > { %v10329_v6 = vpop.f32.mrb[133].mxu0  ;;  %v5989_v48 = vsel %vm1441_vm1, %v5952_v51, -inf }
0x1120   : > { %5990 = vmax.xlane.f32.xlu0 %v5989_v48  ;;  %v5955_v11 = vpop.f32.mrb[134].mxu0 }
0x1121   : > { %v10330_v45 = vpop.f32.mrb[135].mxu0  ;;  %v5992_v24 = vsel %vm1441_vm1, %v5955_v11, -inf }
0x1122   : > { %5993 = vmax.xlane.f32.xlu1 %v5992_v24 }
0x1124   : > { %6032 = vadd.xlane.f32.xlu0 %v6031_v13 }
0x1126   : > { %6035 = vadd.xlane.f32.xlu1 %v6034_v58 }
0x1128   : > { %6038 = vadd.xlane.f32.xlu0 %v6037_v49 }
0x112a   : > { %6041 = vadd.xlane.f32.xlu1 %v6040_v29 }
0x112c   : > { %6044 = vadd.xlane.f32.xlu0 %v6043_v61 }
0x112e   : > { %6047 = vadd.xlane.f32.xlu1 %v6046_v37 }
0x11a5   : > { %v5979_v9 = vpop.xlane.xlu0 %5978 }
0x11a7   : > { %v5982_v57 = vpop.xlane.xlu1 %5981 }
0x11a8   : > { %v6002_v5 = vsub.f32 %v13403_v19, %v5982_v57 }
0x11a9   : > { %v5985_v8 = vpop.xlane.xlu0 %5984 }
0x11aa   : > { %v6003_v33 = vsub.f32 %v13395_v34, %v5985_v8  ;;  %v6001_v34 = vsub.f32 %v13399_v26, %v5979_v9  ;;  %v6021_v16 = vmul.f32 1.442695, %v6002_v5 }
0x11ab   : > { %v5988_v46 = vpop.xlane.xlu1 %5987 }
0x11ac   : > { %v6023_v42 = vmul.f32 1.442695, %v6003_v33  ;;  %v6004_v36 = vsub.f32 %v13397_v38, %v5988_v46  ;;  %v6019_v30 = vmul.f32 1.442695, %v6001_v34 }
0x11ad   : > { %v5991_v38 = vpop.xlane.xlu0 %5990 }
0x11ae   : > { %11142 = vpow2.f32 %v6023_v42  ;;  %v6025_v39 = vmul.f32 1.442695, %v6004_v36  ;;  %v6005_v0 = vsub.f32 %v5952_v51, %v5991_v38 }
0x11af   : > { %v5994_v7 = vpop.xlane.xlu1 %5993 }
0x11b0   : > { %11144 = vpow2.f32 %v6025_v39  ;;  %v6006_v2 = vsub.f32 %v5955_v11, %v5994_v7  ;;  %v6027_v17 = vmul.f32 1.442695, %v6005_v0 }
0x11b1   : > { %11146 = vpow2.f32 %v6019_v30  ;;  %v6033_v45 = vpop.xlane.xlu0 %6032 }
0x11b2   : > { %11148 = vpow2.f32 %v6021_v16  ;;  %v6029_v12 = vmul.f32 1.442695, %v6006_v2 }
0x11b3   : > { %11150 = vpow2.f32 %v6027_v17  ;;  %v6036_v11 = vpop.xlane.xlu1 %6035 }
0x11b4   : > { %11152 = vpow2.f32 %v6029_v12 }
0x11b5   : > { %11154 = vrcp.f32 %v6036_v11  ;;  %v6039_v13 = vpop.xlane.xlu0 %6038 }
0x11b6   : > { %11156 = vrcp.f32 %v6033_v45 }
0x11b7   : > { %v6042_v24 = vpop.xlane.xlu1 %6041 }
0x11b8   : > { %v13439_v60 = vpop.eup %11142  ;;  %11158 = vrcp.f32 %v6042_v24 }
0x11b9   : > { %v6055_v3 = vsel %vm1441_vm1, %v13439_v60, 0.0  ;;  %11160 = vrcp.f32 %v6039_v13  ;;  %v6045_v49 = vpop.xlane.xlu0 %6044  ;;  %v10863_v13 = vld [vmem:[%s14121_s0 + $0x28] sm:$0xff]  }
0x11ba   : > { %v13443_v43 = vpop.eup %11144  ;;  %6056 = vadd.xlane.f32.xlu0 %v6055_v3 }
0x11bb   : > { %v6058_v41 = vsel %vm1441_vm1, %v13443_v43, 0.0  ;;  %v13457_v35 = vpop.eup %11146  ;;  %v6048_v58 = vpop.xlane.xlu1 %6047 }
0x11bc   : > { %6059 = vadd.xlane.f32.xlu1 %v6058_v41  ;;  %v13459_v44 = vpop.eup %11148  ;;  %v6049_v26 = vsel %vm1441_vm1, %v13457_v35, 0.0  ;;  %11162 = vrcp.f32 %v6048_v58 }
0x11bd   : > { %v13463_v28 = vpop.eup %11150  ;;  %v6052_v19 = vsel %vm1441_vm1, %v13459_v44, 0.0  ;;  %11164 = vrcp.f32 %v6045_v49 }
0x11be   : > { %v13467_v51 = vpop.eup %11152  ;;  %v6061_v6 = vsel %vm1441_vm1, %v13463_v28, 0.0 }
0x11bf   : > { %v6064_v48 = vsel %vm1441_vm1, %v13467_v51, 0.0  ;;  %v11155_v29 = vpop.eup %11154 }
0x11c0   : > { %v11157_v61 = vpop.eup %11156  ;;  %v6080_v57 = vmul.f32 %v11155_v29, %v13415_v53 }
0x11c1   : > { %v6079_v46 = vmul.f32 %v11157_v61, %v13412_v10 }
0x11c2   : > { %v11159_v9 = vpop.eup %11158 }
0x11c3   : > { %v11161_v33 = vpop.eup %11160  ;;  %v6082_v42 = vmul.f32 %v11159_v9, %v13423_v25  ;;  %v6091_v41 = vpack.c.bf16 %v6080_v57, %v6079_v46 }
0x11c4   : > { %v6081_v39 = vmul.f32 %v11161_v33, %v13419_v56 }
0x11c6   : > { %v11163_v34 = vpop.eup %11162  ;;  %v6092_v38 = vpack.c.bf16 %v6082_v42, %v6081_v39 }
0x11c7   : > { %v11165_v53 = vpop.eup %11164  ;;  %v6084_v10 = vmul.f32 %v11163_v34, %v13431_v15 }
0x11c8   : > { %v6083_v5 = vmul.f32 %v11165_v53, %v13427_v55 }
0x11ca   : > { %v6093_v7 = vpack.c.bf16 %v6084_v10, %v6083_v5 }
0x11cd   : > { %6144 = vrot.lane.b32.xlu1 %v12304_v63, %s11606_s19 }
0x11d0   : > { %6097 = vrot.lane.b32.xlu0 %v12312_v14, %s11606_s19 }
0x11d1   : > { %6191 = vrot.lane.b32.xlu1 %v12317_v22, %s11606_s19 }
0x11d4   : > { %6238 = vrot.lane.b32.xlu0 %v12314_v20, %s11606_s19 }
0x11f3   : > { %6050 = vadd.xlane.f32.xlu0 %v6049_v26 }
0x11f5   : > { %6053 = vadd.xlane.f32.xlu1 %v6052_v19 }
0x11f7   : > { %6062 = vadd.xlane.f32.xlu0 %v6061_v6 }
0x11f9   : > { %6065 = vadd.xlane.f32.xlu1 %v6064_v48 }
0x120a   : > { %6285 = vrot.lane.b32.xlu1 %v12322_v32, %s11606_s19 }
0x120d   : > { %6332 = vrot.lane.b32.xlu0 %v12320_v31, %s11606_s19  ;;  %s14144_s19 = sld [smem:[#allocation57_spill]] (!%p9435_p9) }
0x120e   : > { %6507 = vrot.lane.b32.xlu1 %v12222_v62, %s11607_s28 }
0x1211   : > { %6505 = vrot.lane.b32.xlu0 %v12231_v4, %s11607_s28 }
0x1212   : > { %6558 = vrot.lane.b32.xlu1 %v12219_v59, %s11607_s28 }
0x1215   : > { %6556 = vrot.lane.b32.xlu0 %v12227_v1, %s11607_s28 }
0x1216   : > { %6609 = vrot.lane.b32.xlu1 %v12244_v21, %s11607_s28 }
0x1219   : > { %6607 = vrot.lane.b32.xlu0 %v12253_v27, %s11607_s28 }
0x121a   : > { %6660 = vrot.lane.b32.xlu1 %v12241_v18, %s11607_s28 }
0x121d   : > { %6711 = vrot.lane.b32.xlu0 %v12271_v50, %s11607_s28 }
0x121e   : > { %6658 = vrot.lane.b32.xlu1 %v12249_v23, %s11607_s28 }
0x1221   : > { %6762 = vrot.lane.b32.xlu0 %v12268_v47, %s11607_s28 }
0x1222   : > { %6709 = vrot.lane.b32.xlu1 %v12282_v54, %s11607_s28 }
0x1225   : > { %6760 = vrot.lane.b32.xlu0 %v12274_v52, %s11607_s28 }
0x1247   : > { %v6057_v37 = vpop.xlane.xlu0 %6056 }
0x1249   : > { %v6060_v8 = vpop.xlane.xlu1 %6059 }
0x124a   : > { %11166 = vrcp.f32 %v6060_v8 }
0x124b   : > { %v6098_v36 = vpop.permute.xlu0 %6097  ;;  %11168 = vrcp.f32 %v6057_v37 }
0x124c   : > { %10332 = vmatpush3.bf16.msra.mxu1 %v6098_v36 }
0x124d   : > { %v6145_v3 = vpop.permute.xlu1 %6144  ;;  %10343 = vmatprep.subr.bf16.mxu1 %v14120_v40 }
0x124e   : > { %10338 = vmatpush3.bf16.msra.mxu0 %v6145_v3 }
0x124f   : > { %10334 = vmatmul.mubr.msk.bf16.vlgmr.msra.gmra.mrb[176].mxu1 %vm1441_vm1, %v6091_v41  ;;  %10349 = vmatprep.subr.bf16.mxu0 %v14120_v40  ;;  %v6239_v25 = vpop.permute.xlu0 %6238 }
0x1250   : > { %10345 = vmatprep.mubr.msk.bf16.mxu1 %vm11601_vm0, %v14120_v40 }
0x1251   : > { %10340 = vmatmul.mubr.msk.bf16.vlgmr.msra.gmra.mrb[136].mxu0 %vm1441_vm1, %v6092_v38  ;;  %v6192_v56 = vpop.permute.xlu1 %6191 }
0x1252   : > { %10344 = vmatpush3.bf16.msra.mxu1 %v6192_v56  ;;  %10350 = vmatpush3.bf16.msra.mxu0 %v6239_v25 }
0x1253   : > { %10355 = vmatprep.subr.bf16.mxu1 %v14120_v40  ;;  %10351 = vmatprep.mubr.msk.bf16.mxu0 %vm11601_vm0, %v14120_v40 }
0x1254   : > { %10361 = vmatprep.subr.bf16.mxu0 %v14120_v40  ;;  %v11167_v55 = vpop.eup %11166 }
0x1255   : > { %v11169_v2 = vpop.eup %11168  ;;  %v6088_v17 = vmul.f32 %v11167_v55, %v13443_v43 }
0x1256   : > { %v6087_v12 = vmul.f32 %v11169_v2, %v13439_v60 }
0x1257   : > { %10346 = vmatmul.mubr.msk.bf16.vlgmr.msra.gmra.mrb[180].mxu1 %vm1441_vm1, %v6093_v7 }
0x1258   : > { %10357 = vmatprep.mubr.msk.bf16.mxu1 %vm11601_vm0, %v14120_v40  ;;  %v6095_v6 = vpack.c.bf16 %v6088_v17, %v6087_v12 }
0x1280   : > { %v6051_v15 = vpop.xlane.xlu0 %6050 }
0x1281   : > { %11170 = vrcp.f32 %v6051_v15 }
0x1282   : > { %v6054_v30 = vpop.xlane.xlu1 %6053 }
0x1283   : > { %11172 = vrcp.f32 %v6054_v30 }
0x1284   : > { %v6063_v0 = vpop.xlane.xlu0 %6062 }
0x1286   : > { %v6066_v16 = vpop.xlane.xlu1 %6065 }
0x1287   : > { %11174 = vrcp.f32 %v6066_v16 }
0x1288   : > { %11176 = vrcp.f32 %v6063_v0  ;;  %v6333_v58 = vpop.permute.xlu0 %6332 }
0x128a   : > { %v6286_v26 = vpop.permute.xlu1 %6285 }
0x128b   : > { %v11171_v19 = vpop.eup %11170  ;;  %10356 = vmatpush3.bf16.msra.mxu1 %v6286_v26 }
0x128c   : > { %10381 = vmatprep.subr.bf16.mxu1 %v14120_v40  ;;  %v6085_v11 = vmul.f32 %v11171_v19, %v13457_v35  ;;  %v6506_v61 = vpop.permute.xlu0 %6505 }
0x128d   : > { %v11173_v48 = vpop.eup %11172 }
0x128e   : > { %v6086_v45 = vmul.f32 %v11173_v48, %v13459_v44  ;;  %10358 = vmatmul.mubr.msk.bf16.vlgmr.msra.gmra.mrb[184].mxu1 %vm1441_vm1, %v6095_v6  ;;  %v6508_v43 = vpop.permute.xlu1 %6507 }
0x128f   : > { %10383 = vmatprep.mubr.msk.bf16.mxu1 %vm11601_vm0, %v14120_v40  ;;  %v6513_v29 = vsel %vm1441_vm1, %v6508_v43, 0 }
0x1290   : > { %v6094_v24 = vpack.c.bf16 %v6086_v45, %v6085_v11 }
0x1291   : > { %v11175_v60 = vpop.eup %11174 }
0x1292   : > { %10352 = vmatmul.mubr.msk.bf16.vlgmr.msra.gmra.mrb[140].mxu0 %vm1441_vm1, %v6094_v24  ;;  %v11177_v49 = vpop.eup %11176  ;;  %v6090_v35 = vmul.f32 %v11175_v60, %v13467_v51  ;;  %v6559_v37 = vpop.permute.xlu1 %6558 }
0x1293   : > { %10362 = vmatpush3.bf16.msra.mxu0 %v6333_v58  ;;  %10363 = vmatprep.mubr.msk.bf16.mxu0 %vm11601_vm0, %v14120_v40  ;;  %v6089_v44 = vmul.f32 %v11177_v49, %v13463_v28  ;;  %v6564_v57 = vsel %vm1441_vm1, %v6559_v37, 0  ;;  %v6557_v51 = vpop.permute.xlu0 %6556 }
0x1294   : > { %10382 = vmatpush3.bf16.xpose.msra.mxu1 %v6513_v29  ;;  %10367 = vmatprep.subr.bf16.mxu0 %v10863_v13 }
0x1295   : > { %10387 = vmatprep.subr.bf16.mxu1 %v14120_v40  ;;  %v6096_v9 = vpack.c.bf16 %v6090_v35, %v6089_v44 }
0x1296   : > { %v6610_v28 = vpop.permute.xlu1 %6609 }
0x1297   : > { %v6615_v8 = vsel %vm1441_vm1, %v6610_v28, 0  ;;  %v6608_v33 = vpop.permute.xlu0 %6607 }
0x129a   : > { %10364 = vmatmul.mubr.msk.bf16.vlgmr.msra.gmra.mrb[144].mxu0 %vm1441_vm1, %v6096_v9  ;;  %v6661_v46 = vpop.permute.xlu1 %6660 }
0x129b   : > { %10384 = vmatmul.mubr.msk.bf16.vlgmr.msra.gmra.mrb[188].mxu1 %vm1441_vm1, %v6506_v61  ;;  %10368 = vmatpush3.bf16.msra.mxu0 %v10863_v13  ;;  %v6712_v42 = vpop.permute.xlu0 %6711  ;;  %v6666_v36 = vsel %vm1441_vm1, %v6661_v46, 0 }
0x129c   : > { %10388 = vmatpush3.bf16.xpose.msra.mxu1 %v6564_v57  ;;  %10389 = vmatprep.mubr.msk.bf16.mxu1 %vm11601_vm0, %v14120_v40  ;;  %v6717_v0 = vsel %vm1441_vm1, %v6712_v42, 0 }
0x129d   : > { %10393 = vmatprep.subr.bf16.mxu1 %v14120_v40  ;;  %10405 = vmatprep.subr.bf16.mxu0 %v14120_v40 }
0x129e   : > { %v6659_v3 = vpop.permute.xlu1 %6658 }
0x129f   : > { %v6763_v39 = vpop.permute.xlu0 %6762 }
0x12a0   : > { %v6768_v41 = vsel %vm1441_vm1, %v6763_v39, 0 }
0x12a2   : > { %v6710_v39 = vpop.permute.xlu1 %6709 }
0x12a3   : > { %10390 = vmatmul.mubr.msk.bf16.vlgmr.msra.gmra.mrb[192].mxu1 %vm1441_vm1, %v6557_v51  ;;  %v6761_v34 = vpop.permute.xlu0 %6760 }
0x12a4   : > { %10394 = vmatpush3.bf16.xpose.msra.mxu1 %v6615_v8  ;;  %10395 = vmatprep.mubr.msk.bf16.mxu1 %vm11601_vm0, %v14120_v40 }
0x12a5   : > { %10399 = vmatprep.subr.bf16.mxu1 %v14120_v40 }
0x12ab   : > { %10396 = vmatmul.mubr.msk.bf16.vlgmr.msra.gmra.mrb[196].mxu1 %vm1441_vm1, %v6608_v33 }
0x12ac   : > { %10400 = vmatpush3.bf16.xpose.msra.mxu1 %v6666_v36  ;;  %10401 = vmatprep.mubr.msk.bf16.mxu1 %vm11601_vm0, %v14120_v40 }
0x12ad   : > { %10411 = vmatprep.subr.bf16.mxu1 %v14120_v40 }
0x12b3   : > { %10402 = vmatmul.mubr.msk.bf16.vlgmr.msra.gmra.mrb[200].mxu1 %vm1441_vm1, %v6659_v3 }
0x12b4   : > { %10412 = vmatpush3.bf16.xpose.msra.mxu1 %v6768_v41  ;;  %10413 = vmatprep.mubr.msk.bf16.mxu1 %vm11601_vm0, %v14120_v40 }
0x12b5   : > { %10423 = vmatprep.subr.bf16.mxu1 %v14120_v40 }
0x12bb   : > { %10414 = vmatmul.mubr.msk.bf16.vlgmr.msra.gmra.mrb[204].mxu1 %vm1441_vm1, %v6761_v34 }
0x12bc   : > { %10425 = vmatprep.mubr.msk.bf16.mxu1 %vm11601_vm0, %v14120_v40 }
0x1322   : > { %v6137_v38 = vpop.f32.mrb[176].mxu1 }
0x1323   : > { %v10335_v53 = vpop.f32.mrb[177].mxu1 }
0x1324   : > { %v6140_v10 = vpop.f32.mrb[178].mxu1  ;;  %v6184_v25 = vpop.f32.mrb[136].mxu0 }
0x1325   : > { %v6379_v56 = vpack.c.bf16 %v6140_v10, %v6137_v38  ;;  %v10336_v5 = vpop.f32.mrb[179].mxu1  ;;  %v10341_v7 = vpop.f32.mrb[137].mxu0 }
0x1326   : > { %v6187_v15 = vpop.f32.mrb[138].mxu0 }
0x1327   : > { %v6380_v30 = vpack.c.bf16 %v6187_v15, %v6184_v25  ;;  %v10342_v55 = vpop.f32.mrb[139].mxu0  ;;  %10369 = vmatprep.mubr.msk.bf16.mxu0 %vm1441_vm1, %v6379_v56 }
0x1329   : > { %10370 = vmatmul.mubr.msk.bf16.vlgmr.msra.gmra.mrb[68].mxu0 %vm1441_vm1, %v6380_v30 }
0x132a   : > { %10406 = vmatpush3.bf16.xpose.msra.mxu0 %v6717_v0  ;;  %v6231_v16 = vpop.f32.mrb[180].mxu1 }
0x132b   : > { %v10347_v2 = vpop.f32.mrb[181].mxu1  ;;  %10417 = vmatprep.subr.bf16.mxu0 %v14120_v40 }
0x132c   : > { %v6234_v17 = vpop.f32.mrb[182].mxu1 }
0x132d   : > { %v6381_v12 = vpack.c.bf16 %v6234_v17, %v6231_v16  ;;  %v10348_v26 = vpop.f32.mrb[183].mxu1 }
0x132f   : > { %10373 = vmatprep.mubr.msk.bf16.mxu0 %vm1441_vm1, %v6381_v12 }
0x1361   : > { %v6325_v19 = vpop.f32.mrb[184].mxu1 }
0x1362   : > { %v10359_v6 = vpop.f32.mrb[185].mxu1 }
0x1363   : > { %v6328_v48 = vpop.f32.mrb[186].mxu1 }
0x1364   : > { %v6383_v11 = vpack.c.bf16 %v6328_v48, %v6325_v19  ;;  %v10360_v45 = vpop.f32.mrb[187].mxu1 }
0x1365   : > { %v6278_v43 = vpop.f32.mrb[140].mxu0 }
0x1366   : > { %v10353_v24 = vpop.f32.mrb[141].mxu0 }
0x1367   : > { %v6281_v13 = vpop.f32.mrb[142].mxu0 }
0x1368   : > { %v6382_v60 = vpack.c.bf16 %v6281_v13, %v6278_v43  ;;  %v10354_v58 = vpop.f32.mrb[143].mxu0 }
0x136a   : > { %10374 = vmatmul.mubr.msk.bf16.gmra.mrb[72].mxu0 %vm1441_vm1, %v6382_v60 }
0x136b   : > { %10377 = vmatprep.mubr.msk.bf16.mxu0 %vm1441_vm1, %v6383_v11 }
0x136d   : > { %v6372_v49 = vpop.f32.mrb[144].mxu0 }
0x136e   : > { %v10365_v29 = vpop.f32.mrb[145].mxu0  ;;  %v6549_v35 = vpop.f32.mrb[188].mxu1 }
0x136f   : > { %v6375_v44 = vpop.f32.mrb[146].mxu0  ;;  %v10385_v61 = vpop.f32.mrb[189].mxu1  ;;  %v6811_v37 = vsel %vm1441_vm1, %v6549_v35, -inf }
0x1370   : > { %v6384_v9 = vpack.c.bf16 %v6375_v44, %v6372_v49  ;;  %6812 = vmax.xlane.f32.xlu1 %v6811_v37  ;;  %v10366_v57 = vpop.f32.mrb[147].mxu0  ;;  %v6552_v51 = vpop.f32.mrb[190].mxu1 }
0x1371   : > { %v10386_v28 = vpop.f32.mrb[191].mxu1  ;;  %v6814_v8 = vsel %vm1441_vm1, %v6552_v51, -inf }
0x1372   : > { %6815 = vmax.xlane.f32.xlu0 %v6814_v8  ;;  %10378 = vmatmul.mubr.msk.bf16.gmra.mrb[76].mxu0 %vm1441_vm1, %v6384_v9 }
0x1373   : > { %10407 = vmatprep.mubr.msk.bf16.mxu0 %vm11601_vm0, %v14120_v40 }
0x1376   : > { %v6600_v33 = vpop.f32.mrb[192].mxu1 }
0x1377   : > { %v10391_v46 = vpop.f32.mrb[193].mxu1  ;;  %v6817_v42 = vsel %vm1441_vm1, %v6600_v33, -inf }
0x1378   : > { %6818 = vmax.xlane.f32.xlu0 %v6817_v42  ;;  %v6603_v36 = vpop.f32.mrb[194].mxu1 }
0x1379   : > { %v10392_v3 = vpop.f32.mrb[195].mxu1  ;;  %v6820_v41 = vsel %vm1441_vm1, %v6603_v36, -inf }
0x137a   : > { %6821 = vmax.xlane.f32.xlu1 %v6820_v41  ;;  %10408 = vmatmul.mubr.msk.bf16.vlgmr.msra.gmra.mrb[148].mxu0 %vm1441_vm1, %v6710_v39 }
0x137b   : > { %10419 = vmatprep.mubr.msk.bf16.mxu0 %vm11601_vm0, %v14120_v40 }
0x137e   : > { %v6651_v34 = vpop.f32.mrb[196].mxu1 }
0x137f   : > { %v10397_v38 = vpop.f32.mrb[197].mxu1  ;;  %v6823_v53 = vsel %vm1441_vm1, %v6651_v34, -inf }
0x1380   : > { %6824 = vmax.xlane.f32.xlu0 %v6823_v53  ;;  %v6654_v10 = vpop.f32.mrb[198].mxu1 }
0x1381   : > { %v10398_v25 = vpop.f32.mrb[199].mxu1  ;;  %v6826_v56 = vsel %vm1441_vm1, %v6654_v10, -inf }
0x1382   : > { %6827 = vmax.xlane.f32.xlu1 %v6826_v56 }
0x1386   : > { %v6702_v5 = vpop.f32.mrb[200].mxu1 }
0x1387   : > { %v10403_v7 = vpop.f32.mrb[201].mxu1  ;;  %v6829_v15 = vsel %vm1441_vm1, %v6702_v5, -inf }
0x1388   : > { %6830 = vmax.xlane.f32.xlu0 %v6829_v15  ;;  %v6705_v30 = vpop.f32.mrb[202].mxu1 }
0x1389   : > { %v10404_v55 = vpop.f32.mrb[203].mxu1  ;;  %v6832_v0 = vsel %vm1441_vm1, %v6705_v30, -inf }
0x138a   : > { %6833 = vmax.xlane.f32.xlu1 %v6832_v0 }
0x138e   : > { %v13582_v16 = vpop.f32.mrb[204].mxu1 }
0x138f   : > { %v10415_v2 = vpop.f32.mrb[205].mxu1 }
0x1390   : > { %v13584_v17 = vpop.f32.mrb[206].mxu1 }
0x1391   : > { %v10416_v12 = vpop.f32.mrb[207].mxu1 }
0x13fd   : > { %v6813_v26 = vpop.xlane.xlu1 %6812 }
0x13fe   : > { %v6847_v6 = vsub.f32 %v6549_v35, %v6813_v26 }
0x13ff   : > { %v6816_v19 = vpop.xlane.xlu0 %6815 }
0x1400   : > { %v6848_v11 = vsub.f32 %v6552_v51, %v6816_v19  ;;  %v6859_v43 = vmul.f32 1.442695, %v6847_v6 }
0x1402   : > { %v6861_v60 = vmul.f32 1.442695, %v6848_v11  ;;  %11178 = vpow2.f32 %v6859_v43 }
0x1404   : > { %11180 = vpow2.f32 %v6861_v60 }
0x1405   : > { %v6819_v48 = vpop.xlane.xlu0 %6818 }
0x1406   : > { %v6849_v24 = vsub.f32 %v6600_v33, %v6819_v48 }
0x1407   : > { %v6822_v45 = vpop.xlane.xlu1 %6821 }
0x1408   : > { %v6850_v58 = vsub.f32 %v6603_v36, %v6822_v45  ;;  %v6863_v29 = vmul.f32 1.442695, %v6849_v24 }
0x140a   : > { %v6865_v37 = vmul.f32 1.442695, %v6850_v58  ;;  %11182 = vpow2.f32 %v6863_v29 }
0x140c   : > { %11184 = vpow2.f32 %v6865_v37  ;;  %v13593_v38 = vpop.eup %11178 }
0x140d   : > { %v6825_v13 = vpop.xlane.xlu0 %6824  ;;  %v6883_v56 = vsel %vm1441_vm1, %v13593_v38, 0.0 }
0x140e   : > { %v6851_v44 = vsub.f32 %v6651_v34, %v6825_v13  ;;  %v6841_v34 = vsel %vm1441_vm1, %v13582_v16, -inf  ;;  %v13597_v25 = vpop.eup %11180 }
0x140f   : > { %v6828_v49 = vpop.xlane.xlu1 %6827  ;;  %v6886_v7 = vsel %vm1441_vm1, %v13597_v25, 0.0 }
0x1410   : > { %v6852_v9 = vsub.f32 %v6654_v10, %v6828_v49  ;;  %v6867_v28 = vmul.f32 1.442695, %v6851_v44  ;;  %v6844_v10 = vsel %vm1441_vm1, %v13584_v17, -inf }
0x1412   : > { %v6869_v46 = vmul.f32 1.442695, %v6852_v9  ;;  %11186 = vpow2.f32 %v6867_v28 }
0x1414   : > { %11188 = vpow2.f32 %v6869_v46 }
0x1415   : > { %v6831_v61 = vpop.xlane.xlu0 %6830 }
0x1416   : > { %v6853_v35 = vsub.f32 %v6702_v5, %v6831_v61  ;;  %v13601_v5 = vpop.eup %11182 }
0x1417   : > { %v6834_v57 = vpop.xlane.xlu1 %6833  ;;  %v13605_v15 = vpop.eup %11184 }
0x1418   : > { %v6854_v42 = vsub.f32 %v6705_v30, %v6834_v57  ;;  %v6871_v41 = vmul.f32 1.442695, %v6853_v35  ;;  %v6889_v30 = vsel %vm1441_vm1, %v13601_v5, 0.0  ;;  %v6892_v0 = vsel %vm1441_vm1, %v13605_v15, 0.0 }
0x141a   : > { %v6873_v53 = vmul.f32 1.442695, %v6854_v42  ;;  %11190 = vpow2.f32 %v6871_v41 }
0x141c   : > { %11192 = vpow2.f32 %v6873_v53  ;;  %v13609_v55 = vpop.eup %11186 }
0x141d   : > { %v6895_v12 = vsel %vm1441_vm1, %v13609_v55, 0.0 }
0x141e   : > { %v13613_v2 = vpop.eup %11188 }
0x141f   : > { %v6898_v19 = vsel %vm1441_vm1, %v13613_v2, 0.0 }
0x1424   : > { %v13617_v26 = vpop.eup %11190 }
0x1425   : > { %v6901_v48 = vsel %vm1441_vm1, %v13617_v26, 0.0 }
0x1426   : > { %v13621_v6 = vpop.eup %11192 }
0x1427   : > { %v6904_v11 = vsel %vm1441_vm1, %v13621_v6, 0.0 }
0x144d   : > { %v13586_v8 = vpop.f32.mrb[148].mxu0 }
0x144e   : > { %v10409_v51 = vpop.f32.mrb[149].mxu0  ;;  %v6835_v33 = vsel %vm1441_vm1, %v13586_v8, -inf }
0x144f   : > { %6836 = vmax.xlane.f32.xlu0 %v6835_v33  ;;  %v6756_v36 = vpop.f32.mrb[150].mxu0 }
0x1450   : > { %v10410_v39 = vpop.f32.mrb[151].mxu0  ;;  %v6838_v3 = vsel %vm1441_vm1, %v6756_v36, -inf }
0x1451   : > { %6839 = vmax.xlane.f32.xlu1 %v6838_v3 }
0x1453   : > { %6842 = vmax.xlane.f32.xlu0 %v6841_v34 }
0x1455   : > { %6845 = vmax.xlane.f32.xlu1 %v6844_v10 }
0x1457   : > { %6884 = vadd.xlane.f32.xlu0 %v6883_v56 }
0x1459   : > { %6887 = vadd.xlane.f32.xlu1 %v6886_v7 }
0x145b   : > { %6890 = vadd.xlane.f32.xlu0 %v6889_v30 }
0x145d   : > { %6893 = vadd.xlane.f32.xlu1 %v6892_v0 }
0x145f   : > { %6896 = vadd.xlane.f32.xlu0 %v6895_v12 }
0x1461   : > { %6899 = vadd.xlane.f32.xlu1 %v6898_v19 }
0x1463   : > { %6902 = vadd.xlane.f32.xlu0 %v6901_v48 }
0x1465   : > { %6905 = vadd.xlane.f32.xlu1 %v6904_v11 }
0x14dc   : > { %v6837_v45 = vpop.xlane.xlu0 %6836 }
0x14de   : > { %v6840_v43 = vpop.xlane.xlu1 %6839 }
0x14e0   : > { %v6843_v24 = vpop.xlane.xlu0 %6842 }
0x14e1   : > { %v6857_v13 = vsub.f32 %v13582_v16, %v6843_v24  ;;  %v6855_v16 = vsub.f32 %v13586_v8, %v6837_v45 }
0x14e2   : > { %v6846_v60 = vpop.xlane.xlu1 %6845 }
0x14e3   : > { %v6879_v58 = vmul.f32 1.442695, %v6857_v13  ;;  %v6858_v49 = vsub.f32 %v13584_v17, %v6846_v60  ;;  %v6856_v17 = vsub.f32 %v6756_v36, %v6840_v43  ;;  %v6875_v57 = vmul.f32 1.442695, %v6855_v16  ;;  %v10864_v60 = vld [vmem:[%s14121_s0 + $0x30] sm:$0xff]  }
0x14e5   : > { %11194 = vpow2.f32 %v6879_v58  ;;  %v6881_v29 = vmul.f32 1.442695, %v6858_v49  ;;  %v6877_v28 = vmul.f32 1.442695, %v6856_v17 }
0x14e7   : > { %11196 = vpow2.f32 %v6881_v29 }
0x14e8   : > { %11198 = vpow2.f32 %v6875_v57 }
0x14e9   : > { %11200 = vpow2.f32 %v6877_v28 }
0x14ef   : > { %v13629_v44 = vpop.eup %11194 }
0x14f0   : > { %v6913_v61 = vsel %vm1441_vm1, %v13629_v44, 0.0 }
0x14f1   : > { %v13633_v37 = vpop.eup %11196  ;;  %6914 = vadd.xlane.f32.xlu0 %v6913_v61 }
0x14f2   : > { %v6916_v9 = vsel %vm1441_vm1, %v13633_v37, 0.0  ;;  %v13646_v35 = vpop.eup %11198 }
0x14f3   : > { %6917 = vadd.xlane.f32.xlu1 %v6916_v9  ;;  %v13648_v51 = vpop.eup %11200  ;;  %v6907_v33 = vsel %vm1441_vm1, %v13646_v35, 0.0 }
0x14f4   : > { %v6910_v46 = vsel %vm1441_vm1, %v13648_v51, 0.0 }
0x1504   : > { %6996 = vrot.lane.b32.xlu1 %v12304_v63, %s11607_s28 }
0x1507   : > { %6949 = vrot.lane.b32.xlu0 %v12312_v14, %s11607_s28 }
0x1508   : > { %7043 = vrot.lane.b32.xlu1 %v12317_v22, %s11607_s28 }
0x150b   : > { %7090 = vrot.lane.b32.xlu0 %v12314_v20, %s11607_s28 }
0x152a   : > { %6908 = vadd.xlane.f32.xlu0 %v6907_v33 }
0x152c   : > { %6911 = vadd.xlane.f32.xlu1 %v6910_v46 }
0x153d   : > { %7137 = vrot.lane.b32.xlu1 %v12322_v32, %s11607_s28 }
0x1540   : > { %7184 = vrot.lane.b32.xlu0 %v12320_v31, %s11607_s28 }
0x1541   : > { %7359 = vrot.lane.b32.xlu1 %v12222_v62, %s11608_s13  ;;  %v6888_v62 = vpop.xlane.xlu1 %6887 }
0x1542   : > { %11202 = vrcp.f32 %v6888_v62 }
0x1544   : > { %7357 = vrot.lane.b32.xlu0 %v12231_v4, %s11608_s13 }
0x1545   : > { %7410 = vrot.lane.b32.xlu1 %v12219_v59, %s11608_s13  ;;  %v6885_v59 = vpop.xlane.xlu0 %6884  ;;  %v6894_v4 = vpop.xlane.xlu1 %6893 }
0x1546   : > { %11204 = vrcp.f32 %v6885_v59 }
0x1547   : > { %11206 = vrcp.f32 %v6894_v4 }
0x1548   : > { %7408 = vrot.lane.b32.xlu0 %v12227_v1, %s11608_s13 }
0x1549   : > { %7461 = vrot.lane.b32.xlu1 %v12244_v21, %s11608_s13  ;;  %v6891_v1 = vpop.xlane.xlu0 %6890  ;;  %v6900_v21 = vpop.xlane.xlu1 %6899 }
0x154a   : > { %11208 = vrcp.f32 %v6891_v1 }
0x154b   : > { %11210 = vrcp.f32 %v6900_v21 }
0x154c   : > { %7512 = vrot.lane.b32.xlu0 %v12241_v18, %s11608_s13 }
0x154d   : > { %7459 = vrot.lane.b32.xlu1 %v12253_v27, %s11608_s13  ;;  %v6897_v18 = vpop.xlane.xlu0 %6896  ;;  %v6906_v27 = vpop.xlane.xlu1 %6905 }
0x154e   : > { %11212 = vrcp.f32 %v6897_v18 }
0x154f   : > { %11214 = vrcp.f32 %v6906_v27 }
0x1550   : > { %7563 = vrot.lane.b32.xlu0 %v12271_v50, %s11608_s13 }
0x1551   : > { %7510 = vrot.lane.b32.xlu1 %v12249_v23, %s11608_s13  ;;  %v6903_v23 = vpop.xlane.xlu0 %6902 }
0x1552   : > { %11216 = vrcp.f32 %v6903_v23 }
0x1554   : > { %7614 = vrot.lane.b32.xlu0 %v12268_v47, %s11608_s13  ;;  %v11203_v47 = vpop.eup %11202 }
0x1555   : > { %7561 = vrot.lane.b32.xlu1 %v12282_v54, %s11608_s13  ;;  %v11205_v50 = vpop.eup %11204 }
0x1556   : > { %v11207_v8 = vpop.eup %11206  ;;  %v6931_v39 = vmul.f32 %v11205_v50, %v13593_v38 }
0x1557   : > { %v11209_v36 = vpop.eup %11208  ;;  %v6934_v3 = vmul.f32 %v11207_v8, %v13605_v15 }
0x1558   : > { %7612 = vrot.lane.b32.xlu0 %v12274_v52, %s11608_s13  ;;  %v6932_v52 = vmul.f32 %v11203_v47, %v13597_v25  ;;  %v6933_v34 = vmul.f32 %v11209_v36, %v13601_v5  ;;  %v11211_v56 = vpop.eup %11210 }
0x1559   : > { %v11213_v7 = vpop.eup %11212  ;;  %v6936_v38 = vmul.f32 %v11211_v56, %v13613_v2 }
0x155a   : > { %v6943_v10 = vpack.c.bf16 %v6932_v52, %v6931_v39  ;;  %v6944_v25 = vpack.c.bf16 %v6934_v3, %v6933_v34  ;;  %v11215_v30 = vpop.eup %11214  ;;  %v6935_v12 = vmul.f32 %v11213_v7, %v13609_v55 }
0x155b   : > { %v6938_v19 = vmul.f32 %v11215_v30, %v13621_v6 }
0x155c   : > { %v11217_v0 = vpop.eup %11216  ;;  %v6945_v48 = vpack.c.bf16 %v6936_v38, %v6935_v12 }
0x155d   : > { %v6937_v2 = vmul.f32 %v11217_v0, %v13617_v26 }
0x155f   : > { %v6946_v11 = vpack.c.bf16 %v6938_v19, %v6937_v2 }
0x157e   : > { %v6915_v54 = vpop.xlane.xlu0 %6914 }
0x1580   : > { %v6918_v42 = vpop.xlane.xlu1 %6917 }
0x1581   : > { %11218 = vrcp.f32 %v6918_v42 }
0x1582   : > { %v6950_v41 = vpop.permute.xlu0 %6949  ;;  %11220 = vrcp.f32 %v6915_v54 }
0x1583   : > { %10418 = vmatpush3.bf16.msra.mxu0 %v6950_v41 }
0x1584   : > { %v6997_v53 = vpop.permute.xlu1 %6996  ;;  %10429 = vmatprep.subr.bf16.mxu0 %v14120_v40 }
0x1585   : > { %10424 = vmatpush3.bf16.msra.mxu1 %v6997_v53 }
0x1586   : > { %10420 = vmatmul.mubr.msk.bf16.vlgmr.msra.gmra.mrb[152].mxu0 %vm1441_vm1, %v6943_v10  ;;  %10435 = vmatprep.subr.bf16.mxu1 %v14120_v40  ;;  %v7091_v15 = vpop.permute.xlu0 %7090 }
0x1587   : > { %10431 = vmatprep.mubr.msk.bf16.mxu0 %vm11601_vm0, %v14120_v40 }
0x1588   : > { %10426 = vmatmul.mubr.msk.bf16.vlgmr.msra.gmra.mrb[208].mxu1 %vm1441_vm1, %v6944_v25  ;;  %v7044_v5 = vpop.permute.xlu1 %7043 }
0x1589   : > { %10430 = vmatpush3.bf16.msra.mxu0 %v7044_v5  ;;  %10436 = vmatpush3.bf16.msra.mxu1 %v7091_v15 }
0x158a   : > { %10437 = vmatprep.mubr.msk.bf16.mxu1 %vm11601_vm0, %v14120_v40  ;;  %10447 = vmatprep.subr.bf16.mxu1 %v14120_v40 }
0x158b   : > { %10441 = vmatprep.subr.bf16.mxu0 %v14120_v40  ;;  %v11219_v55 = vpop.eup %11218 }
0x158c   : > { %v11221_v45 = vpop.eup %11220  ;;  %v6942_v26 = vmul.f32 %v11219_v55, %v13633_v37 }
0x158d   : > { %v6941_v24 = vmul.f32 %v11221_v45, %v13629_v44 }
0x158e   : > { %10432 = vmatmul.mubr.msk.bf16.vlgmr.msra.gmra.mrb[156].mxu0 %vm1441_vm1, %v6945_v48 }
0x158f   : > { %10443 = vmatprep.mubr.msk.bf16.mxu0 %vm11601_vm0, %v14120_v40  ;;  %v6948_v49 = vpack.c.bf16 %v6942_v26, %v6941_v24 }
0x1590   : > { %10438 = vmatmul.mubr.msk.bf16.vlgmr.msra.gmra.mrb[212].mxu1 %vm1441_vm1, %v6946_v11 }
0x1591   : > { %10449 = vmatprep.mubr.msk.bf16.mxu1 %vm11601_vm0, %v14120_v40 }
0x15b7   : > { %v6909_v6 = vpop.xlane.xlu0 %6908 }
0x15b8   : > { %11222 = vrcp.f32 %v6909_v6 }
0x15b9   : > { %v6912_v43 = vpop.xlane.xlu1 %6911 }
0x15ba   : > { %11224 = vrcp.f32 %v6912_v43 }
0x15bb   : > { %v7185_v13 = vpop.permute.xlu0 %7184 }
0x15bc   : > { %10448 = vmatpush3.bf16.msra.mxu1 %v7185_v13 }
0x15bd   : > { %v7138_v58 = vpop.permute.xlu1 %7137  ;;  %10467 = vmatprep.subr.bf16.mxu1 %v14120_v40 }
0x15be   : > { %10442 = vmatpush3.bf16.msra.mxu0 %v7138_v58 }
0x15bf   : > { %10450 = vmatmul.mubr.msk.bf16.vlgmr.msra.gmra.mrb[216].mxu1 %vm1441_vm1, %v6948_v49  ;;  %10453 = vmatprep.subr.bf16.mxu0 %v10864_v60  ;;  %v7358_v17 = vpop.permute.xlu0 %7357 }
0x15c0   : > { %10469 = vmatprep.mubr.msk.bf16.mxu1 %vm11601_vm0, %v14120_v40 }
0x15c1   : > { %v7360_v29 = vpop.permute.xlu1 %7359 }
0x15c2   : > { %v11223_v61 = vpop.eup %11222  ;;  %v7365_v9 = vsel %vm1441_vm1, %v7360_v29, 0 }
0x15c3   : > { %v6939_v44 = vmul.f32 %v11223_v61, %v13646_v35  ;;  %v7409_v46 = vpop.permute.xlu0 %7408 }
0x15c4   : > { %v11225_v37 = vpop.eup %11224 }
0x15c5   : > { %v6940_v16 = vmul.f32 %v11225_v37, %v13648_v51  ;;  %10468 = vmatpush3.bf16.xpose.msra.mxu1 %v7365_v9  ;;  %v7411_v28 = vpop.permute.xlu1 %7410 }
0x15c6   : > { %10473 = vmatprep.subr.bf16.mxu1 %v14120_v40  ;;  %v7416_v33 = vsel %vm1441_vm1, %v7411_v28, 0 }
0x15c7   : > { %v6947_v57 = vpack.c.bf16 %v6940_v16, %v6939_v44  ;;  %v7513_v51 = vpop.permute.xlu0 %7512 }
0x15c8   : > { %v7518_v3 = vsel %vm1441_vm1, %v7513_v51, 0 }
0x15c9   : > { %10444 = vmatmul.mubr.msk.bf16.vlgmr.msra.gmra.mrb[160].mxu0 %vm1441_vm1, %v6947_v57  ;;  %v7462_v35 = vpop.permute.xlu1 %7461 }
0x15ca   : > { %10454 = vmatpush3.bf16.msra.mxu0 %v10864_v60  ;;  %v7467_v59 = vsel %vm1441_vm1, %v7462_v35, 0 }
0x15cb   : > { %10485 = vmatprep.subr.bf16.mxu0 %v14120_v40  ;;  %v7564_v1 = vpop.permute.xlu0 %7563 }
0x15cc   : > { %10470 = vmatmul.mubr.msk.bf16.vlgmr.msra.gmra.mrb[220].mxu1 %vm1441_vm1, %v7358_v17  ;;  %v7569_v4 = vsel %vm1441_vm1, %v7564_v1, 0 }
0x15cd   : > { %10474 = vmatpush3.bf16.xpose.msra.mxu1 %v7416_v33  ;;  %10475 = vmatprep.mubr.msk.bf16.mxu1 %vm11601_vm0, %v14120_v40  ;;  %v7460_v62 = vpop.permute.xlu1 %7459 }
0x15ce   : > { %10479 = vmatprep.subr.bf16.mxu1 %v14120_v40 }
0x15cf   : > { %v7615_v49 = vpop.permute.xlu0 %7614 }
0x15d0   : > { %v7620_v44 = vsel %vm1441_vm1, %v7615_v49, 0 }
0x15d1   : > { %v13731_v18 = vpop.permute.xlu1 %7510 }
0x15d4   : > { %10476 = vmatmul.mubr.msk.bf16.vlgmr.msra.gmra.mrb[224].mxu1 %vm1441_vm1, %v7409_v46  ;;  %v7613_v46 = vpop.permute.xlu0 %7612 }
0x15d5   : > { %10480 = vmatpush3.bf16.xpose.msra.mxu1 %v7467_v59  ;;  %10481 = vmatprep.mubr.msk.bf16.mxu1 %vm11601_vm0, %v14120_v40  ;;  %v7562_v21 = vpop.permute.xlu1 %7561 }
0x15d6   : > { %10491 = vmatprep.subr.bf16.mxu1 %v14120_v40 }
0x15dc   : > { %10482 = vmatmul.mubr.msk.bf16.vlgmr.msra.gmra.mrb[228].mxu1 %vm1441_vm1, %v7460_v62 }
0x15dd   : > { %10492 = vmatpush3.bf16.xpose.msra.mxu1 %v7569_v4  ;;  %10493 = vmatprep.mubr.msk.bf16.mxu1 %vm11601_vm0, %v14120_v40 }
0x15de   : > { %10503 = vmatprep.subr.bf16.mxu1 %v14120_v40 }
0x15e4   : > { %10494 = vmatmul.mubr.msk.bf16.vlgmr.msra.gmra.mrb[232].mxu1 %vm1441_vm1, %v7562_v21 }
0x15e5   : > { %10505 = vmatprep.mubr.msk.bf16.mxu1 %vm11601_vm0, %v14120_v40 }
0x1659   : > { %v6989_v23 = vpop.f32.mrb[152].mxu0 }
0x165a   : > { %v10421_v27 = vpop.f32.mrb[153].mxu0 }
0x165b   : > { %v6992_v47 = vpop.f32.mrb[154].mxu0  ;;  %v7036_v50 = vpop.f32.mrb[208].mxu1 }
0x165c   : > { %v7231_v54 = vpack.c.bf16 %v6992_v47, %v6989_v23  ;;  %v10422_v8 = vpop.f32.mrb[155].mxu0  ;;  %v10427_v52 = vpop.f32.mrb[209].mxu1 }
0x165d   : > { %v7039_v42 = vpop.f32.mrb[210].mxu1 }
0x165e   : > { %v7232_v36 = vpack.c.bf16 %v7039_v42, %v7036_v50  ;;  %v10428_v39 = vpop.f32.mrb[211].mxu1  ;;  %10455 = vmatprep.mubr.msk.bf16.mxu0 %vm1441_vm1, %v7231_v54 }
0x1660   : > { %10456 = vmatmul.mubr.msk.bf16.vlgmr.msra.gmra.mrb[68].mxu0 %vm1441_vm1, %v7232_v36 }
0x1661   : > { %10486 = vmatpush3.bf16.xpose.msra.mxu0 %v7518_v3  ;;  %v7083_v41 = vpop.f32.mrb[156].mxu0 }
0x1662   : > { %v10433_v34 = vpop.f32.mrb[157].mxu0  ;;  %10497 = vmatprep.subr.bf16.mxu0 %v14120_v40 }
0x1663   : > { %v7086_v53 = vpop.f32.mrb[158].mxu0  ;;  %v7130_v10 = vpop.f32.mrb[212].mxu1 }
0x1664   : > { %v7233_v56 = vpack.c.bf16 %v7086_v53, %v7083_v41  ;;  %v10434_v7 = vpop.f32.mrb[159].mxu0  ;;  %v10439_v25 = vpop.f32.mrb[213].mxu1 }
0x1665   : > { %v7133_v30 = vpop.f32.mrb[214].mxu1 }
0x1666   : > { %v7234_v38 = vpack.c.bf16 %v7133_v30, %v7130_v10  ;;  %v10440_v15 = vpop.f32.mrb[215].mxu1  ;;  %10459 = vmatprep.mubr.msk.bf16.mxu0 %vm1441_vm1, %v7233_v56 }
0x1668   : > { %10460 = vmatmul.mubr.msk.bf16.gmra.mrb[72].mxu0 %vm1441_vm1, %v7234_v38 }
0x1692   : > { %v7224_v5 = vpop.f32.mrb[216].mxu1 }
0x1693   : > { %v10451_v0 = vpop.f32.mrb[217].mxu1 }
0x1694   : > { %v7227_v12 = vpop.f32.mrb[218].mxu1 }
0x1695   : > { %v7236_v19 = vpack.c.bf16 %v7227_v12, %v7224_v5  ;;  %v10452_v2 = vpop.f32.mrb[219].mxu1 }
0x169c   : > { %v7177_v48 = vpop.f32.mrb[160].mxu0 }
0x169d   : > { %v10445_v11 = vpop.f32.mrb[161].mxu0 }
0x169e   : > { %v7180_v55 = vpop.f32.mrb[162].mxu0 }
0x169f   : > { %v7235_v6 = vpack.c.bf16 %v7180_v55, %v7177_v48  ;;  %v10446_v45 = vpop.f32.mrb[163].mxu0  ;;  %v7401_v26 = vpop.f32.mrb[220].mxu1 }
0x16a0   : > { %v10471_v43 = vpop.f32.mrb[221].mxu1  ;;  %v7663_v24 = vsel %vm1441_vm1, %v7401_v26, -inf }
0x16a1   : > { %7664 = vmax.xlane.f32.xlu1 %v7663_v24  ;;  %10463 = vmatprep.mubr.msk.bf16.mxu0 %vm1441_vm1, %v7235_v6  ;;  %v7404_v13 = vpop.f32.mrb[222].mxu1 }
0x16a2   : > { %10464 = vmatmul.mubr.msk.bf16.gmra.mrb[76].mxu0 %vm1441_vm1, %v7236_v19  ;;  %v10472_v60 = vpop.f32.mrb[223].mxu1  ;;  %v7666_v58 = vsel %vm1441_vm1, %v7404_v13, -inf }
0x16a3   : > { %7667 = vmax.xlane.f32.xlu0 %v7666_v58  ;;  %10487 = vmatprep.mubr.msk.bf16.mxu0 %vm11601_vm0, %v14120_v40 }
0x16a7   : > { %v7452_v29 = vpop.f32.mrb[224].mxu1 }
0x16a8   : > { %v10477_v61 = vpop.f32.mrb[225].mxu1  ;;  %v7669_v37 = vsel %vm1441_vm1, %v7452_v29, -inf }
0x16a9   : > { %7670 = vmax.xlane.f32.xlu0 %v7669_v37  ;;  %v7455_v9 = vpop.f32.mrb[226].mxu1 }
0x16aa   : > { %v10478_v16 = vpop.f32.mrb[227].mxu1  ;;  %10488 = vmatmul.mubr.msk.bf16.vlgmr.msra.gmra.mrb[164].mxu0 %vm1441_vm1, %v13731_v18  ;;  %v7672_v17 = vsel %vm1441_vm1, %v7455_v9, -inf }
0x16ab   : > { %10498 = vmatpush3.bf16.xpose.msra.mxu0 %v7620_v44  ;;  %7673 = vmax.xlane.f32.xlu1 %v7672_v17 }
0x16ac   : > { %10499 = vmatprep.mubr.msk.bf16.mxu0 %vm11601_vm0, %v14120_v40  ;;  %10509 = vmatprep.subr.bf16.mxu0 %v14120_v40 }
0x16af   : > { %v7503_v57 = vpop.f32.mrb[228].mxu1 }
0x16b0   : > { %v10483_v28 = vpop.f32.mrb[229].mxu1  ;;  %v7675_v33 = vsel %vm1441_vm1, %v7503_v57, -inf }
0x16b1   : > { %7676 = vmax.xlane.f32.xlu0 %v7675_v33  ;;  %v7506_v35 = vpop.f32.mrb[230].mxu1 }
0x16b2   : > { %v10484_v51 = vpop.f32.mrb[231].mxu1  ;;  %10500 = vmatmul.mubr.msk.bf16.vlgmr.msra.gmra.mrb[168].mxu0 %vm1441_vm1, %v7613_v46  ;;  %v7678_v59 = vsel %vm1441_vm1, %v7506_v35, -inf }
0x16b3   : > { %7679 = vmax.xlane.f32.xlu1 %v7678_v59  ;;  %10511 = vmatprep.mubr.msk.bf16.mxu0 %vm11601_vm0, %v14120_v40 }
0x16b7   : > { %v13764_v62 = vpop.f32.mrb[232].mxu1 }
0x16b8   : > { %v10495_v1 = vpop.f32.mrb[233].mxu1  ;;  %v7687_v0 = vsel %vm1441_vm1, %v13764_v62, -inf }
0x16b9   : > { %v13766_v4 = vpop.f32.mrb[234].mxu1 }
0x16ba   : > { %v10496_v18 = vpop.f32.mrb[235].mxu1  ;;  %v7690_v19 = vsel %vm1441_vm1, %v13766_v4, -inf }
0x172e   : > { %v7665_v21 = vpop.xlane.xlu1 %7664 }
0x172f   : > { %v7699_v27 = vsub.f32 %v7401_v26, %v7665_v21 }
0x1730   : > { %v7668_v23 = vpop.xlane.xlu0 %7667 }
0x1731   : > { %v7700_v50 = vsub.f32 %v7404_v13, %v7668_v23  ;;  %v7711_v8 = vmul.f32 1.442695, %v7699_v27 }
0x1733   : > { %v7713_v36 = vmul.f32 1.442695, %v7700_v50  ;;  %11226 = vpow2.f32 %v7711_v8 }
0x1735   : > { %11228 = vpow2.f32 %v7713_v36 }
0x1736   : > { %v7671_v47 = vpop.xlane.xlu0 %7670 }
0x1737   : > { %v7701_v52 = vsub.f32 %v7452_v29, %v7671_v47 }
0x1738   : > { %v7674_v54 = vpop.xlane.xlu1 %7673 }
0x1739   : > { %v7702_v39 = vsub.f32 %v7455_v9, %v7674_v54  ;;  %v7715_v41 = vmul.f32 1.442695, %v7701_v52 }
0x173b   : > { %v7717_v7 = vmul.f32 1.442695, %v7702_v39  ;;  %11230 = vpow2.f32 %v7715_v41 }
0x173d   : > { %11232 = vpow2.f32 %v7717_v7  ;;  %v13781_v55 = vpop.eup %11226 }
0x173e   : > { %v7677_v42 = vpop.xlane.xlu0 %7676  ;;  %v7735_v24 = vsel %vm1441_vm1, %v13781_v55, 0.0 }
0x173f   : > { %v7703_v34 = vsub.f32 %v7503_v57, %v7677_v42  ;;  %v13784_v43 = vpop.eup %11228 }
0x1740   : > { %v7680_v3 = vpop.xlane.xlu1 %7679  ;;  %v7738_v60 = vsel %vm1441_vm1, %v13784_v43, 0.0 }
0x1741   : > { %v7704_v25 = vsub.f32 %v7506_v35, %v7680_v3  ;;  %v7719_v5 = vmul.f32 1.442695, %v7703_v34 }
0x1743   : > { %v7721_v12 = vmul.f32 1.442695, %v7704_v25  ;;  %11234 = vpow2.f32 %v7719_v5 }
0x1745   : > { %11236 = vpow2.f32 %v7721_v12  ;;  %v13788_v13 = vpop.eup %11230 }
0x1746   : > { %v7741_v49 = vsel %vm1441_vm1, %v13788_v13, 0.0 }
0x1747   : > { %v13792_v58 = vpop.eup %11232 }
0x1748   : > { %v7744_v61 = vsel %vm1441_vm1, %v13792_v58, 0.0 }
0x174d   : > { %v13796_v29 = vpop.eup %11234 }
0x174e   : > { %v7747_v9 = vsel %vm1441_vm1, %v13796_v29, 0.0 }
0x174f   : > { %v13800_v37 = vpop.eup %11236 }
0x1750   : > { %v7750_v44 = vsel %vm1441_vm1, %v13800_v37, 0.0 }
0x177d   : > { %v13768_v53 = vpop.f32.mrb[164].mxu0 }
0x177e   : > { %v10489_v10 = vpop.f32.mrb[165].mxu0  ;;  %v7681_v56 = vsel %vm1441_vm1, %v13768_v53, -inf }
0x177f   : > { %7682 = vmax.xlane.f32.xlu0 %v7681_v56  ;;  %v13772_v30 = vpop.f32.mrb[166].mxu0 }
0x1780   : > { %v10490_v38 = vpop.f32.mrb[167].mxu0  ;;  %v7684_v15 = vsel %vm1441_vm1, %v13772_v30, -inf }
0x1781   : > { %7685 = vmax.xlane.f32.xlu1 %v7684_v15 }
0x1783   : > { %7688 = vmax.xlane.f32.xlu0 %v7687_v0 }
0x1785   : > { %7691 = vmax.xlane.f32.xlu1 %v7690_v19  ;;  %v7656_v2 = vpop.f32.mrb[168].mxu0 }
0x1786   : > { %v10501_v48 = vpop.f32.mrb[169].mxu0  ;;  %v7693_v11 = vsel %vm1441_vm1, %v7656_v2, -inf }
0x1787   : > { %7694 = vmax.xlane.f32.xlu0 %v7693_v11  ;;  %v7659_v6 = vpop.f32.mrb[170].mxu0 }
0x1788   : > { %v10502_v45 = vpop.f32.mrb[171].mxu0  ;;  %v7696_v26 = vsel %vm1441_vm1, %v7659_v6, -inf }
0x1789   : > { %7697 = vmax.xlane.f32.xlu1 %v7696_v26 }
0x178b   : > { %7736 = vadd.xlane.f32.xlu0 %v7735_v24 }
0x178d   : > { %7739 = vadd.xlane.f32.xlu1 %v7738_v60 }
0x178f   : > { %7742 = vadd.xlane.f32.xlu0 %v7741_v49 }
0x1791   : > { %7745 = vadd.xlane.f32.xlu1 %v7744_v61 }
0x1793   : > { %7748 = vadd.xlane.f32.xlu0 %v7747_v9 }
0x1795   : > { %7751 = vadd.xlane.f32.xlu1 %v7750_v44 }
0x180c   : > { %v7683_v16 = vpop.xlane.xlu0 %7682 }
0x180e   : > { %v7686_v17 = vpop.xlane.xlu1 %7685 }
0x180f   : > { %v7706_v23 = vsub.f32 %v13772_v30, %v7686_v17 }
0x1810   : > { %v7689_v57 = vpop.xlane.xlu0 %7688 }
0x1811   : > { %v7707_v28 = vsub.f32 %v13764_v62, %v7689_v57  ;;  %v7705_v62 = vsub.f32 %v13768_v53, %v7683_v16  ;;  %v7725_v54 = vmul.f32 1.442695, %v7706_v23 }
0x1812   : > { %v7692_v33 = vpop.xlane.xlu1 %7691 }
0x1813   : > { %v7727_v46 = vmul.f32 1.442695, %v7707_v28  ;;  %v7708_v35 = vsub.f32 %v13766_v4, %v7692_v33  ;;  %v7723_v47 = vmul.f32 1.442695, %v7705_v62 }
0x1814   : > { %v7695_v4 = vpop.xlane.xlu0 %7694 }
0x1815   : > { %11238 = vpow2.f32 %v7727_v46  ;;  %v7729_v51 = vmul.f32 1.442695, %v7708_v35  ;;  %v7709_v50 = vsub.f32 %v7656_v2, %v7695_v4 }
0x1816   : > { %v7698_v27 = vpop.xlane.xlu1 %7697 }
0x1817   : > { %11240 = vpow2.f32 %v7729_v51  ;;  %v7710_v8 = vsub.f32 %v7659_v6, %v7698_v27 }
0x1818   : > { %11242 = vpow2.f32 %v7723_v47  ;;  %v7737_v53 = vpop.xlane.xlu0 %7736  ;;  %v10865_v47 = vld [vmem:[%s14121_s0 + $0x38] sm:$0xff]  }
0x1819   : > { %11244 = vpow2.f32 %v7725_v54  ;;  %v10867_v54 = vld [vmem:[%s14134_s20 + $0x8] sm:$0xff]  }
0x181a   : > { %v7740_v34 = vpop.xlane.xlu1 %7739 }
0x181c   : > { %v7743_v56 = vpop.xlane.xlu0 %7742 }
0x181e   : > { %v7746_v10 = vpop.xlane.xlu1 %7745 }
0x181f   : > { %v13808_v59 = vpop.eup %11238 }
0x1820   : > { %v7759_v1 = vsel %vm1441_vm1, %v13808_v59, 0.0  ;;  %v7749_v25 = vpop.xlane.xlu0 %7748 }
0x1821   : > { %v13812_v18 = vpop.eup %11240  ;;  %7760 = vadd.xlane.f32.xlu0 %v7759_v1  ;;  %v14133_v1 = vld [vmem:[#allocation34_spill] sm:$0xff] }
0x1822   : > { %v7762_v21 = vsel %vm1441_vm1, %v13812_v18, 0.0  ;;  %v7752_v7 = vpop.xlane.xlu1 %7751 }
0x1823   : > { %7763 = vadd.xlane.f32.xlu1 %v7762_v21 }
0x1834   : > { %7848 = vrot.lane.b32.xlu1 %v12304_v63, %s11608_s13  ;;  %v7731_v63 = vmul.f32 1.442695, %v7709_v50  ;;  %v10866_v50 = vld [vmem:[%s14134_s20] sm:$0xff]  }
0x1836   : > { %11246 = vpow2.f32 %v7731_v63  ;;  %v10870_v63 = vld [vmem:[%s14134_s20 + $0x20] sm:$0xff]  }
0x1837   : > { %7801 = vrot.lane.b32.xlu0 %v12312_v14, %s11608_s13  ;;  %v7733_v14 = vmul.f32 1.442695, %v7710_v8  ;;  %v10869_v8 = vld [vmem:[%s14134_s20 + $0x18] sm:$0xff]  }
0x1838   : > { %7895 = vrot.lane.b32.xlu1 %v12317_v22, %s11608_s13  ;;  %v13826_v22 = vpop.eup %11242 }
0x1839   : > { %11248 = vpow2.f32 %v7733_v14  ;;  %v13828_v52 = vpop.eup %11244  ;;  %v10871_v14 = vld [vmem:[%s14134_s20 + $0x28] sm:$0xff]  }
0x183a   : > { %v7756_v36 = vsel %vm1441_vm1, %v13828_v52, 0.0  ;;  %11250 = vrcp.f32 %v7740_v34  ;;  %v14138_v34 = vld [vmem:[#allocation37_spill] sm:$0xff] }
0x183b   : > { %7942 = vrot.lane.b32.xlu0 %v12314_v20, %s11608_s13  ;;  %v7753_v20 = vsel %vm1441_vm1, %v13826_v22, 0.0  ;;  %11252 = vrcp.f32 %v7737_v53  ;;  %v14139_v53 = vld [vmem:[#allocation38_spill] sm:$0xff] }
0x183c   : > { %11254 = vrcp.f32 %v7746_v10  ;;  %v10878_v10 = vld [vmem:[%s14135_s18 + $0x20] sm:$0xff]  }
0x183d   : > { %11256 = vrcp.f32 %v7743_v56 }
0x183e   : > { %11258 = vrcp.f32 %v7752_v7  ;;  %v10879_v7 = vld [vmem:[%s14135_s18 + $0x28] sm:$0xff]  }
0x183f   : > { %11260 = vrcp.f32 %v7749_v25 }
0x1840   : > { %v13832_v42 = vpop.eup %11246 }
0x1841   : > { %v7765_v3 = vsel %vm1441_vm1, %v13832_v42, 0.0 }
0x1843   : > { %v13836_v39 = vpop.eup %11248 }
0x1844   : > { %v7768_v41 = vsel %vm1441_vm1, %v13836_v39, 0.0  ;;  %v11251_v30 = vpop.eup %11250 }
0x1845   : > { %v11253_v38 = vpop.eup %11252 }
0x1846   : > { %v11255_v5 = vpop.eup %11254  ;;  %v7783_v12 = vmul.f32 %v11253_v38, %v13781_v55 }
0x1847   : > { %v7786_v19 = vmul.f32 %v11255_v5, %v13792_v58 }
0x185a   : > { %7754 = vadd.xlane.f32.xlu0 %v7753_v20  ;;  %v10874_v20 = vld [vmem:[%s14135_s18] sm:$0xff]  }
0x185c   : > { %7757 = vadd.xlane.f32.xlu1 %v7756_v36  ;;  %v14136_v36 = vld [vmem:[#allocation35_spill] sm:$0xff] }
0x185e   : > { %7766 = vadd.xlane.f32.xlu0 %v7765_v3  ;;  %v10876_v3 = vld [vmem:[%s14135_s18 + $0x10] sm:$0xff]  }
0x1860   : > { %7769 = vadd.xlane.f32.xlu1 %v7768_v41  ;;  %v10877_v41 = vld [vmem:[%s14135_s18 + $0x18] sm:$0xff]  }
0x1871   : > { %7989 = vrot.lane.b32.xlu1 %v12322_v32, %s11608_s13  ;;  %v7784_v32 = vmul.f32 %v11251_v30, %v13784_v43 }
0x1873   : > { %v7795_v6 = vpack.c.bf16 %v7784_v32, %v7783_v12 }
0x1874   : > { %8036 = vrot.lane.b32.xlu0 %v12320_v31, %s11608_s13  ;;  %v11257_v31 = vpop.eup %11256 }
0x1875   : > { %v7785_v48 = vmul.f32 %v11257_v31, %v13788_v13  ;;  %v11259_v45 = vpop.eup %11258 }
0x1876   : > { %v11261_v43 = vpop.eup %11260  ;;  %v7788_v55 = vmul.f32 %v11259_v45, %v13800_v37 }
0x1877   : > { %v7796_v26 = vpack.c.bf16 %v7786_v19, %v7785_v48  ;;  %v7787_v60 = vmul.f32 %v11261_v43, %v13796_v29 }
0x1879   : > { %v7797_v58 = vpack.c.bf16 %v7788_v55, %v7787_v60 }
0x18ae   : > { %v7761_v15 = vpop.xlane.xlu0 %7760 }
0x18b0   : > { %v7764_v0 = vpop.xlane.xlu1 %7763 }
0x18b1   : > { %11262 = vrcp.f32 %v7764_v0 }
0x18b2   : > { %v7802_v2 = vpop.permute.xlu0 %7801  ;;  %11264 = vrcp.f32 %v7761_v15  ;;  %v14140_v15 = vld [vmem:[#allocation39_spill] sm:$0xff] }
0x18b3   : > { %10504 = vmatpush3.bf16.msra.mxu1 %v7802_v2 }
0x18b4   : > { %v7849_v11 = vpop.permute.xlu1 %7848  ;;  %10515 = vmatprep.subr.bf16.mxu1 %v14120_v40 }
0x18b5   : > { %10510 = vmatpush3.bf16.msra.mxu0 %v7849_v11 }
0x18b6   : > { %10506 = vmatmul.mubr.msk.bf16.vlgmr.msra.gmra.mrb[236].mxu1 %vm1441_vm1, %v7795_v6  ;;  %10521 = vmatprep.subr.bf16.mxu0 %v14120_v40  ;;  %v7943_v24 = vpop.permute.xlu0 %7942 }
0x18b7   : > { %10517 = vmatprep.mubr.msk.bf16.mxu1 %vm11601_vm0, %v14120_v40 }
0x18b8   : > { %10512 = vmatmul.mubr.msk.bf16.vlgmr.msra.gmra.mrb[172].mxu0 %vm1441_vm1, %v7796_v26  ;;  %v7896_v13 = vpop.permute.xlu1 %7895 }
0x18b9   : > { %10516 = vmatpush3.bf16.msra.mxu1 %v7896_v13  ;;  %10522 = vmatpush3.bf16.msra.mxu0 %v7943_v24 }
0x18ba   : > { %10527 = vmatprep.subr.bf16.mxu1 %v14120_v40  ;;  %10523 = vmatprep.mubr.msk.bf16.mxu0 %vm11601_vm0, %v14120_v40 }
0x18bb   : > { %10533 = vmatprep.subr.bf16.mxu0 %v14120_v40  ;;  %v11263_v29 = vpop.eup %11262 }
0x18bc   : > { %v11265_v44 = vpop.eup %11264  ;;  %v7792_v16 = vmul.f32 %v11263_v29, %v13812_v18 }
0x18bd   : > { %v7791_v17 = vmul.f32 %v11265_v44, %v13808_v59 }
0x18be   : > { %10518 = vmatmul.mubr.msk.bf16.vlgmr.msra.gmra.mrb[240].mxu1 %vm1441_vm1, %v7797_v58 }
0x18bf   : > { %10529 = vmatprep.mubr.msk.bf16.mxu1 %vm11601_vm0, %v14120_v40  ;;  %v7799_v33 = vpack.c.bf16 %v7792_v16, %v7791_v17 }
0x18e7   : > { %v7755_v49 = vpop.xlane.xlu0 %7754 }
0x18e8   : > { %11266 = vrcp.f32 %v7755_v49 }
0x18e9   : > { %v7758_v61 = vpop.xlane.xlu1 %7757 }
0x18ea   : > { %11268 = vrcp.f32 %v7758_v61 }
0x18eb   : > { %v7767_v37 = vpop.xlane.xlu0 %7766 }
0x18ed   : > { %v7770_v9 = vpop.xlane.xlu1 %7769 }
0x18ee   : > { %11270 = vrcp.f32 %v7770_v9 }
0x18ef   : > { %11272 = vrcp.f32 %v7767_v37  ;;  %v8037_v62 = vpop.permute.xlu0 %8036 }
0x18f1   : > { %v7990_v57 = vpop.permute.xlu1 %7989 }
0x18f2   : > { %v11267_v28 = vpop.eup %11266  ;;  %10528 = vmatpush3.bf16.msra.mxu1 %v7990_v57  ;;  %v10880_v57 = vld [vmem:[%s14135_s18 + $0x30] sm:$0xff]  }
0x18f3   : > { %v7789_v35 = vmul.f32 %v11267_v28, %v13826_v22  ;;  %10553 = vmatprep.subr.bf16.mxu1 %v10866_v50  ;;  %v10872_v22 = vld [vmem:[%s14134_s20 + $0x30] sm:$0xff]   ;;  %v10881_v28 = vld [vmem:[%s14135_s18 + $0x38] sm:$0xff]  }
0x18f4   : > { %v11269_v46 = vpop.eup %11268 }
0x18f5   : > { %v7790_v51 = vmul.f32 %v11269_v46, %v13828_v52  ;;  %10530 = vmatmul.mubr.msk.bf16.vlgmr.msra.gmra.mrb[244].mxu1 %vm1441_vm1, %v7799_v33  ;;  %v10873_v52 = vld [vmem:[%s14134_s20 + $0x38] sm:$0xff]   ;;  %v10882_v33 = vld [vmem:[%s12133_s25] sm:$0xff]   ;;  %v10883_v46 = vld [vmem:[%s12133_s25 + $0x8] sm:$0xff]  }
0x18f6   : > { %10569 = vmatprep.mubr.bf16.mxu1 %v14133_v1  ;;  %10554 = vmatpush3.bf16.msra.mxu1 %v10866_v50  ;;  %v10886_v1 = vld [vmem:[%s12133_s25 + $0x20] sm:$0xff]  }
0x18f7   : > { %v7798_v18 = vpack.c.bf16 %v7790_v51, %v7789_v35  ;;  %10555 = vmatprep.subr.bf16.mxu1 %v10867_v54  ;;  %v10884_v35 = vld [vmem:[%s12133_s25 + $0x10] sm:$0xff]   ;;  %v10885_v51 = vld [vmem:[%s12133_s25 + $0x18] sm:$0xff]  }
0x18f8   : > { %v11271_v21 = vpop.eup %11270 }
0x18f9   : > { %10524 = vmatmul.mubr.msk.bf16.vlgmr.msra.gmra.mrb[176].mxu0 %vm1441_vm1, %v7798_v18  ;;  %v11273_v59 = vpop.eup %11272  ;;  %v7794_v4 = vmul.f32 %v11271_v21, %v13836_v39  ;;  %v14137_v39 = vld [vmem:[#allocation36_spill] sm:$0xff]  ;;  %v9406_v21 = vld [vmem:[%s14141_s17] ss:$0 sm:$0xff] }
0x18fa   : > { %10534 = vmatpush3.bf16.msra.mxu0 %v8037_v62  ;;  %10535 = vmatprep.mubr.msk.bf16.mxu0 %vm11601_vm0, %v14120_v40  ;;  %v7793_v23 = vmul.f32 %v11273_v59, %v13832_v42  ;;  %v10868_v40 = vld [vmem:[%s14134_s20 + $0x10] sm:$0xff]   ;;  %v10875_v42 = vld [vmem:[%s14135_s18 + $0x8] sm:$0xff]  }
0x18fb   : > { %10539 = vmatprep.subr.bf16.mxu0 %v10865_v47  ;;  %10556 = vmatpush3.bf16.msra.mxu1 %v10867_v54 }
0x18fc   : > { %v7800_v27 = vpack.c.bf16 %v7794_v4, %v7793_v23  ;;  %10557 = vmatprep.subr.bf16.mxu1 %v10868_v40 }
0x18ff   : > { %10558 = vmatpush3.bf16.msra.mxu1 %v10868_v40 }
0x1900   : > { %10559 = vmatprep.subr.bf16.mxu1 %v10869_v8 }
0x1901   : > { %10536 = vmatmul.mubr.msk.bf16.vlgmr.msra.gmra.mrb[180].mxu0 %vm1441_vm1, %v7800_v27 }
0x1902   : > { %10540 = vmatpush3.bf16.msra.mxu0 %v10865_v47 }
0x1903   : > { %10560 = vmatpush3.bf16.msra.mxu1 %v10869_v8  ;;  %10609 = vmatprep.subr.bf16.mxu0 %v10882_v33 }
0x1904   : > { %10561 = vmatprep.subr.bf16.mxu1 %v10870_v63 }
0x1907   : > { %10562 = vmatpush3.bf16.msra.mxu1 %v10870_v63 }
0x1908   : > { %10563 = vmatprep.subr.bf16.mxu1 %v10871_v14 }
0x190b   : > { %10564 = vmatpush3.bf16.msra.mxu1 %v10871_v14 }
0x190c   : > { %10565 = vmatprep.subr.bf16.mxu1 %v10872_v22 }
0x190f   : > { %10566 = vmatpush3.bf16.msra.mxu1 %v10872_v22 }
0x1910   : > { %10567 = vmatprep.subr.bf16.mxu1 %v10873_v52 }
0x1913   : > { %10568 = vmatpush3.bf16.msra.mxu1 %v10873_v52 }
0x1914   : > { %10581 = vmatprep.subr.bf16.mxu1 %v10874_v20 }
0x1916   : > { %10570 = vmatmul.mubr.bf16.vlgmr.msra.gmra.mrb[248].mxu1 %v14136_v36 }
0x1917   : > { %10582 = vmatpush3.bf16.msra.mxu1 %v10874_v20  ;;  %10573 = vmatprep.mubr.bf16.mxu1 %v14137_v39 }
0x1918   : > { %10583 = vmatprep.subr.bf16.mxu1 %v10875_v42 }
0x191b   : > { %10584 = vmatpush3.bf16.msra.mxu1 %v10875_v42 }
0x191c   : > { %10585 = vmatprep.subr.bf16.mxu1 %v10876_v3 }
0x191e   : > { %10574 = vmatmul.mubr.bf16.gmra.mrb[252].mxu1 %v14138_v34 }
0x191f   : > { %10586 = vmatpush3.bf16.msra.mxu1 %v10876_v3  ;;  %10577 = vmatprep.mubr.bf16.mxu1 %v14139_v53 }
0x1920   : > { %10587 = vmatprep.subr.bf16.mxu1 %v10877_v41 }
0x1923   : > { %10588 = vmatpush3.bf16.msra.mxu1 %v10877_v41 }
0x1924   : > { %10589 = vmatprep.subr.bf16.mxu1 %v10878_v10 }
0x1926   : > { %10578 = vmatmul.mubr.bf16.gmra.mrb[0].mxu1 %v14140_v15 }
0x1927   : > { %10590 = vmatpush3.bf16.msra.mxu1 %v10878_v10 }
0x1928   : > { %10591 = vmatprep.subr.bf16.mxu1 %v10879_v7 }
0x192b   : > { %10592 = vmatpush3.bf16.msra.mxu1 %v10879_v7 }
0x192c   : > { %10593 = vmatprep.subr.bf16.mxu1 %v10880_v57 }
0x192f   : > { %10594 = vmatpush3.bf16.msra.mxu1 %v10880_v57 }
0x1930   : > { %10595 = vmatprep.subr.bf16.mxu1 %v10881_v28 }
0x1933   : > { %10596 = vmatpush3.bf16.msra.mxu1 %v10881_v28 }
0x1989   : > { %v7841_v56 = vpop.f32.mrb[236].mxu1 }
0x198a   : > { %v10507_v25 = vpop.f32.mrb[237].mxu1 }
0x198b   : > { %v7844_v30 = vpop.f32.mrb[238].mxu1  ;;  %v7888_v38 = vpop.f32.mrb[172].mxu0 }
0x198c   : > { %v8083_v5 = vpack.c.bf16 %v7844_v30, %v7841_v56  ;;  %v10508_v32 = vpop.f32.mrb[239].mxu1  ;;  %v10513_v0 = vpop.f32.mrb[173].mxu0 }
0x198d   : > { %v7891_v31 = vpop.f32.mrb[174].mxu0  ;;  %v10888_v32 = vld [vmem:[%s12133_s25 + $0x30] sm:$0xff]   ;;  %v10889_v0 = vld [vmem:[%s12133_s25 + $0x38] sm:$0xff]  }
0x198e   : > { %v8084_v12 = vpack.c.bf16 %v7891_v31, %v7888_v38  ;;  %v10514_v19 = vpop.f32.mrb[175].mxu0  ;;  %10541 = vmatprep.mubr.msk.bf16.mxu0 %vm1441_vm1, %v8083_v5  ;;  %v10887_v5 = vld [vmem:[%s12133_s25 + $0x28] sm:$0xff]   ;;  %v9423_v31 = vld [vmem:[%s14142_s5] ss:$0 sm:$0xff] }
0x198f   : > { %v9424_v19 = vld [vmem:[%s914_s10] ss:$0 sm:$0xff] }
0x1990   : > { %10542 = vmatmul.mubr.msk.bf16.vlgmr.msra.gmra.mrb[68].mxu0 %vm1441_vm1, %v8084_v12 }
0x1991   : > { %v7935_v2 = vpop.f32.mrb[240].mxu1  ;;  %10610 = vmatpush3.bf16.msra.mxu0 %v10882_v33 }
0x1992   : > { %v10519_v48 = vpop.f32.mrb[241].mxu1  ;;  %10611 = vmatprep.subr.bf16.mxu0 %v10883_v46 }
0x1993   : > { %v7938_v11 = vpop.f32.mrb[242].mxu1 }
0x1994   : > { %v8085_v6 = vpack.c.bf16 %v7938_v11, %v7935_v2  ;;  %v10520_v45 = vpop.f32.mrb[243].mxu1 }
0x1995   : > { %10612 = vmatpush3.bf16.msra.mxu0 %v10883_v46 }
0x1996   : > { %10545 = vmatprep.mubr.msk.bf16.mxu0 %vm1441_vm1, %v8085_v6  ;;  %10613 = vmatprep.subr.bf16.mxu0 %v10884_v35 }
0x1999   : > { %10614 = vmatpush3.bf16.msra.mxu0 %v10884_v35 }
0x199a   : > { %10615 = vmatprep.subr.bf16.mxu0 %v10885_v51 }
0x199d   : > { %10616 = vmatpush3.bf16.msra.mxu0 %v10885_v51 }
0x199e   : > { %10617 = vmatprep.subr.bf16.mxu0 %v10886_v1 }
0x19a1   : > { %10618 = vmatpush3.bf16.msra.mxu0 %v10886_v1 }
0x19a2   : > { %10619 = vmatprep.subr.bf16.mxu0 %v10887_v5 }
0x19a5   : > { %10620 = vmatpush3.bf16.msra.mxu0 %v10887_v5 }
0x19a6   : > { %10621 = vmatprep.subr.bf16.mxu0 %v10888_v32 }
0x19a9   : > { %10622 = vmatpush3.bf16.msra.mxu0 %v10888_v32 }
0x19aa   : > { %10623 = vmatprep.subr.bf16.mxu0 %v10889_v0 }
0x19ad   : > { %10624 = vmatpush3.bf16.msra.mxu0 %v10889_v0 }
0x19c8   : > { %v8029_v26 = vpop.f32.mrb[244].mxu1 }
0x19c9   : > { %v10531_v43 = vpop.f32.mrb[245].mxu1 }
0x19ca   : > { %v8032_v55 = vpop.f32.mrb[246].mxu1 }
0x19cb   : > { %v8087_v24 = vpack.c.bf16 %v8032_v55, %v8029_v26  ;;  %v10532_v13 = vpop.f32.mrb[247].mxu1 }
0x19cc   : > { %v7982_v60 = vpop.f32.mrb[176].mxu0 }
0x19cd   : > { %v10525_v58 = vpop.f32.mrb[177].mxu0 }
0x19ce   : > { %v7985_v49 = vpop.f32.mrb[178].mxu0 }
0x19cf   : > { %v8086_v61 = vpack.c.bf16 %v7985_v49, %v7982_v60  ;;  %v10526_v29 = vpop.f32.mrb[179].mxu0 }
0x19d1   : > { %10546 = vmatmul.mubr.msk.bf16.gmra.mrb[72].mxu0 %vm1441_vm1, %v8086_v61 }
0x19d2   : > { %10549 = vmatprep.mubr.msk.bf16.mxu0 %vm1441_vm1, %v8087_v24 }
0x19d4   : > { %v8076_v37 = vpop.f32.mrb[180].mxu0 }
0x19d5   : > { %v10537_v9 = vpop.f32.mrb[181].mxu0 }
0x19d6   : > { %v8079_v44 = vpop.f32.mrb[182].mxu0 }
0x19d7   : > { %v8088_v16 = vpack.c.bf16 %v8079_v44, %v8076_v37  ;;  %v10538_v17 = vpop.f32.mrb[183].mxu0 }
0x19d9   : > { %10550 = vmatmul.mubr.msk.bf16.gmra.mrb[76].mxu0 %vm1441_vm1, %v8088_v16 }
0x1a63   : > { %v10543_v18 = vpop.f32.mrb[68].mxu0 }
0x1a64   : > { %v8150_v62 = vpop.f32.mrb[69].mxu0  ;;  %v8218_v4 = vadd.f32 %v10543_v18, %v9406_v21 }
0x1a65   : > { %v10544_v59 = vpop.f32.mrb[70].mxu0  ;;  %v8216_v47 = vadd.f32 %v9406_v21, %v8150_v62 }
0x1a66   : > { %v8219_v23 = vadd.f32 %v10544_v59, %v9406_v21  ;;  %v8153_v27 = vpop.f32.mrb[71].mxu0 }
0x1a67   : > { %v8217_v50 = vadd.f32 %v9406_v21, %v8153_v27 }
0x1a68   : > { %v8229_v54 = vpack.c.bf16 %v8219_v23, %v8218_v4 }
0x1a69   : > { %v8228_v40 = vpack.c.bf16 %v8217_v50, %v8216_v47 }
0x1a6b   : > { %10597 = vmatprep.mubr.bf16.mxu1 %v8228_v40 }
0x1a6c   : > { %10598 = vmatmul.mubr.bf16.vlgmr.msra.gmra.mrb[248].mxu1 %v8229_v54 }
0x1aa4   : > { %v10547_v8 = vpop.f32.mrb[72].mxu0 }
0x1aa5   : > { %v8166_v63 = vpop.f32.mrb[73].mxu0  ;;  %v8222_v22 = vadd.f32 %v10547_v8, %v9406_v21 }
0x1aa6   : > { %v10548_v14 = vpop.f32.mrb[74].mxu0  ;;  %v8220_v42 = vadd.f32 %v9406_v21, %v8166_v63 }
0x1aa7   : > { %v8223_v52 = vadd.f32 %v10548_v14, %v9406_v21  ;;  %v8169_v20 = vpop.f32.mrb[75].mxu0 }
0x1aa8   : > { %v8221_v36 = vadd.f32 %v9406_v21, %v8169_v20 }
0x1aa9   : > { %v8231_v39 = vpack.c.bf16 %v8223_v52, %v8222_v22 }
0x1aaa   : > { %v8230_v3 = vpack.c.bf16 %v8221_v36, %v8220_v42 }
0x1aac   : > { %v10551_v41 = vpop.f32.mrb[76].mxu0  ;;  %10601 = vmatprep.mubr.bf16.mxu1 %v8230_v3 }
0x1aad   : > { %v8182_v34 = vpop.f32.mrb[77].mxu0  ;;  %10602 = vmatmul.mubr.bf16.gmra.mrb[252].mxu1 %v8231_v39  ;;  %v8226_v10 = vadd.f32 %v10551_v41, %v9406_v21 }
0x1aae   : > { %v10552_v53 = vpop.f32.mrb[78].mxu0  ;;  %v8224_v25 = vadd.f32 %v9406_v21, %v8182_v34 }
0x1aaf   : > { %v8227_v56 = vadd.f32 %v10552_v53, %v9406_v21  ;;  %v8185_v7 = vpop.f32.mrb[79].mxu0 }
0x1ab0   : > { %v8225_v30 = vadd.f32 %v9406_v21, %v8185_v7  ;;  %v13933_v7 = vld [vmem:[%s917_s2] ss:$0 sm:$0xff]  ;;  %s14143_s2 = sld [smem:[#allocation43_spill]] (!%p9435_p9) }
0x1ab1   : > { %v8233_v38 = vpack.c.bf16 %v8227_v56, %v8226_v10 }
0x1ab2   : > { %v8232_v15 = vpack.c.bf16 %v8225_v30, %v8224_v25  ;;  %v13940_v30 = vld [vmem:[%s920_s30] ss:$0 sm:$0xff] }
0x1ab4   : > { %10605 = vmatprep.mubr.bf16.mxu1 %v8232_v15 }
0x1ab5   : > { %10606 = vmatmul.mubr.bf16.gmra.mrb[0].mxu1 %v8233_v38 }
0x1b3f   : > { %v10599_v12 = vpop.f32.mrb[248].mxu1 }
0x1b40   : > { %v8533_v2 = vmul.f32 %v10599_v12, %v9423_v31  ;;  %v8477_v48 = vpop.f32.mrb[249].mxu1 }
0x1b41   : > { %v8531_v11 = vmul.f32 %v9423_v31, %v8477_v48  ;;  %v10600_v6 = vpop.f32.mrb[250].mxu1 }
0x1b42   : > { %v8552_v45 = vadd.f32 %v9424_v19, %v8533_v2  ;;  %v8534_v26 = vmul.f32 %v10600_v6, %v9423_v31  ;;  %v8480_v43 = vpop.f32.mrb[251].mxu1 }
0x1b43   : > { %v8550_v55 = vadd.f32 %v9424_v19, %v8531_v11  ;;  %v8532_v24 = vmul.f32 %v9423_v31, %v8480_v43 }
0x1b44   : > { %v8553_v13 = vadd.f32 %v9424_v19, %v8534_v26  ;;  %v8564_v58 = vmax.f32 %v8552_v45, 0.0  ;;  %v11274_v26 = vld [vmem:[#allocation2 + $0x10] sm:$0xff] }
0x1b45   : > { %v8551_v60 = vadd.f32 %v9424_v19, %v8532_v24  ;;  %v8562_v61 = vmax.f32 %v8550_v55, 0.0  ;;  %v11275_v24 = vld [vmem:[#allocation2] sm:$0xff] }
0x1b46   : > { %v8565_v49 = vmax.f32 %v8553_v13, 0.0 }
0x1b47   : > { %v8563_v29 = vmax.f32 %v8551_v60, 0.0 }
0x1b48   : > { %v8575_v37 = vpack.c.bf16 %v8565_v49, %v8564_v58  ;;  %v11276_v58 = vld [vmem:[#allocation2 + $0x18] sm:$0xff] }
0x1b49   : > { %v8574_v9 = vpack.c.bf16 %v8563_v29, %v8562_v61  ;;  %v11277_v61 = vld [vmem:[#allocation2 + $0x8] sm:$0xff] }
0x1b4b   : > { %10625 = vmatprep.mubr.bf16.mxu0 %v8574_v9 }
0x1b4c   : > { %10626 = vmatmul.mubr.bf16.vlgmr.msra.gmra.mrb[184].mxu0 %v8575_v37 }
0x1b80   : > { %v10603_v44 = vpop.f32.mrb[252].mxu1 }
0x1b81   : > { %v8537_v16 = vmul.f32 %v10603_v44, %v9423_v31  ;;  %v8493_v17 = vpop.f32.mrb[253].mxu1 }
0x1b82   : > { %v8535_v57 = vmul.f32 %v9423_v31, %v8493_v17  ;;  %v10604_v28 = vpop.f32.mrb[254].mxu1 }
0x1b83   : > { %v8556_v33 = vadd.f32 %v9424_v19, %v8537_v16  ;;  %v8538_v46 = vmul.f32 %v10604_v28, %v9423_v31  ;;  %v8496_v35 = vpop.f32.mrb[255].mxu1 }
0x1b84   : > { %v8554_v51 = vadd.f32 %v9424_v19, %v8535_v57  ;;  %v8536_v1 = vmul.f32 %v9423_v31, %v8496_v35 }
0x1b85   : > { %v8557_v18 = vadd.f32 %v9424_v19, %v8538_v46  ;;  %v8568_v62 = vmax.f32 %v8556_v33, 0.0 }
0x1b86   : > { %v8555_v21 = vadd.f32 %v9424_v19, %v8536_v1  ;;  %v8566_v4 = vmax.f32 %v8554_v51, 0.0 }
0x1b87   : > { %v8569_v59 = vmax.f32 %v8557_v18, 0.0 }
0x1b88   : > { %v8567_v23 = vmax.f32 %v8555_v21, 0.0  ;;  %v10607_v27 = vpop.f32.mrb[0].mxu1 }
0x1b89   : > { %v8541_v47 = vmul.f32 %v10607_v27, %v9423_v31  ;;  %v8509_v50 = vpop.f32.mrb[1].mxu1  ;;  %v8577_v54 = vpack.c.bf16 %v8569_v59, %v8568_v62  ;;  %v11278_v62 = vld [vmem:[#allocation2 + $0x30] sm:$0xff] }
0x1b8a   : > { %v8539_v40 = vmul.f32 %v9423_v31, %v8509_v50  ;;  %v10608_v8 = vpop.f32.mrb[2].mxu1  ;;  %v8576_v63 = vpack.c.bf16 %v8567_v23, %v8566_v4  ;;  %v11279_v23 = vld [vmem:[#allocation2 + $0x20] sm:$0xff] }
0x1b8b   : > { %v8560_v14 = vadd.f32 %v9424_v19, %v8541_v47  ;;  %v8542_v22 = vmul.f32 %v10608_v8, %v9423_v31  ;;  %v8512_v52 = vpop.f32.mrb[3].mxu1 }
0x1b8c   : > { %v8558_v20 = vadd.f32 %v9424_v19, %v8539_v40  ;;  %v8540_v42 = vmul.f32 %v9423_v31, %v8512_v52  ;;  %10629 = vmatprep.mubr.bf16.mxu0 %v8576_v63 }
0x1b8d   : > { %v8561_v36 = vadd.f32 %v9424_v19, %v8542_v22  ;;  %10630 = vmatmul.mubr.bf16.gmra.mrb[188].mxu0 %v8577_v54  ;;  %v8572_v3 = vmax.f32 %v8560_v14, 0.0  ;;  %v11280_v54 = vld [vmem:[#allocation2 + $0x38] sm:$0xff]  ;;  %v11281_v14 = vld [vmem:[#allocation2 + $0x28] sm:$0xff] }
0x1b8e   : > { %v8559_v39 = vadd.f32 %v9424_v19, %v8540_v42  ;;  %v8570_v34 = vmax.f32 %v8558_v20, 0.0 }
0x1b8f   : > { %v8573_v41 = vmax.f32 %v8561_v36, 0.0 }
0x1b90   : > { %v8571_v53 = vmax.f32 %v8559_v39, 0.0 }
0x1b91   : > { %v8579_v10 = vpack.c.bf16 %v8573_v41, %v8572_v3 }
0x1b92   : > { %v8578_v56 = vpack.c.bf16 %v8571_v53, %v8570_v34 }
0x1b94   : > { %10633 = vmatprep.mubr.bf16.mxu0 %v8578_v56 }
0x1b95   : > { %10634 = vmatmul.mubr.bf16.gmra.mrb[192].mxu0 %v8579_v10 }
0x1c1f   : > { %v10627_v25 = vpop.f32.mrb[184].mxu0 }
0x1c20   : > { %v8734_v38 = vmul.f32 %v10627_v25, %v13933_v7  ;;  %v8678_v15 = vpop.f32.mrb[185].mxu0  ;;  %v11282_v25 = vld [vmem:[#allocation2 + $0x50] sm:$0xff] }
0x1c21   : > { %v8732_v5 = vmul.f32 %v13933_v7, %v8678_v15  ;;  %v10628_v32 = vpop.f32.mrb[186].mxu0 }
0x1c22   : > { %v8753_v0 = vadd.f32 %v13940_v30, %v8734_v38  ;;  %v8735_v31 = vmul.f32 %v10628_v32, %v13933_v7  ;;  %v8681_v12 = vpop.f32.mrb[187].mxu0 }
0x1c23   : > { %v8751_v19 = vadd.f32 %v13940_v30, %v8732_v5  ;;  %v8733_v2 = vmul.f32 %v13933_v7, %v8681_v12  ;;  %v11283_v5 = vld [vmem:[#allocation2 + $0x40] sm:$0xff] }
0x1c24   : > { %v8765_v48 = vmax.f32 %v8753_v0, 0.0  ;;  %v8754_v11 = vadd.f32 %v13940_v30, %v8735_v31  ;;  %v11284_v31 = vld [vmem:[#allocation2 + $0x58] sm:$0xff] }
0x1c25   : > { %v8763_v6 = vmax.f32 %v8751_v19, 0.0  ;;  %v8752_v45 = vadd.f32 %v13940_v30, %v8733_v2  ;;  %v11285_v19 = vld [vmem:[#allocation2 + $0x48] sm:$0xff] }
0x1c26   : > { %v13950_v43 = vadd.f32 %v11274_v26, %v8765_v48  ;;  %v8766_v55 = vmax.f32 %v8754_v11, 0.0 }
0x1c27   : > { %v13952_v13 = vadd.f32 %v11275_v24, %v8763_v6  ;;  %v8764_v60 = vmax.f32 %v8752_v45, 0.0 }
0x1c28   : > { %8789 = vst [vmem:[#allocation2 + $0x10] sm:$0xff] %v13950_v43  ;;  %v13955_v49 = vadd.f32 %v11276_v58, %v8766_v55 }
0x1c29   : > { %8787 = vst [vmem:[#allocation2] sm:$0xff] %v13952_v13  ;;  %v8776_v29 = vadd.f32 %v11277_v61, %v8764_v60 }
0x1c2a   : > { %8790 = vst [vmem:[#allocation2 + $0x18] sm:$0xff] %v13955_v49 }
0x1c2b   : > { %8788 = vst [vmem:[#allocation2 + $0x8] sm:$0xff] %v8776_v29 }
0x1c60   : > { %v10631_v37 = vpop.f32.mrb[188].mxu0 }
0x1c61   : > { %v8738_v9 = vmul.f32 %v10631_v37, %v13933_v7  ;;  %v8694_v44 = vpop.f32.mrb[189].mxu0 }
0x1c62   : > { %v8736_v16 = vmul.f32 %v13933_v7, %v8694_v44  ;;  %v10632_v17 = vpop.f32.mrb[190].mxu0 }
0x1c63   : > { %v8757_v57 = vadd.f32 %v13940_v30, %v8738_v9  ;;  %v8739_v28 = vmul.f32 %v10632_v17, %v13933_v7  ;;  %v8697_v33 = vpop.f32.mrb[191].mxu0 }
0x1c64   : > { %v8755_v46 = vadd.f32 %v13940_v30, %v8736_v16  ;;  %v8737_v35 = vmul.f32 %v13933_v7, %v8697_v33 }
0x1c65   : > { %v8769_v51 = vmax.f32 %v8757_v57, 0.0  ;;  %v8758_v1 = vadd.f32 %v13940_v30, %v8739_v28 }
0x1c66   : > { %v8767_v18 = vmax.f32 %v8755_v46, 0.0  ;;  %v8756_v21 = vadd.f32 %v13940_v30, %v8737_v35 }
0x1c67   : > { %v8781_v59 = vadd.f32 %v11278_v62, %v8769_v51  ;;  %v8770_v4 = vmax.f32 %v8758_v1, 0.0 }
0x1c68   : > { %v8779_v27 = vadd.f32 %v11279_v23, %v8767_v18  ;;  %v8768_v47 = vmax.f32 %v8756_v21, 0.0  ;;  %v10635_v50 = vpop.f32.mrb[192].mxu0 }
0x1c69   : > { %8793 = vst [vmem:[#allocation2 + $0x30] sm:$0xff] %v8781_v59  ;;  %v8782_v40 = vadd.f32 %v11280_v54, %v8770_v4  ;;  %v8742_v8 = vmul.f32 %v10635_v50, %v13933_v7  ;;  %v8710_v63 = vpop.f32.mrb[193].mxu0 }
0x1c6a   : > { %8791 = vst [vmem:[#allocation2 + $0x20] sm:$0xff] %v8779_v27  ;;  %v8780_v22 = vadd.f32 %v11281_v14, %v8768_v47  ;;  %v8740_v52 = vmul.f32 %v13933_v7, %v8710_v63  ;;  %v10636_v20 = vpop.f32.mrb[194].mxu0 }
0x1c6b   : > { %8794 = vst [vmem:[#allocation2 + $0x38] sm:$0xff] %v8782_v40  ;;  %v8761_v42 = vadd.f32 %v13940_v30, %v8742_v8  ;;  %v8743_v36 = vmul.f32 %v10636_v20, %v13933_v7  ;;  %v8713_v39 = vpop.f32.mrb[195].mxu0  ;;  %v8824_v11 = vadd.f32 (!%p9435_p9), %v8782_v40, %v8781_v59 }
0x1c6c   : > { %8792 = vst [vmem:[#allocation2 + $0x28] sm:$0xff] %v8780_v22  ;;  %v8759_v3 = vadd.f32 %v13940_v30, %v8740_v52  ;;  %v8741_v41 = vmul.f32 %v13933_v7, %v8713_v39  ;;  %v8803_v7 = vadd.f32 (!%p9435_p9), %v8776_v29, %v13952_v13  ;;  %v8817_v48 = vadd.f32 (!%p9435_p9), %v8780_v22, %v8779_v27  ;;  %v9436_v22 = vld [vmem:[%s14143_s2] ss:$0 sm:$0xff] (!%p9435_p9) }
0x1c6d   : > { %v8773_v34 = vmax.f32 %v8761_v42, 0.0  ;;  %v8762_v53 = vadd.f32 %v13940_v30, %v8743_v36  ;;  %v8825_v60 = vrot.slane (!%p9435_p9), %v8824_v11, 4 }
0x1c6e   : > { %v8771_v10 = vmax.f32 %v8759_v3, 0.0  ;;  %v8760_v56 = vadd.f32 %v13940_v30, %v8741_v41  ;;  %8802 = sbr.rel (%p9435_p9) target bundleno = 7452 (0x1d1c), region = 128  ;;  %v8810_v30 = vadd.f32 (!%p9435_p9), %v13955_v49, %v13950_v43  ;;  %v8804_v26 = vrot.slane (!%p9435_p9), %v8803_v7, 4 }
0x1c6f   : > { %v8785_v38 = vadd.f32 %v11282_v25, %v8773_v34  ;;  %v8774_v15 = vmax.f32 %v8762_v53, 0.0  ;;  %v8818_v24 = vrot.slane (!%p9435_p9), %v8817_v48, 4  ;;  %v8826_v16 = vadd.f32 (!%p9435_p9), %v8825_v60, %v8824_v11 }
0x1c70   : > { %v8783_v32 = vadd.f32 %v11283_v5, %v8771_v10  ;;  %v8772_v0 = vmax.f32 %v8760_v56, 0.0  ;;  %v8811_v55 = vrot.slane (!%p9435_p9), %v8810_v30, 4  ;;  %v8805_v37 = vadd.f32 (!%p9435_p9), %v8804_v26, %v8803_v7 }
0x1c71   : > { %8797 = vst [vmem:[#allocation2 + $0x50] sm:$0xff] %v8785_v38  ;;  %v8786_v12 = vadd.f32 %v11284_v31, %v8774_v15  ;;  %v8819_v44 = vadd.f32 (!%p9435_p9), %v8818_v24, %v8817_v48  ;;  %v8827_v43 = vrot.slane (!%p9435_p9), %v8826_v16, 2  ;;  %v9437_v48 = vld [vmem:[#allocation4] ss:$0 sm:$0xff] (!%p9435_p9) }
0x1c72   : > { %8795 = vst [vmem:[#allocation2 + $0x40] sm:$0xff] %v8783_v32  ;;  %v8784_v2 = vadd.f32 %v11285_v19, %v8772_v0  ;;  %v8812_v9 = vadd.f32 (!%p9435_p9), %v8811_v55, %v8810_v30  ;;  %v8806_v13 = vrot.slane (!%p9435_p9), %v8805_v37, 2 }
0x1c73   : > { %8798 = vst [vmem:[#allocation2 + $0x58] sm:$0xff] %v8786_v12  ;;  %v8838_v45 = vadd.f32 (!%p9435_p9), %v8786_v12, %v8785_v38  ;;  %v8820_v28 = vrot.slane (!%p9435_p9), %v8819_v44, 2  ;;  %v8828_v1 = vadd.f32 (!%p9435_p9), %v8827_v43, %v8826_v16 }
0x1c74   : > { %8796 = vst [vmem:[#allocation2 + $0x48] sm:$0xff] %v8784_v2  ;;  %v8831_v6 = vadd.f32 (!%p9435_p9), %v8784_v2, %v8783_v32  ;;  %v8813_v29 = vrot.slane (!%p9435_p9), %v8812_v9, 2  ;;  %v8807_v46 = vadd.f32 (!%p9435_p9), %v8806_v13, %v8805_v37 }
0x1c75   : > { %v8839_v61 = vrot.slane %v8838_v45, 4  ;;  %v8821_v51 = vadd.f32 %v8820_v28, %v8819_v44  ;;  %v8829_v23 = vrot.slane %v8828_v1, 1 }
0x1c76   : > { %v8832_v58 = vrot.slane %v8831_v6, 4  ;;  %v8814_v35 = vadd.f32 %v8813_v29, %v8812_v9  ;;  %v8808_v62 = vrot.slane %v8807_v46, 1 }
0x1c77   : > { %v8840_v57 = vadd.f32 %v8839_v61, %v8838_v45  ;;  %v8822_v4 = vrot.slane %v8821_v51, 1  ;;  %v8830_v8 = vadd.f32 %v8829_v23, %v8828_v1 }
0x1c78   : > { %v8833_v17 = vadd.f32 %v8832_v58, %v8831_v6  ;;  %v8815_v59 = vrot.slane %v8814_v35, 1  ;;  %v8809_v50 = vadd.f32 %v8808_v62, %v8807_v46 }
0x1c79   : > { %v8841_v33 = vrot.slane %v8840_v57, 2  ;;  %v8823_v40 = vadd.f32 %v8822_v4, %v8821_v51  ;;  %v8849_v36 = vmul.f32 0.0625, %v8830_v8 }
0x1c7a   : > { %v8834_v49 = vrot.slane %v8833_v17, 2  ;;  %v8816_v54 = vadd.f32 %v8815_v59, %v8814_v35  ;;  %v8846_v52 = vmul.f32 0.0625, %v8809_v50 }
0x1c7b   : > { %v8842_v21 = vadd.f32 %v8841_v33, %v8840_v57  ;;  %v8848_v42 = vmul.f32 0.0625, %v8823_v40  ;;  %v8862_v10 = vmul.f32 %v9436_v22, %v8849_v36 }
0x1c7c   : > { %v8835_v18 = vadd.f32 %v8834_v49, %v8833_v17  ;;  %v8847_v20 = vmul.f32 0.0625, %v8816_v54  ;;  %v8859_v41 = vmul.f32 %v9436_v22, %v8846_v52 }
0x1c7d   : > { %v8843_v47 = vrot.slane %v8842_v21, 1  ;;  %v8861_v53 = vmul.f32 %v9436_v22, %v8848_v42  ;;  %v8877_v5 = vrot.slane %v8862_v10, 5 }
0x1c7e   : > { %v8836_v27 = vrot.slane %v8835_v18, 1  ;;  %v8860_v34 = vmul.f32 %v9436_v22, %v8847_v20 }
0x1c7f   : > { %v8844_v14 = vadd.f32 %v8843_v47, %v8842_v21  ;;  %v8874_v15 = vrot.slane %v8861_v53, 6 }
0x1c80   : > { %v8837_v63 = vadd.f32 %v8836_v27, %v8835_v18  ;;  %v8871_v38 = vrot.slane %v8860_v34, 7 }
0x1c81   : > { %v8851_v3 = vmul.f32 0.0625, %v8844_v14 }
0x1c82   : > { %v8850_v39 = vmul.f32 0.0625, %v8837_v63  ;;  %v8873_v0 = vsel %vm8872_vm2, %v8871_v38, %v8859_v41 }
0x1c83   : > { %v8864_v25 = vmul.f32 %v9436_v22, %v8851_v3  ;;  %v8876_v12 = vsel %vm8875_vm3, %v8874_v15, %v8873_v0 }
0x1c84   : > { %v8863_v56 = vmul.f32 %v9436_v22, %v8850_v39  ;;  %v8879_v19 = vsel %vm8878_vm4, %v8877_v5, %v8876_v12 }
0x1c85   : > { %v8883_v31 = vrot.slane %v8864_v25, 3 }
0x1c86   : > { %v8880_v32 = vrot.slane %v8863_v56, 4 }
0x1c88   : > { %v8882_v2 = vsel %vm8881_vm5, %v8880_v32, %v8879_v19 }
0x1c89   : > { %v8885_v7 = vsel %vm8884_vm6, %v8883_v31, %v8882_v2 }
0x1c8a   : > { %v8888_v30 = vsel %vm8887_vm7, %v8885_v7, 0.0 }
0x1c8b   : > { %8889 = vadd.xlane.f32.xlu0 %v8888_v30 }
0x1d18   : > { %v8890_v11 = vpop.xlane.xlu0 %8889 }
0x1d19   : > { %v8898_v6 = vadd.f32 %v9437_v48, %v8890_v11 }
0x1d1b   : > { %8900 = vst.msk [vmem:[%s14144_s19] sm:$0x3f] %vm8899_vm8, %v8898_v6 }
0x1d1c PF: > { %s14145_s28 = sld [smem:[#allocation28_spill]]  ;;  %s14146_s30 = sld [smem:[#allocation25_spill]] }
0x1d1d   : > { %s14147_s0 = sld [smem:[#allocation26_spill]]  ;;  %s14148_s19 = sld [smem:[#allocation30_spill]] }
0x1d1e   : > { %s14149_s1 = sld [smem:[#allocation27_spill]]  ;;  %s14150_s20 = sld [smem:[#allocation29_spill]] }
0x1d22   : > { %s42_s21 = sadd.s32 1, %s14145_s28  }
0x1d23   : > { %p39_p4 = scmp.ge.s32.totalorder %s42_s21, 4  }
0x1d25   :  { %41 = sbr.rel (!%p39_p4) target bundleno = 27 (0x1b), region = 244 }
0x1d2c   :  { %8920 = vsyncpa [#allocation6], 1 }
0x1d2d   :  { %8922 = vsyncpa [#allocation6 + $0x1], 1 }
0x1d2e   :  { %8923 = vsyncpa [#allocation8], 1 }
0x1d2f   :  { %8925 = vsyncpa [#allocation8 + $0x1], 1 }
0x1d30   :  { %8926 = vsyncpa [#allocation11], 1 }
0x1d31   :  { %8928 = vsyncpa [#allocation11 + $0x1], 1 }
0x1d32   :  { %8929 = vsyncpa [#allocation14], 1 }
0x1d33   :  { %8931 = vsyncpa [#allocation14 + $0x1], 1 }
0x1d34   :  { %8932 = vsyncmov [#allocation3] }
0x1d37   :  { %s8933_s13 = vpop.sfrf %8932 }
0x1d38   :  { %p9441_p8 = scmp.ne.s32.totalorder %s8933_s13, 0 }
0x1d3a   :  { %8937 = shalt.err (%p9441_p8)  }

</bundles_post_ra>
